<compile_context>
chip_gen: v7x
topology: tpu7x:2x2x1
jax: 0.10.0
libtpu: 0.0.40
codegen_flags: <defaults>
</compile_context>

<pallas_src>
import functools
import math

import jax
import jax.numpy as jnp
from jax.experimental import pallas as pl
from jax.experimental.pallas import tpu as pltpu

LEAKY_SLOPE = 0.01   # torch.nn.LeakyReLU default negative_slope
LANE = 128
SUBLANE = 8


def _round_up(x, m):
  return ((x + m - 1) // m) * m


def _ceil_div(a, b):
  return -(-a // b)


def _tap_rect(kh, kw, padding, stride, src_h, src_w, dst_h, dst_w):
  """Dest rect (consumer output coords) covered by tap (kh, kw).

  Output pixel (ho, wo) is covered iff its source pixel
  (ho*stride + kh - padding, wo*stride + kw - padding) lies inside the
  producer extent (src_h, src_w).  Pure static Python arithmetic.
  """
  r_lo = max(0, _ceil_div(padding - kh, stride))
  r_hi = min(dst_h, (src_h - 1 + padding - kh) // stride + 1)
  c_lo = max(0, _ceil_div(padding - kw, stride))
  c_hi = min(dst_w, (src_w - 1 + padding - kw) // stride + 1)
  return r_lo, r_hi, c_lo, c_hi


def _zero_pad_ring(buf, rects, dst_h, dst_w, k_real):
  """Zero only the padding ring of the consumer's read window.

  `rects` are the (full-extent) per-tap write rects; their intersection is the
  always-written interior box, so everything else inside [0,dst_h)x[0,dst_w)
  is conv zero-padding that must read as exact zeros.  At most 4 thin strip
  stores; emits nothing when padding == 0 (write rects cover the window).
  """
  r_lo = max(r[0] for r in rects)
  r_hi = min(r[1] for r in rects)
  c_lo = max(r[2] for r in rects)
  c_hi = min(r[3] for r in rects)
  if r_lo >= r_hi or c_lo >= c_hi:          # degenerate: clear the whole window
    strips = [(0, dst_h, 0, dst_w)]
  else:
    strips = [(0, r_lo, 0, dst_w), (r_hi, dst_h, 0, dst_w),
              (r_lo, r_hi, 0, c_lo), (r_lo, r_hi, c_hi, dst_w)]
  for a, b, c, d in strips:
    if a < b and c < d:
      buf[a:b, c:d, :] = jnp.zeros((b - a, d - c, k_real), buf.dtype)


def _fused_conv_stack_kernel(*refs, depth, kh_kw, padding, c_in, k_real,
                             in_hw, layer_cfgs, chunk_rows):
  """Runs the whole conv stack for one batch element entirely in VMEM.

  refs = (x_ref, w_0..w_{d-1}, b_0..b_{d-1}, o_ref, buf0[, buf1])

  x_ref : (1, H, W, k_real)   input with channels replicated per tap so every
                              staging store is lane-aligned (k_real = KH*KW*Cin)
  w_i   : (k_real, N_i)       tap-packed weights; intermediate layers are
                              column-replicated per tap (N_i = k_real) so the
                              matmul emits the next layer's im2col lane layout;
                              last layer has N = out_channels
  b_i   : (1, N_i)            f32 bias (replicated to match)
  o_ref : (1, Ho, Wo, Cout)   lane-packed NHWC output tile
  buf_j : (Ho_max, Woc_max, k_real)  im2col ping-pong buffers
  """
  KH, KW = kh_kw
  P = padding
  H0, W0 = in_hw
  taps = [(kh, kw) for kh in range(KH) for kw in range(KW)]

  x_ref = refs[0]
  w_refs = refs[1:1 + depth]
  b_refs = refs[1 + depth:1 + 2 * depth]
  o_ref = refs[1 + 2 * depth]
  bufs = list(refs[2 + 2 * depth:])

  # ---- Stage layer 0's im2col rows from the tap-replicated input -----------
  Ho0, Wo0, _Woc0, s0 = layer_cfgs[0]
  rects0 = [_tap_rect(kh, kw, P, s0, H0, W0, Ho0, Wo0) for kh, kw in taps]
  _zero_pad_ring(bufs[0], rects0, Ho0, Wo0, k_real)
  for t, (kh, kw) in enumerate(taps):
    r_lo, r_hi, c_lo, c_hi = rects0[t]
    if r_lo >= r_hi or c_lo >= c_hi:
      continue
    nr, nc = r_hi - r_lo, c_hi - c_lo
    sr, sc = r_lo * s0 + kh - P, c_lo * s0 + kw - P
    l0 = t * c_in
    if s0 == 1:
      val = x_ref[0, sr:sr + nr, sc:sc + nc, l0:l0 + c_in]
    else:
      # Rare path: stride only applies to layer 0 (see TODO in header).
      val = x_ref[0, pl.ds(sr, nr, s0), pl.ds(sc, nc, s0), l0:l0 + c_in]
    bufs[0][r_lo:r_hi, c_lo:c_hi, l0:l0 + c_in] = val.astype(bufs[0].dtype)

  # ---- Conv (+ LeakyReLU) layers: one MXU matmul per row-chunk -------------
  for i in range(depth):
    Ho, Wo, Wo_c, _s = layer_cfgs[i]
    w_ref, b_ref = w_refs[i], b_refs[i]
    src = bufs[i % len(bufs)]
    last = i == depth - 1
    if not last:
      Hn, Wn = layer_cfgs[i + 1][0], layer_cfgs[i + 1][1]
      dst = bufs[(i + 1) % len(bufs)]
      rects = [_tap_rect(kh, kw, P, 1, Ho, Wo, Hn, Wn) for kh, kw in taps]
      _zero_pad_ring(dst, rects, Hn, Wn, k_real)

    ch = chunk_rows[i]
    for h0 in range(0, Ho, ch):
      h1 = min(Ho, h0 + ch)
      m = (h1 - h0) * Wo_c
      lhs = src[h0:h1, 0:Wo_c, :].reshape(m, k_real)
      y = jnp.dot(lhs, w_ref[...], preferred_element_type=jnp.float32)
      y = y + b_ref[...]                       # f32 bias add on the VPU
      if last:
        y3 = y.reshape(h1 - h0, Wo_c, y.shape[-1])
        o_ref[0, h0:h1, :, :] = y3[:, 0:Wo, :].astype(o_ref.dtype)
      else:
        y = jnp.where(y > 0, y, LEAKY_SLOPE * y)
        y3 = y.reshape(h1 - h0, Wo_c, y.shape[-1]).astype(dst.dtype)
        # Scatter this chunk into the next layer's im2col buffer: one small
        # store per tap; source/dest lane offsets match by construction.
        for t, (kh, kw) in enumerate(taps):
          dr_lo = max(0, h0 + P - kh)
          dr_hi = min(Hn, h1 + P - kh)
          dc_lo = max(0, P - kw)
          dc_hi = min(Wn, Wo + P - kw)
          if dr_lo >= dr_hi or dc_lo >= dc_hi:
            continue
          sr = dr_lo + kh - P - h0
          sc = dc_lo + kw - P
          l0 = t * c_in
          dst[dr_lo:dr_hi, dc_lo:dc_hi, l0:l0 + c_in] = y3[
              sr:sr + (dr_hi - dr_lo), sc:sc + (dc_hi - dc_lo), l0:l0 + c_in]


def _conv_stack_pallas(xr, packed_w, packed_b, *, strides, kernel_size,
                       padding, c_in, k_real, out_channels, buf_dtype,
                       out_dtype):
  """Fused conv stack.  xr: (N, H, W, k_real) tap-replicated NHWC input."""
  N, H, W, _ = xr.shape
  depth = len(packed_w)
  KH = KW = kernel_size
  P = padding

  # Static per-layer geometry, row-chunking and scratch sizing.
  layer_cfgs, chunk_rows = [], []
  hb_max, wb_max = SUBLANE, SUBLANE
  Hi, Wi = H, W
  for i in range(depth):
    s = strides[i]
    Ho = (Hi + 2 * P - KH) // s + 1
    Wo = (Wi + 2 * P - KW) // s + 1
    assert Ho > 0 and Wo > 0, "conv output collapsed to zero size"
    Wo_c = _round_up(Wo, SUBLANE)       # junk columns are computed + discarded
    layer_cfgs.append((Ho, Wo, Wo_c, s))
    ch = max(1, 128 // Wo_c)            # ~128-row matmul chunks (vreg budget)
    ch = max(ch, _ceil_div(Ho, 16))     # bound the unrolled chunk count
    chunk_rows.append(min(ch, Ho))
    hb_max = max(hb_max, Ho)
    wb_max = max(wb_max, Wo_c)
    Hi, Wi = Ho, Wo
  Ho_l, Wo_l = layer_cfgs[-1][0], layer_cfgs[-1][1]
  n_bufs = 1 if depth == 1 else 2

  kernel = functools.partial(
      _fused_conv_stack_kernel, depth=depth, kh_kw=(KH, KW), padding=P,
      c_in=c_in, k_real=k_real, in_hw=(H, W), layer_cfgs=tuple(layer_cfgs),
      chunk_rows=tuple(chunk_rows))

  in_specs = [pl.BlockSpec((1, H, W, k_real), lambda n: (n, 0, 0, 0))]
  for w in packed_w:
    in_specs.append(pl.BlockSpec(w.shape, lambda n: (0, 0)))
  for b in packed_b:
    in_specs.append(pl.BlockSpec(b.shape, lambda n: (0, 0)))
  out_specs = pl.BlockSpec((1, Ho_l, Wo_l, out_channels),
                           lambda n: (n, 0, 0, 0))
  scratch_shapes = [pltpu.VMEM((hb_max, wb_max, k_real), buf_dtype)
                    for _ in range(n_bufs)]

  # VMEM budget: im2col buffers + double-buffered I/O blocks + (tiny) weights,
  # sized against the actual chip generation (v7x has 64 MiB/core).
  lp = lambda n: _round_up(n, LANE)
  sp = lambda n: _round_up(n, SUBLANE)
  need = n_bufs * hb_max * wb_max * lp(k_real) * jnp.dtype(buf_dtype).itemsize
  need += 2 * H * sp(W) * lp(k_real) * jnp.dtype(xr.dtype).itemsize
  need += 2 * Ho_l * sp(Wo_l) * lp(out_channels) * jnp.dtype(out_dtype).itemsize
  need += 2 * sum(sp(w.shape[0]) * lp(w.shape[1]) * w.dtype.itemsize
                  for w in packed_w)
  need += 2 * sum(SUBLANE * lp(b.shape[1]) * 4 for b in packed_b)
  cap = 64 * 1024 * 1024                # conservative fallback (v7x per-core)
  try:
    cap = int(getattr(pltpu.get_tpu_info(), "vmem_capacity_bytes", cap))
  except Exception:
    pass
  vmem_limit = int(min(max(2 * need + (4 << 20), 32 << 20), int(0.85 * cap)))
  vmem_limit = max(vmem_limit, 16 << 20)

  return pl.pallas_call(
      kernel,
      out_shape=jax.ShapeDtypeStruct((N, Ho_l, Wo_l, out_channels), out_dtype),
      grid_spec=pltpu.PrefetchScalarGridSpec(
          num_scalar_prefetch=0,
          grid=(N,),
          in_specs=in_specs,
          out_specs=out_specs,
          scratch_shapes=scratch_shapes),
      compiler_params=pltpu.CompilerParams(
          dimension_semantics=("parallel",),
          vmem_limit_bytes=vmem_limit),
  )(xr, *packed_w, *packed_b)


class ConvolutionLayerPallas:
  """JAX/Pallas port of agent.model.modules.convolution_layer.ConvolutionLayer."""

  def __init__(self, depth, in_channels, out_channels, kernel_size,
               stride=1, padding=0, key=None, compute_dtype=jnp.float32):
    # compute_dtype=jnp.bfloat16 stores weights and the activation ping-pong
    # buffers in bf16 (f32 accumulation/bias/LeakyReLU kept) for v6e/v7x MXU
    # rate; default f32 matches the PyTorch reference numerics.
    if key is None:
      key = jax.random.PRNGKey(0)
    assert depth >= 1
    self.depth = depth
    self.in_channels = in_channels
    self.out_channels = out_channels
    self.kernel_size = kernel_size
    self.padding = padding
    self.compute_dtype = compute_dtype
    k = kernel_size
    self.k_real = k * k * in_channels      # tap-packed contraction depth

    self.raw_params = []   # (weight OIHW, bias, stride) — for the reference
    self.packed_w = []     # (k_real, N_i) tap-packed (and tap-replicated) weights
    self.packed_b = []     # (1, N_i) f32 bias
    self.strides = []
    for i in range(depth):
      s = stride if i == 0 else 1
      o = out_channels if i == depth - 1 else in_channels
      key, wk, bk = jax.random.split(key, 3)
      fan_in = in_channels * k * k
      w_bound = math.sqrt(6.0 / fan_in)    # Kaiming-uniform-style init
      w = jax.random.uniform(wk, (o, in_channels, k, k), jnp.float32,
                             -w_bound, w_bound)
      b_bound = 1.0 / math.sqrt(fan_in)
      b = jax.random.uniform(bk, (o,), jnp.float32, -b_bound, b_bound)
      self.raw_params.append((w, b, s))
      self.strides.append(s)

      # One-time packing: OIHW -> (KH*KW*Cin, O), rows tap-major / channel-minor
      # to match the im2col lane layout.
      base = jnp.transpose(w, (2, 3, 1, 0)).reshape(self.k_real, o)
      if i < depth - 1:
        # Replicate output columns per tap of the NEXT layer so the matmul
        # emits its im2col lane layout directly (writeback stores then need
        # no lane relayout).  o == in_channels here, so N_i == k_real.
        packed = jnp.tile(base, (1, k * k))
        bias = jnp.tile(b, k * k)
      else:
        packed = base
        bias = b
      self.packed_w.append(packed.astype(compute_dtype))
      self.packed_b.append(bias.reshape(1, -1).astype(jnp.float32))

  def __call__(self, img_nchw):
    N, C, H, W = img_nchw.shape
    assert C == self.in_channels
    x = jnp.transpose(img_nchw, (0, 2, 3, 1))                    # NCHW -> NHWC
    # Replicate channels across the KH*KW taps so every staging store in the
    # kernel is already lane-aligned with the im2col layout.
    xr = jnp.tile(x, (1, 1, 1, self.kernel_size ** 2)).astype(self.compute_dtype)
    out = _conv_stack_pallas(
        xr, self.packed_w, self.packed_b,
        strides=tuple(self.strides), kernel_size=self.kernel_size,
        padding=self.padding, c_in=self.in_channels, k_real=self.k_real,
        out_channels=self.out_channels, buf_dtype=self.compute_dtype,
        out_dtype=img_nchw.dtype)
    return jnp.transpose(out, (0, 3, 1, 2))                      # NHWC -> NCHW


def _reference_forward(module, img_nchw):
  """Pure-JAX (lax.conv) reference replicating the PyTorch forward."""
  x = img_nchw
  for i, (w, b, s) in enumerate(module.raw_params):
    x = jax.lax.conv_general_dilated(
        x, w, window_strides=(s, s),
        padding=[(module.padding, module.padding)] * 2,
        dimension_numbers=("NCHW", "OIHW", "NCHW"))
    x = x + b.reshape(1, -1, 1, 1)
    if i < module.depth - 1:
      x = jnp.where(x > 0, x, LEAKY_SLOPE * x)
  return x


if __name__ == "__main__":
  key = jax.random.PRNGKey(0)
  k_img, k_p1, k_p2, k_p3 = jax.random.split(key, 4)

  img = jax.random.normal(k_img, (2, 4, 16, 16), jnp.float32)

  # Primary config: depth=2, in=4, out=8, k=3, stride=1, padding=1.
  layer = ConvolutionLayerPallas(2, 4, 8, 3, stride=1, padding=1, key=k_p1)
  out = jax.block_until_ready(layer(img))
  assert out.shape == (2, 8, 16, 16), out.shape
  ref = jax.block_until_ready(_reference_forward(layer, img))
  assert jnp.allclose(out, ref, atol=1e-3, rtol=1e-3), (
      float(jnp.max(jnp.abs(out - ref))))

  # depth=3, padding=0: shrinking extents exercise ping-pong buffer reuse,
  # non-multiple-of-8 output widths and the "no ring zeroing" fast path.
  layer2 = ConvolutionLayerPallas(3, 4, 8, 3, stride=1, padding=0, key=k_p2)
  out2 = jax.block_until_ready(layer2(img))
  assert out2.shape == (2, 8, 10, 10), out2.shape
  ref2 = jax.block_until_ready(_reference_forward(layer2, img))
  assert jnp.allclose(out2, ref2, atol=1e-3, rtol=1e-3), (
      float(jnp.max(jnp.abs(out2 - ref2))))

  # Depth-1 config: single conv, no activation, single im2col buffer.
  layer3 = ConvolutionLayerPallas(1, 4, 8, 3, stride=1, padding=1, key=k_p3)
  out3 = jax.block_until_ready(layer3(img))
  assert out3.shape == (2, 8, 16, 16), out3.shape
  ref3 = jax.block_until_ready(_reference_forward(layer3, img))
  assert jnp.allclose(out3, ref3, atol=1e-3, rtol=1e-3), (
      float(jnp.max(jnp.abs(out3 - ref3))))

  print("KERNEL_OK")
</pallas_src>

<mosaic_0001>
module attributes {stable_mosaic.version = 11 : i64} {
  func.func @_fused_conv_stack_kernel(%arg0: i32, %arg1: memref<1x16x16x36xf32, #tpu.memory_space<vmem>>, %arg2: memref<36x36xf32, #tpu.memory_space<vmem>>, %arg3: memref<36x8xf32, #tpu.memory_space<vmem>>, %arg4: memref<1x36xf32, #tpu.memory_space<vmem>>, %arg5: memref<1x8xf32, #tpu.memory_space<vmem>>, %arg6: memref<1x16x16x8xf32, #tpu.memory_space<vmem>>, %arg7: memref<16x16x36xf32, #tpu.memory_space<vmem>>, %arg8: memref<16x16x36xf32, #tpu.memory_space<vmem>>) attributes {dimension_semantics = [#tpu.dimension_semantics<parallel>], iteration_bounds = array<i64: 2>, scalar_prefetch = 0 : i64, scratch_operands = 2 : i64, tpu.core_type = #tpu.core_type<tc>, window_params = [{transform_indices = @transform_0, window_bounds = array<i64: 1, 16, 16, 36>}, {pipeline_mode = #tpu.pipeline_mode<synchronous>, transform_indices = @transform_1, window_bounds = array<i64: 36, 36>}, {pipeline_mode = #tpu.pipeline_mode<synchronous>, transform_indices = @transform_2, window_bounds = array<i64: 36, 8>}, {pipeline_mode = #tpu.pipeline_mode<synchronous>, transform_indices = @transform_3, window_bounds = array<i64: 1, 36>}, {pipeline_mode = #tpu.pipeline_mode<synchronous>, transform_indices = @transform_4, window_bounds = array<i64: 1, 8>}, {transform_indices = @transform_5, window_bounds = array<i64: 1, 16, 16, 8>}]} {
    %cst = arith.constant 0.000000e+00 : f32
    %0 = vector.broadcast %cst : f32 to vector<1x16x36xf32>
    %c0 = arith.constant 0 : index
    %c0_0 = arith.constant 0 : index
    %c0_1 = arith.constant 0 : index
    %1 = vector.load %arg7[%c0, %c0_0, %c0_1] : memref<16x16x36xf32, #tpu.memory_space<vmem>>, vector<1x16x36xf32>
    tpu.vector_store %arg7[%c0, %c0_0, %c0_1], %0 {strides = array<i32>} : memref<16x16x36xf32, #tpu.memory_space<vmem>>, vector<1x16x36xf32>,
    %cst_2 = arith.constant 0.000000e+00 : f32
    %2 = vector.broadcast %cst_2 : f32 to vector<1x16x36xf32>
    %c15 = arith.constant 15 : index
    %c0_3 = arith.constant 0 : index
    %c0_4 = arith.constant 0 : index
    %3 = vector.load %arg7[%c15, %c0_3, %c0_4] : memref<16x16x36xf32, #tpu.memory_space<vmem>>, vector<1x16x36xf32>
    tpu.vector_store %arg7[%c15, %c0_3, %c0_4], %2 {strides = array<i32>} : memref<16x16x36xf32, #tpu.memory_space<vmem>>, vector<1x16x36xf32>,
    %cst_5 = arith.constant 0.000000e+00 : f32
    %4 = vector.broadcast %cst_5 : f32 to vector<14x1x36xf32>
    %c1 = arith.constant 1 : index
    %c0_6 = arith.constant 0 : index
    %c0_7 = arith.constant 0 : index
    %5 = vector.load %arg7[%c1, %c0_6, %c0_7] : memref<16x16x36xf32, #tpu.memory_space<vmem>>, vector<14x1x36xf32>
    tpu.vector_store %arg7[%c1, %c0_6, %c0_7], %4 {strides = array<i32>} : memref<16x16x36xf32, #tpu.memory_space<vmem>>, vector<14x1x36xf32>,
    %cst_8 = arith.constant 0.000000e+00 : f32
    %6 = vector.broadcast %cst_8 : f32 to vector<14x1x36xf32>
    %c1_9 = arith.constant 1 : index
    %c15_10 = arith.constant 15 : index
    %c0_11 = arith.constant 0 : index
    %7 = vector.load %arg7[%c1_9, %c15_10, %c0_11] : memref<16x16x36xf32, #tpu.memory_space<vmem>>, vector<14x1x36xf32>
    tpu.vector_store %arg7[%c1_9, %c15_10, %c0_11], %6 {strides = array<i32>} : memref<16x16x36xf32, #tpu.memory_space<vmem>>, vector<14x1x36xf32>,
    %c0_12 = arith.constant 0 : index
    %c0_13 = arith.constant 0 : index
    %c0_14 = arith.constant 0 : index
    %c0_15 = arith.constant 0 : index
    %8 = vector.load %arg1[%c0_12, %c0_13, %c0_14, %c0_15] : memref<1x16x16x36xf32, #tpu.memory_space<vmem>>, vector<1x15x15x4xf32>
    %9 = vector.shape_cast %8 : vector<1x15x15x4xf32> to vector<15x15x4xf32>
    %c1_16 = arith.constant 1 : index
    %c1_17 = arith.constant 1 : index
    %c0_18 = arith.constant 0 : index
    %10 = vector.load %arg7[%c1_16, %c1_17, %c0_18] : memref<16x16x36xf32, #tpu.memory_space<vmem>>, vector<15x15x4xf32>
    tpu.vector_store %arg7[%c1_16, %c1_17, %c0_18], %9 {strides = array<i32>} : memref<16x16x36xf32, #tpu.memory_space<vmem>>, vector<15x15x4xf32>,
    %c0_19 = arith.constant 0 : index
    %c0_20 = arith.constant 0 : index
    %c0_21 = arith.constant 0 : index
    %c4 = arith.constant 4 : index
    %11 = vector.load %arg1[%c0_19, %c0_20, %c0_21, %c4] : memref<1x16x16x36xf32, #tpu.memory_space<vmem>>, vector<1x15x16x4xf32>
    %12 = vector.shape_cast %11 : vector<1x15x16x4xf32> to vector<15x16x4xf32>
    %c1_22 = arith.constant 1 : index
    %c0_23 = arith.constant 0 : index
    %c4_24 = arith.constant 4 : index
    %13 = vector.load %arg7[%c1_22, %c0_23, %c4_24] : memref<16x16x36xf32, #tpu.memory_space<vmem>>, vector<15x16x4xf32>
    tpu.vector_store %arg7[%c1_22, %c0_23, %c4_24], %12 {strides = array<i32>} : memref<16x16x36xf32, #tpu.memory_space<vmem>>, vector<15x16x4xf32>,
    %c0_25 = arith.constant 0 : index
    %c0_26 = arith.constant 0 : index
    %c1_27 = arith.constant 1 : index
    %c8 = arith.constant 8 : index
    %14 = vector.load %arg1[%c0_25, %c0_26, %c1_27, %c8] : memref<1x16x16x36xf32, #tpu.memory_space<vmem>>, vector<1x15x15x4xf32>
    %15 = vector.shape_cast %14 : vector<1x15x15x4xf32> to vector<15x15x4xf32>
    %c1_28 = arith.constant 1 : index
    %c0_29 = arith.constant 0 : index
    %c8_30 = arith.constant 8 : index
    %16 = vector.load %arg7[%c1_28, %c0_29, %c8_30] : memref<16x16x36xf32, #tpu.memory_space<vmem>>, vector<15x15x4xf32>
    tpu.vector_store %arg7[%c1_28, %c0_29, %c8_30], %15 {strides = array<i32>} : memref<16x16x36xf32, #tpu.memory_space<vmem>>, vector<15x15x4xf32>,
    %c0_31 = arith.constant 0 : index
    %c0_32 = arith.constant 0 : index
    %c0_33 = arith.constant 0 : index
    %c12 = arith.constant 12 : index
    %17 = vector.load %arg1[%c0_31, %c0_32, %c0_33, %c12] : memref<1x16x16x36xf32, #tpu.memory_space<vmem>>, vector<1x16x15x4xf32>
    %18 = vector.shape_cast %17 : vector<1x16x15x4xf32> to vector<16x15x4xf32>
    %c0_34 = arith.constant 0 : index
    %c1_35 = arith.constant 1 : index
    %c12_36 = arith.constant 12 : index
    %19 = vector.load %arg7[%c0_34, %c1_35, %c12_36] : memref<16x16x36xf32, #tpu.memory_space<vmem>>, vector<16x15x4xf32>
    tpu.vector_store %arg7[%c0_34, %c1_35, %c12_36], %18 {strides = array<i32>} : memref<16x16x36xf32, #tpu.memory_space<vmem>>, vector<16x15x4xf32>,
    %c0_37 = arith.constant 0 : index
    %c0_38 = arith.constant 0 : index
    %c0_39 = arith.constant 0 : index
    %c16 = arith.constant 16 : index
    %20 = vector.load %arg1[%c0_37, %c0_38, %c0_39, %c16] : memref<1x16x16x36xf32, #tpu.memory_space<vmem>>, vector<1x16x16x4xf32>
    %21 = vector.shape_cast %20 : vector<1x16x16x4xf32> to vector<16x16x4xf32>
    %c0_40 = arith.constant 0 : index
    %c0_41 = arith.constant 0 : index
    %c16_42 = arith.constant 16 : index
    %22 = vector.load %arg7[%c0_40, %c0_41, %c16_42] : memref<16x16x36xf32, #tpu.memory_space<vmem>>, vector<16x16x4xf32>
    tpu.vector_store %arg7[%c0_40, %c0_41, %c16_42], %21 {strides = array<i32>} : memref<16x16x36xf32, #tpu.memory_space<vmem>>, vector<16x16x4xf32>,
    %c0_43 = arith.constant 0 : index
    %c0_44 = arith.constant 0 : index
    %c1_45 = arith.constant 1 : index
    %c20 = arith.constant 20 : index
    %23 = vector.load %arg1[%c0_43, %c0_44, %c1_45, %c20] : memref<1x16x16x36xf32, #tpu.memory_space<vmem>>, vector<1x16x15x4xf32>
    %24 = vector.shape_cast %23 : vector<1x16x15x4xf32> to vector<16x15x4xf32>
    %c0_46 = arith.constant 0 : index
    %c0_47 = arith.constant 0 : index
    %c20_48 = arith.constant 20 : index
    %25 = vector.load %arg7[%c0_46, %c0_47, %c20_48] : memref<16x16x36xf32, #tpu.memory_space<vmem>>, vector<16x15x4xf32>
    tpu.vector_store %arg7[%c0_46, %c0_47, %c20_48], %24 {strides = array<i32>} : memref<16x16x36xf32, #tpu.memory_space<vmem>>, vector<16x15x4xf32>,
    %c0_49 = arith.constant 0 : index
    %c1_50 = arith.constant 1 : index
    %c0_51 = arith.constant 0 : index
    %c24 = arith.constant 24 : index
    %26 = vector.load %arg1[%c0_49, %c1_50, %c0_51, %c24] : memref<1x16x16x36xf32, #tpu.memory_space<vmem>>, vector<1x15x15x4xf32>
    %27 = vector.shape_cast %26 : vector<1x15x15x4xf32> to vector<15x15x4xf32>
    %c0_52 = arith.constant 0 : index
    %c1_53 = arith.constant 1 : index
    %c24_54 = arith.constant 24 : index
    %28 = vector.load %arg7[%c0_52, %c1_53, %c24_54] : memref<16x16x36xf32, #tpu.memory_space<vmem>>, vector<15x15x4xf32>
    tpu.vector_store %arg7[%c0_52, %c1_53, %c24_54], %27 {strides = array<i32>} : memref<16x16x36xf32, #tpu.memory_space<vmem>>, vector<15x15x4xf32>,
    %c0_55 = arith.constant 0 : index
    %c1_56 = arith.constant 1 : index
    %c0_57 = arith.constant 0 : index
    %c28 = arith.constant 28 : index
    %29 = vector.load %arg1[%c0_55, %c1_56, %c0_57, %c28] : memref<1x16x16x36xf32, #tpu.memory_space<vmem>>, vector<1x15x16x4xf32>
    %30 = vector.shape_cast %29 : vector<1x15x16x4xf32> to vector<15x16x4xf32>
    %c0_58 = arith.constant 0 : index
    %c0_59 = arith.constant 0 : index
    %c28_60 = arith.constant 28 : index
    %31 = vector.load %arg7[%c0_58, %c0_59, %c28_60] : memref<16x16x36xf32, #tpu.memory_space<vmem>>, vector<15x16x4xf32>
    tpu.vector_store %arg7[%c0_58, %c0_59, %c28_60], %30 {strides = array<i32>} : memref<16x16x36xf32, #tpu.memory_space<vmem>>, vector<15x16x4xf32>,
    %c0_61 = arith.constant 0 : index
    %c1_62 = arith.constant 1 : index
    %c1_63 = arith.constant 1 : index
    %c32 = arith.constant 32 : index
    %32 = vector.load %arg1[%c0_61, %c1_62, %c1_63, %c32] : memref<1x16x16x36xf32, #tpu.memory_space<vmem>>, vector<1x15x15x4xf32>
    %33 = vector.shape_cast %32 : vector<1x15x15x4xf32> to vector<15x15x4xf32>
    %c0_64 = arith.constant 0 : index
    %c0_65 = arith.constant 0 : index
    %c32_66 = arith.constant 32 : index
    %34 = vector.load %arg7[%c0_64, %c0_65, %c32_66] : memref<16x16x36xf32, #tpu.memory_space<vmem>>, vector<15x15x4xf32>
    tpu.vector_store %arg7[%c0_64, %c0_65, %c32_66], %33 {strides = array<i32>} : memref<16x16x36xf32, #tpu.memory_space<vmem>>, vector<15x15x4xf32>,
    %cst_67 = arith.constant 0.000000e+00 : f32
    %35 = vector.broadcast %cst_67 : f32 to vector<1x16x36xf32>
    %c0_68 = arith.constant 0 : index
    %c0_69 = arith.constant 0 : index
    %c0_70 = arith.constant 0 : index
    %36 = vector.load %arg8[%c0_68, %c0_69, %c0_70] : memref<16x16x36xf32, #tpu.memory_space<vmem>>, vector<1x16x36xf32>
    tpu.vector_store %arg8[%c0_68, %c0_69, %c0_70], %35 {strides = array<i32>} : memref<16x16x36xf32, #tpu.memory_space<vmem>>, vector<1x16x36xf32>,
    %cst_71 = arith.constant 0.000000e+00 : f32
    %37 = vector.broadcast %cst_71 : f32 to vector<1x16x36xf32>
    %c15_72 = arith.constant 15 : index
    %c0_73 = arith.constant 0 : index
    %c0_74 = arith.constant 0 : index
    %38 = vector.load %arg8[%c15_72, %c0_73, %c0_74] : memref<16x16x36xf32, #tpu.memory_space<vmem>>, vector<1x16x36xf32>
    tpu.vector_store %arg8[%c15_72, %c0_73, %c0_74], %37 {strides = array<i32>} : memref<16x16x36xf32, #tpu.memory_space<vmem>>, vector<1x16x36xf32>,
    %cst_75 = arith.constant 0.000000e+00 : f32
    %39 = vector.broadcast %cst_75 : f32 to vector<14x1x36xf32>
    %c1_76 = arith.constant 1 : index
    %c0_77 = arith.constant 0 : index
    %c0_78 = arith.constant 0 : index
    %40 = vector.load %arg8[%c1_76, %c0_77, %c0_78] : memref<16x16x36xf32, #tpu.memory_space<vmem>>, vector<14x1x36xf32>
    tpu.vector_store %arg8[%c1_76, %c0_77, %c0_78], %39 {strides = array<i32>} : memref<16x16x36xf32, #tpu.memory_space<vmem>>, vector<14x1x36xf32>,
    %cst_79 = arith.constant 0.000000e+00 : f32
    %41 = vector.broadcast %cst_79 : f32 to vector<14x1x36xf32>
    %c1_80 = arith.constant 1 : index
    %c15_81 = arith.constant 15 : index
    %c0_82 = arith.constant 0 : index
    %42 = vector.load %arg8[%c1_80, %c15_81, %c0_82] : memref<16x16x36xf32, #tpu.memory_space<vmem>>, vector<14x1x36xf32>
    tpu.vector_store %arg8[%c1_80, %c15_81, %c0_82], %41 {strides = array<i32>} : memref<16x16x36xf32, #tpu.memory_space<vmem>>, vector<14x1x36xf32>,
    %c0_83 = arith.constant 0 : index
    %c0_84 = arith.constant 0 : index
    %c0_85 = arith.constant 0 : index
    %43 = vector.load %arg7[%c0_83, %c0_84, %c0_85] : memref<16x16x36xf32, #tpu.memory_space<vmem>>, vector<8x16x36xf32>
    %44 = vector.shape_cast %43 : vector<8x16x36xf32> to vector<128x36xf32>
    %c0_86 = arith.constant 0 : index
    %c0_87 = arith.constant 0 : index
    %45 = vector.load %arg2[%c0_86, %c0_87] : memref<36x36xf32, #tpu.memory_space<vmem>>, vector<36x36xf32>
    %cst_88 = arith.constant dense<0.000000e+00> : vector<128x36xf32>
    %46 = tpu.matmul %44, %45, %cst_88 {dimension_numbers = #tpu.dot_dimension_numbers<[1], [0], [0], [1], [0, 0, 1, 1], [], []>} : vector<128x36xf32>, vector<36x36xf32>, vector<128x36xf32> -> vector<128x36xf32>
    %c0_89 = arith.constant 0 : index
    %c0_90 = arith.constant 0 : index
    %47 = vector.load %arg4[%c0_89, %c0_90] : memref<1x36xf32, #tpu.memory_space<vmem>>, vector<1x36xf32>
    %48 = vector.broadcast %47 : vector<1x36xf32> to vector<128x36xf32>
    %49 = arith.addf %46, %48 : vector<128x36xf32>
    %cst_91 = arith.constant 0.000000e+00 : f32
    %50 = vector.broadcast %cst_91 : f32 to vector<128x36xf32>
    %51 = arith.cmpf ogt, %49, %50 : vector<128x36xf32>
    %cst_92 = arith.constant 0.00999999977 : f32
    %52 = vector.broadcast %cst_92 : f32 to vector<128x36xf32>
    %53 = arith.mulf %52, %49 : vector<128x36xf32>
    %54 = arith.select %51, %49, %53 : vector<128x36xi1>, vector<128x36xf32>
    %55 = vector.shape_cast %54 : vector<128x36xf32> to vector<8x16x36xf32>
    %56 = vector.extract_strided_slice %55 {offsets = [0, 0, 0], sizes = [8, 15, 4], strides = [1, 1, 1]} : vector<8x16x36xf32> to vector<8x15x4xf32>
    %c1_93 = arith.constant 1 : index
    %c1_94 = arith.constant 1 : index
    %c0_95 = arith.constant 0 : index
    %57 = vector.load %arg8[%c1_93, %c1_94, %c0_95] : memref<16x16x36xf32, #tpu.memory_space<vmem>>, vector<8x15x4xf32>
    tpu.vector_store %arg8[%c1_93, %c1_94, %c0_95], %56 {strides = array<i32>} : memref<16x16x36xf32, #tpu.memory_space<vmem>>, vector<8x15x4xf32>,
    %58 = vector.extract_strided_slice %55 {offsets = [0, 0, 4], sizes = [8, 16, 4], strides = [1, 1, 1]} : vector<8x16x36xf32> to vector<8x16x4xf32>
    %c1_96 = arith.constant 1 : index
    %c0_97 = arith.constant 0 : index
    %c4_98 = arith.constant 4 : index
    %59 = vector.load %arg8[%c1_96, %c0_97, %c4_98] : memref<16x16x36xf32, #tpu.memory_space<vmem>>, vector<8x16x4xf32>
    tpu.vector_store %arg8[%c1_96, %c0_97, %c4_98], %58 {strides = array<i32>} : memref<16x16x36xf32, #tpu.memory_space<vmem>>, vector<8x16x4xf32>,
    %60 = vector.extract_strided_slice %55 {offsets = [0, 1, 8], sizes = [8, 15, 4], strides = [1, 1, 1]} : vector<8x16x36xf32> to vector<8x15x4xf32>
    %c1_99 = arith.constant 1 : index
    %c0_100 = arith.constant 0 : index
    %c8_101 = arith.constant 8 : index
    %61 = vector.load %arg8[%c1_99, %c0_100, %c8_101] : memref<16x16x36xf32, #tpu.memory_space<vmem>>, vector<8x15x4xf32>
    tpu.vector_store %arg8[%c1_99, %c0_100, %c8_101], %60 {strides = array<i32>} : memref<16x16x36xf32, #tpu.memory_space<vmem>>, vector<8x15x4xf32>,
    %62 = vector.extract_strided_slice %55 {offsets = [0, 0, 12], sizes = [8, 15, 4], strides = [1, 1, 1]} : vector<8x16x36xf32> to vector<8x15x4xf32>
    %c0_102 = arith.constant 0 : index
    %c1_103 = arith.constant 1 : index
    %c12_104 = arith.constant 12 : index
    %63 = vector.load %arg8[%c0_102, %c1_103, %c12_104] : memref<16x16x36xf32, #tpu.memory_space<vmem>>, vector<8x15x4xf32>
    tpu.vector_store %arg8[%c0_102, %c1_103, %c12_104], %62 {strides = array<i32>} : memref<16x16x36xf32, #tpu.memory_space<vmem>>, vector<8x15x4xf32>,
    %64 = vector.extract_strided_slice %55 {offsets = [0, 0, 16], sizes = [8, 16, 4], strides = [1, 1, 1]} : vector<8x16x36xf32> to vector<8x16x4xf32>
    %c0_105 = arith.constant 0 : index
    %c0_106 = arith.constant 0 : index
    %c16_107 = arith.constant 16 : index
    %65 = vector.load %arg8[%c0_105, %c0_106, %c16_107] : memref<16x16x36xf32, #tpu.memory_space<vmem>>, vector<8x16x4xf32>
    tpu.vector_store %arg8[%c0_105, %c0_106, %c16_107], %64 {strides = array<i32>} : memref<16x16x36xf32, #tpu.memory_space<vmem>>, vector<8x16x4xf32>,
    %66 = vector.extract_strided_slice %55 {offsets = [0, 1, 20], sizes = [8, 15, 4], strides = [1, 1, 1]} : vector<8x16x36xf32> to vector<8x15x4xf32>
    %c0_108 = arith.constant 0 : index
    %c0_109 = arith.constant 0 : index
    %c20_110 = arith.constant 20 : index
    %67 = vector.load %arg8[%c0_108, %c0_109, %c20_110] : memref<16x16x36xf32, #tpu.memory_space<vmem>>, vector<8x15x4xf32>
    tpu.vector_store %arg8[%c0_108, %c0_109, %c20_110], %66 {strides = array<i32>} : memref<16x16x36xf32, #tpu.memory_space<vmem>>, vector<8x15x4xf32>,
    %68 = vector.extract_strided_slice %55 {offsets = [1, 0, 24], sizes = [7, 15, 4], strides = [1, 1, 1]} : vector<8x16x36xf32> to vector<7x15x4xf32>
    %c0_111 = arith.constant 0 : index
    %c1_112 = arith.constant 1 : index
    %c24_113 = arith.constant 24 : index
    %69 = vector.load %arg8[%c0_111, %c1_112, %c24_113] : memref<16x16x36xf32, #tpu.memory_space<vmem>>, vector<7x15x4xf32>
    tpu.vector_store %arg8[%c0_111, %c1_112, %c24_113], %68 {strides = array<i32>} : memref<16x16x36xf32, #tpu.memory_space<vmem>>, vector<7x15x4xf32>,
    %70 = vector.extract_strided_slice %55 {offsets = [1, 0, 28], sizes = [7, 16, 4], strides = [1, 1, 1]} : vector<8x16x36xf32> to vector<7x16x4xf32>
    %c0_114 = arith.constant 0 : index
    %c0_115 = arith.constant 0 : index
    %c28_116 = arith.constant 28 : index
    %71 = vector.load %arg8[%c0_114, %c0_115, %c28_116] : memref<16x16x36xf32, #tpu.memory_space<vmem>>, vector<7x16x4xf32>
    tpu.vector_store %arg8[%c0_114, %c0_115, %c28_116], %70 {strides = array<i32>} : memref<16x16x36xf32, #tpu.memory_space<vmem>>, vector<7x16x4xf32>,
    %72 = vector.extract_strided_slice %55 {offsets = [1, 1, 32], sizes = [7, 15, 4], strides = [1, 1, 1]} : vector<8x16x36xf32> to vector<7x15x4xf32>
    %c0_117 = arith.constant 0 : index
    %c0_118 = arith.constant 0 : index
    %c32_119 = arith.constant 32 : index
    %73 = vector.load %arg8[%c0_117, %c0_118, %c32_119] : memref<16x16x36xf32, #tpu.memory_space<vmem>>, vector<7x15x4xf32>
    tpu.vector_store %arg8[%c0_117, %c0_118, %c32_119], %72 {strides = array<i32>} : memref<16x16x36xf32, #tpu.memory_space<vmem>>, vector<7x15x4xf32>,
    %c8_120 = arith.constant 8 : index
    %c0_121 = arith.constant 0 : index
    %c0_122 = arith.constant 0 : index
    %74 = vector.load %arg7[%c8_120, %c0_121, %c0_122] : memref<16x16x36xf32, #tpu.memory_space<vmem>>, vector<8x16x36xf32>
    %75 = vector.shape_cast %74 : vector<8x16x36xf32> to vector<128x36xf32>
    %c0_123 = arith.constant 0 : index
    %c0_124 = arith.constant 0 : index
    %76 = vector.load %arg2[%c0_123, %c0_124] : memref<36x36xf32, #tpu.memory_space<vmem>>, vector<36x36xf32>
    %cst_125 = arith.constant dense<0.000000e+00> : vector<128x36xf32>
    %77 = tpu.matmul %75, %76, %cst_125 {dimension_numbers = #tpu.dot_dimension_numbers<[1], [0], [0], [1], [0, 0, 1, 1], [], []>} : vector<128x36xf32>, vector<36x36xf32>, vector<128x36xf32> -> vector<128x36xf32>
    %c0_126 = arith.constant 0 : index
    %c0_127 = arith.constant 0 : index
    %78 = vector.load %arg4[%c0_126, %c0_127] : memref<1x36xf32, #tpu.memory_space<vmem>>, vector<1x36xf32>
    %79 = vector.broadcast %78 : vector<1x36xf32> to vector<128x36xf32>
    %80 = arith.addf %77, %79 : vector<128x36xf32>
    %cst_128 = arith.constant 0.000000e+00 : f32
    %81 = vector.broadcast %cst_128 : f32 to vector<128x36xf32>
    %82 = arith.cmpf ogt, %80, %81 : vector<128x36xf32>
    %cst_129 = arith.constant 0.00999999977 : f32
    %83 = vector.broadcast %cst_129 : f32 to vector<128x36xf32>
    %84 = arith.mulf %83, %80 : vector<128x36xf32>
    %85 = arith.select %82, %80, %84 : vector<128x36xi1>, vector<128x36xf32>
    %86 = vector.shape_cast %85 : vector<128x36xf32> to vector<8x16x36xf32>
    %87 = vector.extract_strided_slice %86 {offsets = [0, 0, 0], sizes = [7, 15, 4], strides = [1, 1, 1]} : vector<8x16x36xf32> to vector<7x15x4xf32>
    %c9 = arith.constant 9 : index
    %c1_130 = arith.constant 1 : index
    %c0_131 = arith.constant 0 : index
    %88 = vector.load %arg8[%c9, %c1_130, %c0_131] : memref<16x16x36xf32, #tpu.memory_space<vmem>>, vector<7x15x4xf32>
    tpu.vector_store %arg8[%c9, %c1_130, %c0_131], %87 {strides = array<i32>} : memref<16x16x36xf32, #tpu.memory_space<vmem>>, vector<7x15x4xf32>,
    %89 = vector.extract_strided_slice %86 {offsets = [0, 0, 4], sizes = [7, 16, 4], strides = [1, 1, 1]} : vector<8x16x36xf32> to vector<7x16x4xf32>
    %c9_132 = arith.constant 9 : index
    %c0_133 = arith.constant 0 : index
    %c4_134 = arith.constant 4 : index
    %90 = vector.load %arg8[%c9_132, %c0_133, %c4_134] : memref<16x16x36xf32, #tpu.memory_space<vmem>>, vector<7x16x4xf32>
    tpu.vector_store %arg8[%c9_132, %c0_133, %c4_134], %89 {strides = array<i32>} : memref<16x16x36xf32, #tpu.memory_space<vmem>>, vector<7x16x4xf32>,
    %91 = vector.extract_strided_slice %86 {offsets = [0, 1, 8], sizes = [7, 15, 4], strides = [1, 1, 1]} : vector<8x16x36xf32> to vector<7x15x4xf32>
    %c9_135 = arith.constant 9 : index
    %c0_136 = arith.constant 0 : index
    %c8_137 = arith.constant 8 : index
    %92 = vector.load %arg8[%c9_135, %c0_136, %c8_137] : memref<16x16x36xf32, #tpu.memory_space<vmem>>, vector<7x15x4xf32>
    tpu.vector_store %arg8[%c9_135, %c0_136, %c8_137], %91 {strides = array<i32>} : memref<16x16x36xf32, #tpu.memory_space<vmem>>, vector<7x15x4xf32>,
    %93 = vector.extract_strided_slice %86 {offsets = [0, 0, 12], sizes = [8, 15, 4], strides = [1, 1, 1]} : vector<8x16x36xf32> to vector<8x15x4xf32>
    %c8_138 = arith.constant 8 : index
    %c1_139 = arith.constant 1 : index
    %c12_140 = arith.constant 12 : index
    %94 = vector.load %arg8[%c8_138, %c1_139, %c12_140] : memref<16x16x36xf32, #tpu.memory_space<vmem>>, vector<8x15x4xf32>
    tpu.vector_store %arg8[%c8_138, %c1_139, %c12_140], %93 {strides = array<i32>} : memref<16x16x36xf32, #tpu.memory_space<vmem>>, vector<8x15x4xf32>,
    %95 = vector.extract_strided_slice %86 {offsets = [0, 0, 16], sizes = [8, 16, 4], strides = [1, 1, 1]} : vector<8x16x36xf32> to vector<8x16x4xf32>
    %c8_141 = arith.constant 8 : index
    %c0_142 = arith.constant 0 : index
    %c16_143 = arith.constant 16 : index
    %96 = vector.load %arg8[%c8_141, %c0_142, %c16_143] : memref<16x16x36xf32, #tpu.memory_space<vmem>>, vector<8x16x4xf32>
    tpu.vector_store %arg8[%c8_141, %c0_142, %c16_143], %95 {strides = array<i32>} : memref<16x16x36xf32, #tpu.memory_space<vmem>>, vector<8x16x4xf32>,
    %97 = vector.extract_strided_slice %86 {offsets = [0, 1, 20], sizes = [8, 15, 4], strides = [1, 1, 1]} : vector<8x16x36xf32> to vector<8x15x4xf32>
    %c8_144 = arith.constant 8 : index
    %c0_145 = arith.constant 0 : index
    %c20_146 = arith.constant 20 : index
    %98 = vector.load %arg8[%c8_144, %c0_145, %c20_146] : memref<16x16x36xf32, #tpu.memory_space<vmem>>, vector<8x15x4xf32>
    tpu.vector_store %arg8[%c8_144, %c0_145, %c20_146], %97 {strides = array<i32>} : memref<16x16x36xf32, #tpu.memory_space<vmem>>, vector<8x15x4xf32>,
    %99 = vector.extract_strided_slice %86 {offsets = [0, 0, 24], sizes = [8, 15, 4], strides = [1, 1, 1]} : vector<8x16x36xf32> to vector<8x15x4xf32>
    %c7 = arith.constant 7 : index
    %c1_147 = arith.constant 1 : index
    %c24_148 = arith.constant 24 : index
    %100 = vector.load %arg8[%c7, %c1_147, %c24_148] : memref<16x16x36xf32, #tpu.memory_space<vmem>>, vector<8x15x4xf32>
    tpu.vector_store %arg8[%c7, %c1_147, %c24_148], %99 {strides = array<i32>} : memref<16x16x36xf32, #tpu.memory_space<vmem>>, vector<8x15x4xf32>,
    %101 = vector.extract_strided_slice %86 {offsets = [0, 0, 28], sizes = [8, 16, 4], strides = [1, 1, 1]} : vector<8x16x36xf32> to vector<8x16x4xf32>
    %c7_149 = arith.constant 7 : index
    %c0_150 = arith.constant 0 : index
    %c28_151 = arith.constant 28 : index
    %102 = vector.load %arg8[%c7_149, %c0_150, %c28_151] : memref<16x16x36xf32, #tpu.memory_space<vmem>>, vector<8x16x4xf32>
    tpu.vector_store %arg8[%c7_149, %c0_150, %c28_151], %101 {strides = array<i32>} : memref<16x16x36xf32, #tpu.memory_space<vmem>>, vector<8x16x4xf32>,
    %103 = vector.extract_strided_slice %86 {offsets = [0, 1, 32], sizes = [8, 15, 4], strides = [1, 1, 1]} : vector<8x16x36xf32> to vector<8x15x4xf32>
    %c7_152 = arith.constant 7 : index
    %c0_153 = arith.constant 0 : index
    %c32_154 = arith.constant 32 : index
    %104 = vector.load %arg8[%c7_152, %c0_153, %c32_154] : memref<16x16x36xf32, #tpu.memory_space<vmem>>, vector<8x15x4xf32>
    tpu.vector_store %arg8[%c7_152, %c0_153, %c32_154], %103 {strides = array<i32>} : memref<16x16x36xf32, #tpu.memory_space<vmem>>, vector<8x15x4xf32>,
    %c0_155 = arith.constant 0 : index
    %c0_156 = arith.constant 0 : index
    %c0_157 = arith.constant 0 : index
    %105 = vector.load %arg8[%c0_155, %c0_156, %c0_157] : memref<16x16x36xf32, #tpu.memory_space<vmem>>, vector<8x16x36xf32>
    %106 = vector.shape_cast %105 : vector<8x16x36xf32> to vector<128x36xf32>
    %c0_158 = arith.constant 0 : index
    %c0_159 = arith.constant 0 : index
    %107 = vector.load %arg3[%c0_158, %c0_159] : memref<36x8xf32, #tpu.memory_space<vmem>>, vector<36x8xf32>
    %cst_160 = arith.constant dense<0.000000e+00> : vector<128x8xf32>
    %108 = tpu.matmul %106, %107, %cst_160 {dimension_numbers = #tpu.dot_dimension_numbers<[1], [0], [0], [1], [0, 0, 1, 1], [], []>} : vector<128x36xf32>, vector<36x8xf32>, vector<128x8xf32> -> vector<128x8xf32>
    %c0_161 = arith.constant 0 : index
    %c0_162 = arith.constant 0 : index
    %109 = vector.load %arg5[%c0_161, %c0_162] : memref<1x8xf32, #tpu.memory_space<vmem>>, vector<1x8xf32>
    %110 = vector.broadcast %109 : vector<1x8xf32> to vector<128x8xf32>
    %111 = arith.addf %108, %110 : vector<128x8xf32>
    %112 = vector.shape_cast %111 : vector<128x8xf32> to vector<8x16x8xf32>
    %c0_163 = arith.constant 0 : index
    %c0_164 = arith.constant 0 : index
    %c0_165 = arith.constant 0 : index
    %c0_166 = arith.constant 0 : index
    %113 = vector.load %arg6[%c0_163, %c0_164, %c0_165, %c0_166] : memref<1x16x16x8xf32, #tpu.memory_space<vmem>>, vector<1x8x16x8xf32>
    %114 = vector.shape_cast %113 : vector<1x8x16x8xf32> to vector<8x16x8xf32>
    %115 = vector.shape_cast %112 : vector<8x16x8xf32> to vector<1x8x16x8xf32>
    tpu.vector_store %arg6[%c0_163, %c0_164, %c0_165, %c0_166], %115 {strides = array<i32>} : memref<1x16x16x8xf32, #tpu.memory_space<vmem>>, vector<1x8x16x8xf32>,
    %c8_167 = arith.constant 8 : index
    %c0_168 = arith.constant 0 : index
    %c0_169 = arith.constant 0 : index
    %116 = vector.load %arg8[%c8_167, %c0_168, %c0_169] : memref<16x16x36xf32, #tpu.memory_space<vmem>>, vector<8x16x36xf32>
    %117 = vector.shape_cast %116 : vector<8x16x36xf32> to vector<128x36xf32>
    %c0_170 = arith.constant 0 : index
    %c0_171 = arith.constant 0 : index
    %118 = vector.load %arg3[%c0_170, %c0_171] : memref<36x8xf32, #tpu.memory_space<vmem>>, vector<36x8xf32>
    %cst_172 = arith.constant dense<0.000000e+00> : vector<128x8xf32>
    %119 = tpu.matmul %117, %118, %cst_172 {dimension_numbers = #tpu.dot_dimension_numbers<[1], [0], [0], [1], [0, 0, 1, 1], [], []>} : vector<128x36xf32>, vector<36x8xf32>, vector<128x8xf32> -> vector<128x8xf32>
    %c0_173 = arith.constant 0 : index
    %c0_174 = arith.constant 0 : index
    %120 = vector.load %arg5[%c0_173, %c0_174] : memref<1x8xf32, #tpu.memory_space<vmem>>, vector<1x8xf32>
    %121 = vector.broadcast %120 : vector<1x8xf32> to vector<128x8xf32>
    %122 = arith.addf %119, %121 : vector<128x8xf32>
    %123 = vector.shape_cast %122 : vector<128x8xf32> to vector<8x16x8xf32>
    %c0_175 = arith.constant 0 : index
    %c8_176 = arith.constant 8 : index
    %c0_177 = arith.constant 0 : index
    %c0_178 = arith.constant 0 : index
    %124 = vector.load %arg6[%c0_175, %c8_176, %c0_177, %c0_178] : memref<1x16x16x8xf32, #tpu.memory_space<vmem>>, vector<1x8x16x8xf32>
    %125 = vector.shape_cast %124 : vector<1x8x16x8xf32> to vector<8x16x8xf32>
    %126 = vector.shape_cast %123 : vector<8x16x8xf32> to vector<1x8x16x8xf32>
    tpu.vector_store %arg6[%c0_175, %c8_176, %c0_177, %c0_178], %126 {strides = array<i32>} : memref<1x16x16x8xf32, #tpu.memory_space<vmem>>, vector<1x8x16x8xf32>,
    return
  }
  func.func @transform_0(%arg0: i32) -> (i32, i32, i32, i32) {
    %c0_i32 = arith.constant 0 : i32
    %c0_i32_0 = arith.constant 0 : i32
    %c0_i32_1 = arith.constant 0 : i32
    %c0_i32_2 = arith.constant 0 : i32
    return %arg0, %c0_i32, %c0_i32_0, %c0_i32_1 : i32, i32, i32, i32
  }
  func.func @transform_1(%arg0: i32) -> (i32, i32) {
    %c0_i32 = arith.constant 0 : i32
    %c0_i32_0 = arith.constant 0 : i32
    %c0_i32_1 = arith.constant 0 : i32
    return %c0_i32, %c0_i32_0 : i32, i32
  }
  func.func @transform_2(%arg0: i32) -> (i32, i32) {
    %c0_i32 = arith.constant 0 : i32
    %c0_i32_0 = arith.constant 0 : i32
    %c0_i32_1 = arith.constant 0 : i32
    return %c0_i32, %c0_i32_0 : i32, i32
  }
  func.func @transform_3(%arg0: i32) -> (i32, i32) {
    %c0_i32 = arith.constant 0 : i32
    %c0_i32_0 = arith.constant 0 : i32
    %c0_i32_1 = arith.constant 0 : i32
    return %c0_i32, %c0_i32_0 : i32, i32
  }
  func.func @transform_4(%arg0: i32) -> (i32, i32) {
    %c0_i32 = arith.constant 0 : i32
    %c0_i32_0 = arith.constant 0 : i32
    %c0_i32_1 = arith.constant 0 : i32
    return %c0_i32, %c0_i32_0 : i32, i32
  }
  func.func @transform_5(%arg0: i32) -> (i32, i32, i32, i32) {
    %c0_i32 = arith.constant 0 : i32
    %c0_i32_0 = arith.constant 0 : i32
    %c0_i32_1 = arith.constant 0 : i32
    %c0_i32_2 = arith.constant 0 : i32
    return %arg0, %c0_i32, %c0_i32_0, %c0_i32_1 : i32, i32, i32, i32
  }
}

</mosaic_0001>

<bundles_post_ra>
// kernel: tpu_custom_call.1
= control target key start
LH: loop header
LB: loop body
LE: loop exit
PB: predicated region body
PF: predicated region fallthrough
CT: control target
= control target key end

     0   :  { %10 = vsyncpa [#allocation5], 0  ;;  %s4150_s0 = inlined_call_operand.hbm [shape: f32[2,16,16,36], index: 0, kind: input, shape index: {}]   ;;  %s4151_s1 = inlined_call_operand.vmem [shape: f32[36,36], index: 1, kind: input, shape index: {}]   ;;  %s4152_s2 = inlined_call_operand.vmem [shape: f32[36,8], index: 2, kind: input, shape index: {}]   ;;  %s4153_s3 = inlined_call_operand.vmem [shape: f32[1,36], index: 3, kind: input, shape index: {}]   ;;  %s4154_s4 = inlined_call_operand.vmem [shape: f32[1,8], index: 4, kind: input, shape index: {}]   ;;  %s4155_s5 = inlined_call_operand.vmem [shape: f32[2,16,16,8], index: 5, kind: output, shape index: {}]  }
   0x1   :  { %12 = vsyncpa [#allocation5 + $0x1], 0  ;;  %s2846_s18 = smov 0   ;;  %s2848_s19 = smov 0  }
   0x2   :  { %s2850_s20 = smov 0   ;;  %s2852_s21 = smov 0  }
   0x3 LB: > { %s2865_s22 = sadd.s32 4294967295, %s2810_s21   ;;  %s2868_s23 = sadd.s32 1, %s2810_s21   ;;  %s2810_s21 = sphi %s2852_s21, %s4363_s21   ;;  %s2806_s20 = sphi %s2850_s20, %s4362_s20   ;;  %s2802_s19 = sphi %s2848_s19, %s4361_s19   ;;  %s2798_s18 = sphi %s2846_s18, %s4360_s18  }
   0x4   : > { %s22_s24 = ssub.s32 %s2810_s21, %s2868_s23  ;;  %s25_s25 = sadd.s32 1, %s2806_s20 }
   0x5   : > { %p23_p0 = scmp.eq.s32.totalorder %s22_s24, 0  ;;  %p32_p1 = scmp.ne.s32.totalorder %s2806_s20, %s2802_s19 }
   0x6   : > { %p33_p2 = scmp.eq.s32.totalorder %s2810_s21, 0  ;;  %p38_p3 = scmp.ne.s32.totalorder %s2802_s19, %s2798_s18 }
   0x7   : > { %s2878_s26 = scalar_select %p23_p0, %s2806_s20, %s25_s25  }
   0x8   : > { %p34_p4 = por %p33_p2, %p32_p1  ;;  %p39_p5 = scmp.eq.s32.totalorder %s2865_s22, 0 }
   0x9   : > { %p2710_p6 = scmp.lt.s32.totalorder %s2810_s21, 2  ;;  %s184_s28 = sand.u32 1, %s2806_s20  }
   0xa   : > { %p2882_p7 = por %p39_p5, %p38_p3  ;;  %s2263_s29 = sshll.u32 %s184_s28, 8 }
   0xb   : > { %s2450_s30 = sshll.u32 %s2810_s21, 12  ;;  %s188_s9 = scalar_lea.vmem [#allocation4], %s2263_s29 }
   0xc   : > { %s2891_s8 = scalar_lea.hbm %s4150_s0, %s2450_s30  ;;  %s195_s10 = sshll.u32 %s188_s9, 4  ;;  %s2893_s10 = int_to_ptr.vmem [resolvable:$true] %s195_s10 }
   0xd   : > { %p2895_p8 = pnand %p2710_p6, %p34_p4  ;;  %s2900_s12 = scalar_lea.sflag [#allocation5], %s184_s28 }
   0xe   : > { %s2746_s13 = scalar_lea.hbm %s2891_s8, 4096  ;;  %s2751_s16 = scalar_lea.hbm %s4150_s0, 8192 }
   0xf   : > { %p2747_p10 = scmp.ne.s32.totalorder %s2891_s8, %s2746_s13  ;;  %p2748_p11 = pneg %p2895_p8 }
  0x10   : > { %p2752_p0 = scmp.lt.u32.totalorder %s2891_s8, %s4150_s0  ;;  %p2753_p1 = scmp.lt.u32.totalorder %s2751_s16, %s2746_s13 }
  0x11   : > { %p2749_p12 = pnand %p2748_p11, %p2747_p10  ;;  %p2755_p3 = scmp.lt.u32.totalorder %s2746_s13, %s2891_s8 }
  0x12   : > { %p2754_p2 = por %p2753_p1, %p2752_p0 }
  0x13   : > { %p2750_p13 = pneg %p2749_p12 }
  0x14   : > { %p2756_p4 = por %p2755_p3, %p2754_p2 }
  0x16   : > { %p2757_p5 = pnand %p2756_p4, %p2750_p13 }
  0x18   : > { %2760 = shalt.err (!%p2757_p5)
}
  0x19   : > { %s2761_s24 = scalar_lea.vmem %s2893_s10, 4096  ;;  %s2812_s25 = smov [#allocation4]  }
  0x1a   : > { %p2762_p6 = scmp.ne.s32.totalorder %s2893_s10, %s2761_s24  ;;  %s2766_s28 = sshll.u32 %s2812_s25, 4  ;;  %s2767_s28 = int_to_ptr.vmem [resolvable:$false] %s2766_s28 }
  0x1b   : > { %s2768_s29 = scalar_lea.vmem %s2767_s28, 8192  ;;  %p2769_p9 = scmp.lt.s32.totalorder %s2893_s10, %s2767_s28 }
  0x1c   : > { %p2764_p10 = pnand %p2762_p6, %p2748_p11  ;;  %p2770_p0 = scmp.lt.s32.totalorder %s2768_s29, %s2761_s24 }
  0x1e   : > { %p2765_p12 = pneg %p2764_p10  ;;  %p2771_p1 = por %p2770_p0, %p2769_p9 }
  0x20   : > { %p2772_p2 = pnand %p2771_p1, %p2765_p12 }
  0x22   : > { %2775 = shalt.err (!%p2772_p2)
}
  0x23   : > { %s2813_s30 = smov 128   ;;  %s2814_s6 = smov 8  }
  0x24   : > { %2709 = dma.hbm_to_vmem [thread:$0]  (!%p2895_p8), %s2891_s8, 4096, %s2893_s10, %s2900_s12, %s2813_s30, %s2813_s30, %s2814_s6  }
  0x25   : > { %p203_p11 = scmp.lt.s32.totalorder %s2810_s21, 3  ;;  %p4168_p13 = scmp.ge.s32.totalorder %s2810_s21, 1 }
  0x27   : > { %p204_p3 = pnand %p4168_p13, %p203_p11 }
  0x28   : > { %s209_s7 = sand.u32 (!%p204_p3), 1, %s2802_s19  }
  0x29   : > { %207 = sbr.rel (%p204_p3) target bundleno = 808 (0x328), region = 40  ;;  %s2267_s9 = sshll.u32 (!%p204_p3), %s209_s7, 8 }
  0x2a   : > { %s210_s13 = scalar_lea.sflag (!%p204_p3), [#allocation5], %s209_s7  ;;  %s2932_s14 = scalar_lea.vmem (!%p204_p3), [#allocation4], %s2267_s9 }
  0x30   : > { %2793 = dma.done.wait (%p2882_p7), %s210_s13, 4096  }
  0x31   : > { %2795 = vsyncadd (%p2882_p7), %s210_s13, 4294963200  ;;  %vm4156_vm0 = vcmask 293888   ;;  %v2815_v0 = vmov 0.0   ;;  %vm252_vm1 = vcmask 286720   ;;  %vm4165_vm2 = vcmask 130144   ;;  %v899_v1 = vld [vmem:[%s4151_s1] sm:$0xff] }
  0x32   : > { %246 = vst.msk [vmem:[#allocation2] sm:$0xff] %vm4156_vm0, %v2815_v0  ;;  %247 = vst.msk [vmem:[#allocation2 + $0x8] sm:$0xff] %vm4156_vm0, %v2815_v0  ;;  %vm4160_vm3 = vcmask 31744   ;;  %v900_v2 = vld [vmem:[%s4151_s1 + $0x8] sm:$0xff]  ;;  %v901_v3 = vld [vmem:[%s4151_s1 + $0x10] sm:$0xff]  ;;  %vm500_vm4 = vcmask 129120  }
  0x33   : > { %249 = vst.msk [vmem:[#allocation2 + $0xf0] sm:$0xff] %vm4156_vm0, %v2815_v0  ;;  %250 = vst.msk [vmem:[#allocation2 + $0xf8] sm:$0xff] %vm4156_vm0, %v2815_v0  ;;  %vm564_vm5 = vcmask 162944   ;;  %vm373_vm6 = vcmask 64544   ;;  %v2672_v4 = vpack.c.bf16 %v900_v2, %v899_v1  ;;  %v902_v5 = vld [vmem:[%s4151_s1 + $0x18] sm:$0xff]  ;;  %v466_v6 = vld [vmem:[%s2932_s14] sm:$0xff] }
  0x34   : > { %849 = vst.msk [vmem:[#allocation3] sm:$0xff] %vm4156_vm0, %v2815_v0  ;;  %850 = vst.msk [vmem:[#allocation3 + $0x8] sm:$0xff] %vm4156_vm0, %v2815_v0  ;;  %vm629_vm7 = vcmask 195744   ;;  %vm631_vm8 = vcmask 194720   ;;  %vm4158_vm9 = vcmask 97344   ;;  %v2676_v7 = vpack.c.bf16 %v902_v5, %v901_v3  ;;  %v533_v9 = vld [vmem:[%s2932_s14 + $0x8] sm:$0xff] }
  0x35   : > { %852 = vst.msk [vmem:[#allocation3 + $0xf0] sm:$0xff] %vm4156_vm0, %v2815_v0  ;;  %853 = vst.msk [vmem:[#allocation3 + $0xf8] sm:$0xff] %vm4156_vm0, %v2815_v0  ;;  %v467_v8 = vld [vmem:[%s2932_s14 + $0x8] sm:$0x7f]  ;;  %vm4164_vm10 = vcmask 228544   ;;  %vm4163_vm11 = vcmask 261344   ;;  %2673 = vmatprep.subr.bf16.mxu0 %v2672_v4  ;;  %2681 = vmatprep.subr.bf16.mxu1 %v2672_v4 }
  0x36   : > { %253 = vst.msk [vmem:[#allocation2 + $0x10] sm:$0x1] %vm252_vm1, %v2815_v0  ;;  %267 = vst.msk [vmem:[#allocation2 + $0x1f] sm:$0x1] %vm252_vm1, %v2815_v0  ;;  %v597_v10 = vld [vmem:[%s2932_s14 + $0x1] sm:$0xff]  ;;  %v2270_v12 = vld [vmem:[%s2932_s14 + $0x10] sm:$0xff]  ;;  %2675 = vmatpush3.bf16.msra.mxu0 %v2672_v4  ;;  %2683 = vmatpush3.bf16.msra.mxu1 %v2672_v4 }
  0x37   : > { %254 = vst.msk [vmem:[#allocation2 + $0x20] sm:$0x1] %vm252_vm1, %v2815_v0  ;;  %255 = vst.msk [vmem:[#allocation2 + $0x30] sm:$0x1] %vm252_vm1, %v2815_v0  ;;  %v598_v11 = vld [vmem:[%s2932_s14 + $0x9] sm:$0x7f]  ;;  %2677 = vmatprep.subr.bf16.mxu0 %v2676_v7  ;;  %2685 = vmatprep.subr.bf16.mxu1 %v2676_v7 }
  0x38   : > { %256 = vst.msk [vmem:[#allocation2 + $0x40] sm:$0x1] %vm252_vm1, %v2815_v0  ;;  %257 = vst.msk [vmem:[#allocation2 + $0x50] sm:$0x1] %vm252_vm1, %v2815_v0  ;;  %vm4161_vm12 = vcmask 294144   ;;  %vm696_vm13 = vcmask 227520  }
  0x39   : > { %258 = vst.msk [vmem:[#allocation2 + $0x60] sm:$0x1] %vm252_vm1, %v2815_v0  ;;  %259 = vst.msk [vmem:[#allocation2 + $0x70] sm:$0x1] %vm252_vm1, %v2815_v0  ;;  %vm4159_vm14 = vcmask 30720   ;;  %v2330_v13 = vld [vmem:[%s2932_s14 + $0x11] sm:$0xff] }
  0x3a   : > { %260 = vst.msk [vmem:[#allocation2 + $0x80] sm:$0x1] %vm252_vm1, %v2815_v0  ;;  %261 = vst.msk [vmem:[#allocation2 + $0x90] sm:$0x1] %vm252_vm1, %v2815_v0  ;;  %v2271_v14 = vld [vmem:[%s2932_s14 + $0x18] sm:$0x7f]  ;;  %2679 = vmatpush3.bf16.msra.mxu0 %v2676_v7  ;;  %2687 = vmatpush3.bf16.msra.mxu1 %v2676_v7 }
  0x3b   : > { %262 = vst.msk [vmem:[#allocation2 + $0xa0] sm:$0x1] %vm252_vm1, %v2815_v0  ;;  %263 = vst.msk [vmem:[#allocation2 + $0xb0] sm:$0x1] %vm252_vm1, %v2815_v0  ;;  %v2301_v15 = vld [vmem:[%s2932_s14 + $0x18] sm:$0xff]  ;;  %vm819_vm15 = vcmask 293120  }
  0x3c   : > { %264 = vst.msk [vmem:[#allocation2 + $0xc0] sm:$0x1] %vm252_vm1, %v2815_v0  ;;  %265 = vst.msk [vmem:[#allocation2 + $0xd0] sm:$0x1] %vm252_vm1, %v2815_v0  ;;  %v2331_v16 = vld [vmem:[%s2932_s14 + $0x19] sm:$0x7f] }
  0x3d   : > { %266 = vst.msk [vmem:[#allocation2 + $0xe0] sm:$0x1] %vm252_vm1, %v2815_v0  ;;  %268 = vst.msk [vmem:[#allocation2 + $0x2f] sm:$0x1] %vm252_vm1, %v2815_v0  ;;  %v282_v17 = vld [vmem:[%s2932_s14 + $0x8] sm:$0x7f] }
  0x3e   : > { %269 = vst.msk [vmem:[#allocation2 + $0x3f] sm:$0x1] %vm252_vm1, %v2815_v0  ;;  %270 = vst.msk [vmem:[#allocation2 + $0x4f] sm:$0x1] %vm252_vm1, %v2815_v0  ;;  %v405_v18 = vld [vmem:[%s2932_s14 + $0x9] sm:$0x7f] }
  0x3f   : > { %271 = vst.msk [vmem:[#allocation2 + $0x5f] sm:$0x1] %vm252_vm1, %v2815_v0  ;;  %272 = vst.msk [vmem:[#allocation2 + $0x6f] sm:$0x1] %vm252_vm1, %v2815_v0  ;;  %v903_v19 = vld [vmem:[%s4151_s1 + $0x20] sm:$0xf] }
  0x40   : > { %273 = vst.msk [vmem:[#allocation2 + $0x7f] sm:$0x1] %vm252_vm1, %v2815_v0  ;;  %274 = vst.msk [vmem:[#allocation2 + $0x8f] sm:$0x1] %vm252_vm1, %v2815_v0  ;;  %vm4157_vm0 = vcmask 1043456   ;;  %v2272_v21 = vld [vmem:[%s2932_s14 + $0x20] sm:$0xff] }
  0x41   : > { %275 = vst.msk [vmem:[#allocation2 + $0x9f] sm:$0x1] %vm252_vm1, %v2815_v0  ;;  %276 = vst.msk [vmem:[#allocation2 + $0xaf] sm:$0x1] %vm252_vm1, %v2815_v0  ;;  %v469_v20 = vld [vmem:[%s2932_s14 + $0x18] sm:$0x7f]  ;;  %2544 = vmatprep.subr.msk.mxu0 %vm4157_vm0, %v903_v19 }
  0x42   : > { %277 = vst.msk [vmem:[#allocation2 + $0xbf] sm:$0x1] %vm252_vm1, %v2815_v0  ;;  %278 = vst.msk [vmem:[#allocation2 + $0xcf] sm:$0x1] %vm252_vm1, %v2815_v0  ;;  %v600_v22 = vld [vmem:[%s2932_s14 + $0x19] sm:$0x7f]  ;;  %2545 = vmatpush3.msk.msra.mxu0 %vm4157_vm0, %v903_v19 }
  0x43   : > { %279 = vst.msk [vmem:[#allocation2 + $0xdf] sm:$0x1] %vm252_vm1, %v2815_v0  ;;  %280 = vst.msk [vmem:[#allocation2 + $0xef] sm:$0x1] %vm252_vm1, %v2815_v0  ;;  %v2332_v23 = vld [vmem:[%s2932_s14 + $0x21] sm:$0xff]  ;;  %v2274_v30 = vld [vmem:[%s2932_s14 + $0x30] sm:$0xff] }
  0x44   : > { %855 = vst.msk [vmem:[#allocation3 + $0x10] sm:$0x1] %vm252_vm1, %v2815_v0  ;;  %856 = vst.msk [vmem:[#allocation3 + $0x20] sm:$0x1] %vm252_vm1, %v2815_v0  ;;  %v2273_v24 = vld [vmem:[%s2932_s14 + $0x28] sm:$0x7f] }
  0x45   : > { %857 = vst.msk [vmem:[#allocation3 + $0x30] sm:$0x1] %vm252_vm1, %v2815_v0  ;;  %858 = vst.msk [vmem:[#allocation3 + $0x40] sm:$0x1] %vm252_vm1, %v2815_v0  ;;  %v2303_v25 = vld [vmem:[%s2932_s14 + $0x28] sm:$0xff]  ;;  %v2334_v32 = vld [vmem:[%s2932_s14 + $0x31] sm:$0xff] }
  0x46   : > { %859 = vst.msk [vmem:[#allocation3 + $0x50] sm:$0x1] %vm252_vm1, %v2815_v0  ;;  %860 = vst.msk [vmem:[#allocation3 + $0x60] sm:$0x1] %vm252_vm1, %v2815_v0  ;;  %v284_v26 = vld [vmem:[%s2932_s14 + $0x18] sm:$0x7f] }
  0x47   : > { %861 = vst.msk [vmem:[#allocation3 + $0x70] sm:$0x1] %vm252_vm1, %v2815_v0  ;;  %862 = vst.msk [vmem:[#allocation3 + $0x80] sm:$0x1] %vm252_vm1, %v2815_v0  ;;  %v407_v27 = vld [vmem:[%s2932_s14 + $0x19] sm:$0x7f] }
  0x48   : > { %863 = vst.msk [vmem:[#allocation3 + $0x90] sm:$0x1] %vm252_vm1, %v2815_v0  ;;  %864 = vst.msk [vmem:[#allocation3 + $0xa0] sm:$0x1] %vm252_vm1, %v2815_v0  ;;  %v2333_v28 = vld [vmem:[%s2932_s14 + $0x29] sm:$0x7f] }
  0x49   : > { %865 = vst.msk [vmem:[#allocation3 + $0xb0] sm:$0x1] %vm252_vm1, %v2815_v0  ;;  %866 = vst.msk [vmem:[#allocation3 + $0xc0] sm:$0x1] %vm252_vm1, %v2815_v0  ;;  %v471_v29 = vld [vmem:[%s2932_s14 + $0x28] sm:$0x7f] }
  0x4a   : > { %867 = vst.msk [vmem:[#allocation3 + $0xd0] sm:$0x1] %vm252_vm1, %v2815_v0  ;;  %868 = vst.msk [vmem:[#allocation3 + $0xe0] sm:$0x1] %vm252_vm1, %v2815_v0  ;;  %v602_v31 = vld [vmem:[%s2932_s14 + $0x29] sm:$0x7f] }
  0x4b   : > { %869 = vst.msk [vmem:[#allocation3 + $0x1f] sm:$0x1] %vm252_vm1, %v2815_v0  ;;  %870 = vst.msk [vmem:[#allocation3 + $0x2f] sm:$0x1] %vm252_vm1, %v2815_v0  ;;  %v2275_v33 = vld [vmem:[%s2932_s14 + $0x38] sm:$0x7f] }
  0x4c   : > { %871 = vst.msk [vmem:[#allocation3 + $0x3f] sm:$0x1] %vm252_vm1, %v2815_v0  ;;  %872 = vst.msk [vmem:[#allocation3 + $0x4f] sm:$0x1] %vm252_vm1, %v2815_v0  ;;  %v2305_v34 = vld [vmem:[%s2932_s14 + $0x38] sm:$0xff]  ;;  %v2276_v39 = vld [vmem:[%s2932_s14 + $0x40] sm:$0xff] }
  0x4d   : > { %873 = vst.msk [vmem:[#allocation3 + $0x5f] sm:$0x1] %vm252_vm1, %v2815_v0  ;;  %874 = vst.msk [vmem:[#allocation3 + $0x6f] sm:$0x1] %vm252_vm1, %v2815_v0  ;;  %v286_v35 = vld [vmem:[%s2932_s14 + $0x28] sm:$0x7f] }
  0x4e   : > { %875 = vst.msk [vmem:[#allocation3 + $0x7f] sm:$0x1] %vm252_vm1, %v2815_v0  ;;  %876 = vst.msk [vmem:[#allocation3 + $0x8f] sm:$0x1] %vm252_vm1, %v2815_v0  ;;  %v409_v36 = vld [vmem:[%s2932_s14 + $0x29] sm:$0x7f] }
  0x4f   : > { %877 = vst.msk [vmem:[#allocation3 + $0x9f] sm:$0x1] %vm252_vm1, %v2815_v0  ;;  %878 = vst.msk [vmem:[#allocation3 + $0xaf] sm:$0x1] %vm252_vm1, %v2815_v0  ;;  %v2335_v37 = vld [vmem:[%s2932_s14 + $0x39] sm:$0x7f] }
  0x50   : > { %879 = vst.msk [vmem:[#allocation3 + $0xbf] sm:$0x1] %vm252_vm1, %v2815_v0  ;;  %880 = vst.msk [vmem:[#allocation3 + $0xcf] sm:$0x1] %vm252_vm1, %v2815_v0  ;;  %v473_v38 = vld [vmem:[%s2932_s14 + $0x38] sm:$0x7f] }
  0x51   : > { %881 = vst.msk [vmem:[#allocation3 + $0xdf] sm:$0x1] %vm252_vm1, %v2815_v0  ;;  %882 = vst.msk [vmem:[#allocation3 + $0xef] sm:$0x1] %vm252_vm1, %v2815_v0  ;;  %vm436_vm1 = vcmask 96320   ;;  %v2336_v41 = vld [vmem:[%s2932_s14 + $0x41] sm:$0xff] }
  0x52   : > { %499 = vst.msk [vmem:[#allocation2 + $0x1] sm:$0xff] %vm4165_vm2, %v466_v6  ;;  %v604_v40 = vld [vmem:[%s2932_s14 + $0x39] sm:$0x7f]  ;;  %v2277_v42 = vld [vmem:[%s2932_s14 + $0x48] sm:$0x7f]  ;;  %vm4169_vm0 = vcmask 293888  }
  0x53   : > { %312 = vst.msk [vmem:[#allocation2 + $0x11] sm:$0xff] %vm4160_vm3, %v466_v6  ;;  %315 = vst.msk [vmem:[#allocation2 + $0x21] sm:$0xff] %vm4160_vm3, %v2270_v12  ;;  %v2307_v43 = vld [vmem:[%s2932_s14 + $0x48] sm:$0xff]  ;;  %v288_v44 = vld [vmem:[%s2932_s14 + $0x38] sm:$0x7f]  ;;  %p240_p7 = scmp.lt.s32.totalorder %s2865_s22, 1 }
  0x54   : > { %501 = vst.msk [vmem:[#allocation2 + $0x9] sm:$0x7f] %vm500_vm4, %v467_v8  ;;  %v411_v45 = vld [vmem:[%s2932_s14 + $0x39] sm:$0x7f]  ;;  %v2337_v48 = vld [vmem:[%s2932_s14 + $0x49] sm:$0x7f] }
  0x55   : > { %565 = vst.msk [vmem:[#allocation2] sm:$0xff] %vm564_vm5, %v466_v6  ;;  %566 = vst.msk [vmem:[#allocation2 + $0x8] sm:$0xff] %vm564_vm5, %v533_v9  ;;  %v475_v49 = vld [vmem:[%s2932_s14 + $0x48] sm:$0x7f]  ;;  %v2278_v51 = vld [vmem:[%s2932_s14 + $0x50] sm:$0xff]  ;;  %s4365_s22 = smov (!%p240_p7, %s2865_s22), 1 }
  0x56   : > { %374 = vst.msk [vmem:[#allocation2 + $0x10] sm:$0xff] %vm373_vm6, %v466_v6  ;;  %376 = vst.msk [vmem:[#allocation2 + $0x20] sm:$0xff] %vm373_vm6, %v2270_v12  ;;  %v606_v50 = vld [vmem:[%s2932_s14 + $0x49] sm:$0x7f]  ;;  %v2338_v52 = vld [vmem:[%s2932_s14 + $0x51] sm:$0xff]  ;;  %s2451_s15 = sshll.u32 %s4365_s22, 8 }
  0x57   : > { %630 = vst.msk [vmem:[#allocation2] sm:$0xff] %vm629_vm7, %v597_v10  ;;  %v2279_v53 = vld [vmem:[%s2932_s14 + $0x58] sm:$0x7f]  ;;  %v290_v55 = vld [vmem:[%s2932_s14 + $0x48] sm:$0x7f]  ;;  %v2280_v60 = vld [vmem:[%s2932_s14 + $0x60] sm:$0xff]  ;;  %s4039_s25 = scalar_lea.vmem %s4155_s5, %s2451_s15 }
  0x58   : > { %435 = vst.msk [vmem:[#allocation2 + $0x10] sm:$0xff] %vm4158_vm9, %v597_v10  ;;  %438 = vst.msk [vmem:[#allocation2 + $0x20] sm:$0xff] %vm4158_vm9, %v2330_v13  ;;  %v2309_v54 = vld [vmem:[%s2932_s14 + $0x58] sm:$0xff]  ;;  %v413_v57 = vld [vmem:[%s2932_s14 + $0x49] sm:$0x7f] }
  0x59   : > { %632 = vst.msk [vmem:[#allocation2 + $0x8] sm:$0x7f] %vm631_vm8, %v598_v11  ;;  %v2339_v56 = vld [vmem:[%s2932_s14 + $0x59] sm:$0x7f]  ;;  %v2340_v61 = vld [vmem:[%s2932_s14 + $0x61] sm:$0xff]  ;;  %v3247_v7 = vld [vmem:[%s2932_s14 + $0x70] sm:$0xff] }
  0x5a   : > { %695 = vst.msk [vmem:[#allocation2 + $0x1] sm:$0xff] %vm4164_vm10, %v2270_v12  ;;  %v477_v58 = vld [vmem:[%s2932_s14 + $0x58] sm:$0x7f]  ;;  %v2281_v62 = vld [vmem:[%s2932_s14 + $0x68] sm:$0x7f] }
  0x5b   : > { %697 = vst.msk [vmem:[#allocation2 + $0x9] sm:$0x7f] %vm696_vm13, %v2271_v14  ;;  %v608_v59 = vld [vmem:[%s2932_s14 + $0x59] sm:$0x7f]  ;;  %v3226_v63 = vld [vmem:[%s2932_s14 + $0x68] sm:$0xff]  ;;  %v3257_v8 = vld [vmem:[%s2932_s14 + $0x71] sm:$0xff] }
  0x5c   : > { %314 = vst.msk [vmem:[#allocation2 + $0x19] sm:$0x7f] %vm4159_vm14, %v282_v17  ;;  %316 = vst.msk [vmem:[#allocation2 + $0x29] sm:$0x7f] %vm4159_vm14, %v284_v26  ;;  %v292_v0 = vld [vmem:[%s2932_s14 + $0x58] sm:$0x7f] }
  0x5d   : > { %757 = vst.msk [vmem:[#allocation2] sm:$0xff] %vm4163_vm11, %v2270_v12  ;;  %758 = vst.msk [vmem:[#allocation2 + $0x8] sm:$0xff] %vm4163_vm11, %v2301_v15  ;;  %v2341_v3 = vld [vmem:[%s2932_s14 + $0x69] sm:$0x7f]  ;;  %v415_v4 = vld [vmem:[%s2932_s14 + $0x59] sm:$0x7f] }
  0x5e   : > { %375 = vst.msk [vmem:[#allocation2 + $0x18] sm:$0xff] %vm373_vm6, %v533_v9  ;;  %377 = vst.msk [vmem:[#allocation2 + $0x28] sm:$0xff] %vm373_vm6, %v2301_v15  ;;  %v479_v5 = vld [vmem:[%s2932_s14 + $0x68] sm:$0x7f]  ;;  %v1318_v9 = vld [vmem:[%s4151_s1 + $0x20] sm:$0xf] }
  0x5f   : > { %317 = vst.msk [vmem:[#allocation2 + $0x31] sm:$0xff] %vm4160_vm3, %v2272_v21  ;;  %319 = vst.msk [vmem:[#allocation2 + $0x41] sm:$0xff] %vm4160_vm3, %v2274_v30  ;;  %v610_v6 = vld [vmem:[%s2932_s14 + $0x69] sm:$0x7f]  ;;  %v2283_v10 = vld [vmem:[%s2932_s14 + $0x78] sm:$0x7f] }
  0x60   : > { %818 = vst.msk [vmem:[#allocation2] sm:$0xff] %vm4161_vm12, %v2330_v13  ;;  %v296_v14 = vld [vmem:[%s2932_s14 + $0x78] sm:$0x7f]  ;;  %v3294_v17 = vld [vmem:[%s2932_s14 + $0x80] sm:$0xff] }
  0x61   : > { %820 = vst.msk [vmem:[#allocation2 + $0x8] sm:$0x7f] %vm819_vm15, %v2331_v16  ;;  %v2343_v16 = vld [vmem:[%s2932_s14 + $0x79] sm:$0x7f] }
  0x62   : > { %437 = vst.msk [vmem:[#allocation2 + $0x18] sm:$0x7f] %vm436_vm1, %v405_v18  ;;  %439 = vst.msk [vmem:[#allocation2 + $0x28] sm:$0x7f] %vm436_vm1, %v407_v27  ;;  %v483_v18 = vld [vmem:[%s2932_s14 + $0x88] sm:$0x7f] }
  0x63   : > { %378 = vst.msk [vmem:[#allocation2 + $0x30] sm:$0xff] %vm373_vm6, %v2272_v21  ;;  %380 = vst.msk [vmem:[#allocation2 + $0x40] sm:$0xff] %vm373_vm6, %v2274_v30  ;;  %v2287_v26 = vld [vmem:[%s2932_s14 + $0x98] sm:$0x7f] }
  0x64   : > { %502 = vst.msk [vmem:[#allocation2 + $0x11] sm:$0xff] %vm4165_vm2, %v2270_v12  ;;  %504 = vst.msk [vmem:[#allocation2 + $0x21] sm:$0xff] %vm4165_vm2, %v2272_v21 }
  0x65   : > { %503 = vst.msk [vmem:[#allocation2 + $0x19] sm:$0x7f] %vm500_vm4, %v469_v20  ;;  %505 = vst.msk [vmem:[#allocation2 + $0x29] sm:$0x7f] %vm500_vm4, %v471_v29  ;;  %v3304_v20 = vld [vmem:[%s2932_s14 + $0x88] sm:$0xff] }
  0x66   : > { %440 = vst.msk [vmem:[#allocation2 + $0x30] sm:$0xff] %vm4158_vm9, %v2332_v23  ;;  %442 = vst.msk [vmem:[#allocation2 + $0x40] sm:$0xff] %vm4158_vm9, %v2334_v32  ;;  %v294_v29 = vld [vmem:[%s2932_s14 + $0x68] sm:$0x7f] }
  0x67   : > { %567 = vst.msk [vmem:[#allocation2 + $0x10] sm:$0xff] %vm564_vm5, %v2270_v12  ;;  %568 = vst.msk [vmem:[#allocation2 + $0x18] sm:$0xff] %vm564_vm5, %v2301_v15  ;;  %v883_v46 = vld [vmem:[#allocation2] sm:$0xff]  ;;  %v419_v15 = vld [vmem:[%s2932_s14 + $0x79] sm:$0x7f] }
  0x68   : > { %633 = vst.msk [vmem:[#allocation2 + $0x10] sm:$0xff] %vm629_vm7, %v2330_v13  ;;  %v884_v47 = vld [vmem:[#allocation2 + $0x8] sm:$0xff]  ;;  %2546 = vmatprep.mubr.msk.f32.mxu0 %vm4169_vm0, %v883_v46  ;;  %v3271_v13 = vld [vmem:[%s2932_s14 + $0x78] sm:$0xff] }
  0x69   : > { %634 = vst.msk [vmem:[#allocation2 + $0x18] sm:$0x7f] %vm631_vm8, %v600_v22  ;;  %v2319_v46 = vld [vmem:[%s2932_s14 + $0xa8] sm:$0xff] }
  0x6a   : > { %698 = vst.msk [vmem:[#allocation2 + $0x11] sm:$0xff] %vm4164_vm10, %v2272_v21 }
  0x6b   : > { %699 = vst.msk [vmem:[#allocation2 + $0x19] sm:$0x7f] %vm696_vm13, %v2273_v24  ;;  %v3319_v24 = vld [vmem:[%s2932_s14 + $0x90] sm:$0xff] }
  0x6c   : > { %318 = vst.msk [vmem:[#allocation2 + $0x39] sm:$0x7f] %vm4159_vm14, %v286_v35  ;;  %320 = vst.msk [vmem:[#allocation2 + $0x49] sm:$0x7f] %vm4159_vm14, %v288_v44  ;;  %v2348_v44 = vld [vmem:[%s2932_s14 + $0xa1] sm:$0xff] }
  0x6d   : > { %759 = vst.msk [vmem:[#allocation2 + $0x10] sm:$0xff] %vm4163_vm11, %v2272_v21  ;;  %760 = vst.msk [vmem:[#allocation2 + $0x18] sm:$0xff] %vm4163_vm11, %v2303_v25 }
  0x6e   : > { %569 = vst.msk [vmem:[#allocation2 + $0x20] sm:$0xff] %vm564_vm5, %v2272_v21  ;;  %570 = vst.msk [vmem:[#allocation2 + $0x28] sm:$0xff] %vm564_vm5, %v2303_v25  ;;  %v3307_v21 = vld [vmem:[%s2932_s14 + $0x81] sm:$0xff] }
  0x6f   : > { %379 = vst.msk [vmem:[#allocation2 + $0x38] sm:$0xff] %vm373_vm6, %v2303_v25  ;;  %381 = vst.msk [vmem:[#allocation2 + $0x48] sm:$0xff] %vm373_vm6, %v2305_v34  ;;  %v3330_v25 = vld [vmem:[%s2932_s14 + $0x91] sm:$0xff] }
  0x70   : > { %321 = vst.msk [vmem:[#allocation2 + $0x51] sm:$0xff] %vm4160_vm3, %v2276_v39  ;;  %323 = vst.msk [vmem:[#allocation2 + $0x61] sm:$0xff] %vm4160_vm3, %v2278_v51 }
  0x71   : > { %821 = vst.msk [vmem:[#allocation2 + $0x10] sm:$0xff] %vm4161_vm12, %v2332_v23 }
  0x72   : > { %822 = vst.msk [vmem:[#allocation2 + $0x18] sm:$0x7f] %vm819_vm15, %v2333_v28  ;;  %v3342_v28 = vld [vmem:[%s2932_s14 + $0x98] sm:$0xff] }
  0x73   : > { %635 = vst.msk [vmem:[#allocation2 + $0x20] sm:$0xff] %vm629_vm7, %v2332_v23  ;;  %v614_v23 = vld [vmem:[%s2932_s14 + $0x89] sm:$0x7f] }
  0x74   : > { %636 = vst.msk [vmem:[#allocation2 + $0x28] sm:$0x7f] %vm631_vm8, %v602_v31  ;;  %v417_v31 = vld [vmem:[%s2932_s14 + $0x69] sm:$0x7f] }
  0x75   : > { %441 = vst.msk [vmem:[#allocation2 + $0x38] sm:$0x7f] %vm436_vm1, %v409_v36  ;;  %443 = vst.msk [vmem:[#allocation2 + $0x48] sm:$0x7f] %vm436_vm1, %v411_v45  ;;  %v612_v36 = vld [vmem:[%s2932_s14 + $0x79] sm:$0x7f] }
  0x76   : > { %382 = vst.msk [vmem:[#allocation2 + $0x50] sm:$0xff] %vm373_vm6, %v2276_v39  ;;  %384 = vst.msk [vmem:[#allocation2 + $0x60] sm:$0xff] %vm373_vm6, %v2278_v51  ;;  %v2289_v45 = vld [vmem:[%s2932_s14 + $0xa8] sm:$0x7f] }
  0x77   : > { %700 = vst.msk [vmem:[#allocation2 + $0x21] sm:$0xff] %vm4164_vm10, %v2274_v30 }
  0x78   : > { %701 = vst.msk [vmem:[#allocation2 + $0x29] sm:$0x7f] %vm696_vm13, %v2275_v33  ;;  %v885_v1 = vld [vmem:[#allocation2 + $0x10] sm:$0xff] }
  0x79   : > { %506 = vst.msk [vmem:[#allocation2 + $0x31] sm:$0xff] %vm4165_vm2, %v2274_v30  ;;  %508 = vst.msk [vmem:[#allocation2 + $0x41] sm:$0xff] %vm4165_vm2, %v2276_v39  ;;  %v886_v2 = vld [vmem:[#allocation2 + $0x18] sm:$0xff] }
  0x7a   : > { %507 = vst.msk [vmem:[#allocation2 + $0x39] sm:$0x7f] %vm500_vm4, %v473_v38  ;;  %509 = vst.msk [vmem:[#allocation2 + $0x49] sm:$0x7f] %vm500_vm4, %v475_v49  ;;  %v2285_v38 = vld [vmem:[%s2932_s14 + $0x88] sm:$0x7f] }
  0x7b   : > { %444 = vst.msk [vmem:[#allocation2 + $0x50] sm:$0xff] %vm4158_vm9, %v2336_v41  ;;  %vm4170_vm9 = vmmov %vm4169_vm0  ;;  %vm4171_vm0 = vcmask 97344   ;;  %v423_v49 = vld [vmem:[%s2932_s14 + $0x99] sm:$0x7f] }
  0x7c   : > { %761 = vst.msk [vmem:[#allocation2 + $0x20] sm:$0xff] %vm4163_vm11, %v2274_v30  ;;  %762 = vst.msk [vmem:[#allocation2 + $0x28] sm:$0xff] %vm4163_vm11, %v2305_v34  ;;  %2547 = vmatmul.mubr.msk.f32.vlgmr.msra.gmra.mrb[0].mxu0 %vm4170_vm9, %v884_v47 }
  0x7d   : > { %571 = vst.msk [vmem:[#allocation2 + $0x30] sm:$0xff] %vm564_vm5, %v2274_v30  ;;  %572 = vst.msk [vmem:[#allocation2 + $0x38] sm:$0xff] %vm564_vm5, %v2305_v34  ;;  %2549 = vmatprep.mubr.msk.f32.mxu0 %vm4170_vm9, %v885_v1  ;;  %v2347_v30 = vld [vmem:[%s2932_s14 + $0x99] sm:$0x7f]  ;;  %v298_v34 = vld [vmem:[%s2932_s14 + $0x88] sm:$0x7f] }
  0x7e   : > { %823 = vst.msk [vmem:[#allocation2 + $0x20] sm:$0xff] %vm4161_vm12, %v2334_v32  ;;  %v2292_v1 = vld [vmem:[%s2932_s14 + $0xc0] sm:$0xff] }
  0x7f   : > { %824 = vst.msk [vmem:[#allocation2 + $0x28] sm:$0x7f] %vm819_vm15, %v2335_v37  ;;  %v421_v37 = vld [vmem:[%s2932_s14 + $0x89] sm:$0x7f] }
  0x80   : > { %637 = vst.msk [vmem:[#allocation2 + $0x30] sm:$0xff] %vm629_vm7, %v2334_v32  ;;  %v481_v32 = vld [vmem:[%s2932_s14 + $0x78] sm:$0x7f] }
  0x81   : > { %638 = vst.msk [vmem:[#allocation2 + $0x38] sm:$0x7f] %vm631_vm8, %v604_v40  ;;  %v3383_v40 = vld [vmem:[%s2932_s14 + $0xa0] sm:$0xff] }
  0x82   : > { %702 = vst.msk [vmem:[#allocation2 + $0x31] sm:$0xff] %vm4164_vm10, %v2276_v39 }
  0x83   : > { %703 = vst.msk [vmem:[#allocation2 + $0x39] sm:$0x7f] %vm696_vm13, %v2277_v42  ;;  %v2345_v42 = vld [vmem:[%s2932_s14 + $0x89] sm:$0x7f] }
  0x84   : > { %322 = vst.msk [vmem:[#allocation2 + $0x59] sm:$0x7f] %vm4159_vm14, %v290_v55  ;;  %324 = vst.msk [vmem:[#allocation2 + $0x69] sm:$0x7f] %vm4159_vm14, %v292_v0  ;;  %v2350_v55 = vld [vmem:[%s2932_s14 + $0xb1] sm:$0xff] }
  0x85   : > { %763 = vst.msk [vmem:[#allocation2 + $0x30] sm:$0xff] %vm4163_vm11, %v2276_v39  ;;  %764 = vst.msk [vmem:[#allocation2 + $0x38] sm:$0xff] %vm4163_vm11, %v2307_v43  ;;  %v887_v11 = vld [vmem:[#allocation2 + $0x20] sm:$0xff]  ;;  %v620_v0 = vld [vmem:[%s2932_s14 + $0xb9] sm:$0x7f] }
  0x86   : > { %573 = vst.msk [vmem:[#allocation2 + $0x40] sm:$0xff] %vm564_vm5, %v2276_v39  ;;  %574 = vst.msk [vmem:[#allocation2 + $0x48] sm:$0xff] %vm564_vm5, %v2307_v43  ;;  %v888_v12 = vld [vmem:[#allocation2 + $0x28] sm:$0xff]  ;;  %v485_v39 = vld [vmem:[%s2932_s14 + $0x98] sm:$0x7f] }
  0x87   : > { %383 = vst.msk [vmem:[#allocation2 + $0x58] sm:$0xff] %vm373_vm6, %v2307_v43  ;;  %385 = vst.msk [vmem:[#allocation2 + $0x68] sm:$0xff] %vm373_vm6, %v2309_v54  ;;  %v616_v43 = vld [vmem:[%s2932_s14 + $0x99] sm:$0x7f] }
  0x88   : > { %446 = vst.msk [vmem:[#allocation2 + $0x60] sm:$0xff] %vm4171_vm0, %v2338_v52  ;;  %vm4172_vm14 = vmmov %vm4170_vm9 }
  0x89   : > { %825 = vst.msk [vmem:[#allocation2 + $0x30] sm:$0xff] %vm4161_vm12, %v2336_v41  ;;  %2550 = vmatmul.mubr.msk.f32.gmra.mrb[2].mxu0 %vm4172_vm14, %v886_v2  ;;  %vm4173_vm14 = vcmask 1043456   ;;  %v2352_v2 = vld [vmem:[%s2932_s14 + $0xc1] sm:$0xff] }
  0x8a   : > { %826 = vst.msk [vmem:[#allocation2 + $0x38] sm:$0x7f] %vm819_vm15, %v2337_v48  ;;  %2578 = vmatprep.subr.msk.mxu1 %vm4173_vm14, %v1318_v9  ;;  %2552 = vmatprep.mubr.msk.f32.mxu0 %vm4170_vm9, %v887_v11  ;;  %vm4176_vm9 = vcmask 30720   ;;  %v300_v48 = vld [vmem:[%s2932_s14 + $0x98] sm:$0x7f] }
  0x8b   : > { %639 = vst.msk [vmem:[#allocation2 + $0x40] sm:$0xff] %vm629_vm7, %v2336_v41  ;;  %v3493_v11 = vld [vmem:[%s2932_s14 + $0xd1] sm:$0xff] }
  0x8c   : > { %640 = vst.msk [vmem:[#allocation2 + $0x48] sm:$0x7f] %vm631_vm8, %v606_v50 }
  0x8d   : > { %445 = vst.msk [vmem:[#allocation2 + $0x58] sm:$0x7f] %vm436_vm1, %v413_v57  ;;  %447 = vst.msk [vmem:[#allocation2 + $0x68] sm:$0x7f] %vm436_vm1, %v415_v4  ;;  %v2321_v57 = vld [vmem:[%s2932_s14 + $0xb8] sm:$0xff]  ;;  %v2323_v4 = vld [vmem:[%s2932_s14 + $0xc8] sm:$0xff] }
  0x8e   : > { %325 = vst.msk [vmem:[#allocation2 + $0x71] sm:$0xff] %vm4160_vm3, %v2280_v60  ;;  %327 = vst.msk [vmem:[#allocation2 + $0x81] sm:$0xff] %vm4160_vm3, %v3247_v7 }
  0x8f   : > { %704 = vst.msk [vmem:[#allocation2 + $0x41] sm:$0xff] %vm4164_vm10, %v2278_v51 }
  0x90   : > { %705 = vst.msk [vmem:[#allocation2 + $0x49] sm:$0x7f] %vm696_vm13, %v2279_v53  ;;  %v889_v19 = vld [vmem:[#allocation2 + $0x30] sm:$0xff] }
  0x91   : > { %510 = vst.msk [vmem:[#allocation2 + $0x51] sm:$0xff] %vm4165_vm2, %v2278_v51  ;;  %512 = vst.msk [vmem:[#allocation2 + $0x61] sm:$0xff] %vm4165_vm2, %v2280_v60  ;;  %v890_v22 = vld [vmem:[#allocation2 + $0x38] sm:$0xff]  ;;  %v2290_v53 = vld [vmem:[%s2932_s14 + $0xb0] sm:$0xff] }
  0x92   : > { %511 = vst.msk [vmem:[#allocation2 + $0x59] sm:$0x7f] %vm500_vm4, %v477_v58  ;;  %513 = vst.msk [vmem:[#allocation2 + $0x69] sm:$0x7f] %vm500_vm4, %v479_v5  ;;  %v302_v58 = vld [vmem:[%s2932_s14 + $0xa8] sm:$0x7f] }
  0x93   : > { %386 = vst.msk [vmem:[#allocation2 + $0x70] sm:$0xff] %vm373_vm6, %v2280_v60  ;;  %388 = vst.msk [vmem:[#allocation2 + $0x80] sm:$0xff] %vm373_vm6, %v3247_v7  ;;  %v304_v5 = vld [vmem:[%s2932_s14 + $0xb8] sm:$0x7f] }
  0x94   : > { %765 = vst.msk [vmem:[#allocation2 + $0x40] sm:$0xff] %vm4163_vm11, %v2278_v51  ;;  %766 = vst.msk [vmem:[#allocation2 + $0x48] sm:$0xff] %vm4163_vm11, %v2309_v54 }
  0x95   : > { %575 = vst.msk [vmem:[#allocation2 + $0x50] sm:$0xff] %vm564_vm5, %v2278_v51  ;;  %576 = vst.msk [vmem:[#allocation2 + $0x58] sm:$0xff] %vm564_vm5, %v2309_v54  ;;  %v2349_v51 = vld [vmem:[%s2932_s14 + $0xa9] sm:$0x7f] }
  0x96   : > { %448 = vst.msk [vmem:[#allocation2 + $0x70] sm:$0xff] %vm4171_vm0, %v2340_v61  ;;  %vm4174_vm0 = vmmov %vm4173_vm14  ;;  %vm4175_vm14 = vcmask 97344   ;;  %v618_v54 = vld [vmem:[%s2932_s14 + $0xa9] sm:$0x7f] }
  0x97   : > { %827 = vst.msk [vmem:[#allocation2 + $0x40] sm:$0xff] %vm4161_vm12, %v2338_v52  ;;  %2579 = vmatpush3.msk.msra.mxu1 %vm4174_vm0, %v1318_v9  ;;  %vm4177_vm0 = vcmask 293888   ;;  %v622_v9 = vld [vmem:[%s2932_s14 + $0xc9] sm:$0x7f] }
  0x98   : > { %828 = vst.msk [vmem:[#allocation2 + $0x48] sm:$0x7f] %vm819_vm15, %v2339_v56  ;;  %2553 = vmatmul.mubr.msk.f32.gmra.mrb[4].mxu0 %vm4177_vm0, %v888_v12  ;;  %v2291_v56 = vld [vmem:[%s2932_s14 + $0xb8] sm:$0x7f] }
  0x99   : > { %641 = vst.msk [vmem:[#allocation2 + $0x50] sm:$0xff] %vm629_vm7, %v2338_v52  ;;  %v487_v52 = vld [vmem:[%s2932_s14 + $0xa8] sm:$0x7f] }
  0x9a   : > { %642 = vst.msk [vmem:[#allocation2 + $0x58] sm:$0x7f] %vm631_vm8, %v608_v59  ;;  %v425_v59 = vld [vmem:[%s2932_s14 + $0xa9] sm:$0x7f] }
  0x9b   : > { %706 = vst.msk [vmem:[#allocation2 + $0x51] sm:$0xff] %vm4164_vm10, %v2280_v60 }
  0x9c   : > { %707 = vst.msk [vmem:[#allocation2 + $0x59] sm:$0x7f] %vm696_vm13, %v2281_v62  ;;  %v2351_v62 = vld [vmem:[%s2932_s14 + $0xb9] sm:$0x7f] }
  0x9d   : > { %767 = vst.msk [vmem:[#allocation2 + $0x50] sm:$0xff] %vm4163_vm11, %v2280_v60  ;;  %768 = vst.msk [vmem:[#allocation2 + $0x58] sm:$0xff] %vm4163_vm11, %v3226_v63 }
  0x9e   : > { %577 = vst.msk [vmem:[#allocation2 + $0x60] sm:$0xff] %vm564_vm5, %v2280_v60  ;;  %578 = vst.msk [vmem:[#allocation2 + $0x68] sm:$0xff] %vm564_vm5, %v3226_v63  ;;  %v891_v27 = vld [vmem:[#allocation2 + $0x40] sm:$0xff] }
  0x9f   : > { %450 = vst.msk [vmem:[#allocation2 + $0x80] sm:$0xff] %vm4175_vm14, %v3257_v8  ;;  %vm4178_vm14 = vmmov %vm4177_vm0  ;;  %v892_v33 = vld [vmem:[#allocation2 + $0x48] sm:$0xff] }
  0xa0   : > { %829 = vst.msk [vmem:[#allocation2 + $0x50] sm:$0xff] %vm4161_vm12, %v2340_v61  ;;  %2555 = vmatprep.mubr.msk.f32.mxu0 %vm4178_vm14, %v889_v19  ;;  %vm4180_vm14 = vcmask 30720  }
  0xa1   : > { %830 = vst.msk [vmem:[#allocation2 + $0x58] sm:$0x7f] %vm819_vm15, %v2341_v3  ;;  %2556 = vmatmul.mubr.msk.f32.gmra.mrb[6].mxu0 %vm4177_vm0, %v890_v22  ;;  %v2293_v3 = vld [vmem:[%s2932_s14 + $0xc8] sm:$0x7f]  ;;  %v2296_v22 = vld [vmem:[%s2932_s14 + $0xe0] sm:$0xff] }
  0xa2   : > { %643 = vst.msk [vmem:[#allocation2 + $0x60] sm:$0xff] %vm629_vm7, %v2340_v61 }
  0xa3   : > { %644 = vst.msk [vmem:[#allocation2 + $0x68] sm:$0x7f] %vm631_vm8, %v610_v6  ;;  %v2353_v6 = vld [vmem:[%s2932_s14 + $0xc9] sm:$0x7f] }
  0xa4   : > { %328 = vst.msk [vmem:[#allocation2 + $0x89] sm:$0x7f] %vm4176_vm9, %v296_v14  ;;  %vm4179_vm9 = vcmask 97344   ;;  %v2295_v14 = vld [vmem:[%s2932_s14 + $0xd8] sm:$0x7f] }
  0xa5   : > { %708 = vst.msk [vmem:[#allocation2 + $0x61] sm:$0xff] %vm4164_vm10, %v3247_v7 }
  0xa6   : > { %709 = vst.msk [vmem:[#allocation2 + $0x69] sm:$0x7f] %vm696_vm13, %v2283_v10  ;;  %v2294_v10 = vld [vmem:[%s2932_s14 + $0xd0] sm:$0xff] }
  0xa7   : > { %389 = vst.msk [vmem:[#allocation2 + $0x88] sm:$0xff] %vm373_vm6, %v3271_v13  ;;  %v893_v35 = vld [vmem:[#allocation2 + $0x50] sm:$0xff] }
  0xa8   : > { %329 = vst.msk [vmem:[#allocation2 + $0x91] sm:$0xff] %vm4160_vm3, %v3294_v17  ;;  %331 = vst.msk [vmem:[#allocation2 + $0xa1] sm:$0xff] %vm4160_vm3, %v3319_v24  ;;  %v894_v41 = vld [vmem:[#allocation2 + $0x58] sm:$0xff] }
  0xa9   : > { %769 = vst.msk [vmem:[#allocation2 + $0x60] sm:$0xff] %vm4163_vm11, %v3247_v7  ;;  %770 = vst.msk [vmem:[#allocation2 + $0x68] sm:$0xff] %vm4163_vm11, %v3271_v13 }
  0xaa   : > { %451 = vst.msk [vmem:[#allocation2 + $0x88] sm:$0x7f] %vm436_vm1, %v419_v15  ;;  %vm4181_vm3 = vmmov %vm4177_vm0  ;;  %v2325_v15 = vld [vmem:[%s2932_s14 + $0xd8] sm:$0xff] }
  0xab   : > { %390 = vst.msk [vmem:[#allocation2 + $0x90] sm:$0xff] %vm373_vm6, %v3294_v17  ;;  %392 = vst.msk [vmem:[#allocation2 + $0xa0] sm:$0xff] %vm373_vm6, %v3319_v24  ;;  %2558 = vmatprep.mubr.msk.f32.mxu0 %vm4181_vm3, %v891_v27  ;;  %v431_v27 = vld [vmem:[%s2932_s14 + $0xd9] sm:$0x7f] }
  0xac   : > { %831 = vst.msk [vmem:[#allocation2 + $0x60] sm:$0xff] %vm4161_vm12, %v3257_v8  ;;  %vm4182_vm3 = vmmov %vm4180_vm14  ;;  %2559 = vmatmul.mubr.msk.f32.gmra.mrb[8].mxu0 %vm4177_vm0, %v892_v33  ;;  %v626_v33 = vld [vmem:[%s2932_s14 + $0xe9] sm:$0x7f] }
  0xad   : > { %832 = vst.msk [vmem:[#allocation2 + $0x68] sm:$0x7f] %vm819_vm15, %v2343_v16  ;;  %v306_v16 = vld [vmem:[%s2932_s14 + $0xc8] sm:$0x7f] }
  0xae   : > { %516 = vst.msk [vmem:[#allocation2 + $0x81] sm:$0xff] %vm4165_vm2, %v3294_v17 }
  0xaf   : > { %517 = vst.msk [vmem:[#allocation2 + $0x89] sm:$0x7f] %vm500_vm4, %v483_v18 }
  0xb0   : > { %452 = vst.msk [vmem:[#allocation2 + $0x90] sm:$0xff] %vm4179_vm9, %v3307_v21  ;;  %454 = vst.msk [vmem:[#allocation2 + $0xa0] sm:$0xff] %vm4179_vm9, %v3330_v25 }
  0xb1   : > { %581 = vst.msk [vmem:[#allocation2 + $0x80] sm:$0xff] %vm564_vm5, %v3294_v17  ;;  %582 = vst.msk [vmem:[#allocation2 + $0x88] sm:$0xff] %vm564_vm5, %v3304_v20 }
  0xb2   : > { %647 = vst.msk [vmem:[#allocation2 + $0x80] sm:$0xff] %vm629_vm7, %v3307_v21  ;;  %vm4184_vm9 = vmmov %vm4177_vm0  ;;  %vm4186_vm0 = vcmask 30720  }
  0xb3   : > { %648 = vst.msk [vmem:[#allocation2 + $0x88] sm:$0x7f] %vm631_vm8, %v614_v23  ;;  %2561 = vmatprep.mubr.msk.f32.mxu0 %vm4184_vm9, %v893_v35  ;;  %v895_v47 = vld [vmem:[#allocation2 + $0x60] sm:$0xff]  ;;  %v624_v23 = vld [vmem:[%s2932_s14 + $0xd9] sm:$0x7f] }
  0xb4   : > { %326 = vst.msk [vmem:[#allocation2 + $0x79] sm:$0x7f] %vm4180_vm14, %v294_v29  ;;  %vm4183_vm14 = vcmask 31744   ;;  %v896_v50 = vld [vmem:[#allocation2 + $0x68] sm:$0xff] }
  0xb5   : > { %712 = vst.msk [vmem:[#allocation2 + $0x81] sm:$0xff] %vm4164_vm10, %v3319_v24  ;;  %v495_v29 = vld [vmem:[%s2932_s14 + $0xe8] sm:$0x7f] }
  0xb6   : > { %713 = vst.msk [vmem:[#allocation2 + $0x89] sm:$0x7f] %vm696_vm13, %v2287_v26  ;;  %v308_v26 = vld [vmem:[%s2932_s14 + $0xd8] sm:$0x7f]  ;;  %v310_v35 = vld [vmem:[%s2932_s14 + $0xe8] sm:$0x7f] }
  0xb7   : > { %387 = vst.msk [vmem:[#allocation2 + $0x78] sm:$0xff] %vm373_vm6, %v3226_v63  ;;  %v489_v63 = vld [vmem:[%s2932_s14 + $0xb8] sm:$0x7f] }
  0xb8   : > { %773 = vst.msk [vmem:[#allocation2 + $0x80] sm:$0xff] %vm4163_vm11, %v3319_v24  ;;  %774 = vst.msk [vmem:[#allocation2 + $0x88] sm:$0xff] %vm4163_vm11, %v3342_v28 }
  0xb9   : > { %449 = vst.msk [vmem:[#allocation2 + $0x78] sm:$0x7f] %vm436_vm1, %v417_v31 }
  0xba   : > { %330 = vst.msk [vmem:[#allocation2 + $0x99] sm:$0x7f] %vm4182_vm3, %v298_v34  ;;  %vm4185_vm3 = vcmask 97344   ;;  %v2298_v34 = vld [vmem:[%s2932_s14 + $0xf0] sm:$0xff] }
  0xbb   : > { %835 = vst.msk [vmem:[#allocation2 + $0x80] sm:$0xff] %vm4161_vm12, %v3330_v25 }
  0xbc   : > { %836 = vst.msk [vmem:[#allocation2 + $0x88] sm:$0x7f] %vm819_vm15, %v2347_v30 }
  0xbd   : > { %514 = vst.msk [vmem:[#allocation2 + $0x71] sm:$0xff] %vm4165_vm2, %v3247_v7 }
  0xbe   : > { %515 = vst.msk [vmem:[#allocation2 + $0x79] sm:$0x7f] %vm500_vm4, %v481_v32  ;;  %v2357_v32 = vld [vmem:[%s2932_s14 + $0xe9] sm:$0x7f] }
  0xbf   : > { %391 = vst.msk [vmem:[#allocation2 + $0x98] sm:$0xff] %vm373_vm6, %v3304_v20 }
  0xc0   : > { %579 = vst.msk [vmem:[#allocation2 + $0x70] sm:$0xff] %vm564_vm5, %v3247_v7  ;;  %580 = vst.msk [vmem:[#allocation2 + $0x78] sm:$0xff] %vm564_vm5, %v3271_v13  ;;  %v427_v7 = vld [vmem:[%s2932_s14 + $0xb9] sm:$0x7f] }
  0xc1   : > { %453 = vst.msk [vmem:[#allocation2 + $0x98] sm:$0x7f] %vm436_vm1, %v421_v37  ;;  %v433_v37 = vld [vmem:[%s2932_s14 + $0xe9] sm:$0x7f] }
  0xc2   : > { %333 = vst.msk [vmem:[#allocation2 + $0xb1] sm:$0xff] %vm4183_vm14, %v3383_v40  ;;  %vm4187_vm14 = vmmov %vm4184_vm9  ;;  %vm4188_vm9 = vcmask 31744   ;;  %v1298_v60 = vld [vmem:[#allocation2 + $0x80] sm:$0xff] }
  0xc3   : > { %645 = vst.msk [vmem:[#allocation2 + $0x70] sm:$0xff] %vm629_vm7, %v3257_v8  ;;  %2562 = vmatmul.mubr.msk.f32.gmra.mrb[10].mxu0 %vm4187_vm14, %v894_v41  ;;  %v1299_v61 = vld [vmem:[#allocation2 + $0x88] sm:$0xff]  ;;  %v2329_v41 = vld [vmem:[%s2932_s14 + $0xf8] sm:$0xff] }
  0xc4   : > { %646 = vst.msk [vmem:[#allocation2 + $0x78] sm:$0x7f] %vm631_vm8, %v612_v36  ;;  %v491_v8 = vld [vmem:[%s2932_s14 + $0xc8] sm:$0x7f]  ;;  %v2299_v36 = vld [vmem:[%s2932_s14 + $0xf8] sm:$0x7f] }
  0xc5   : > { %518 = vst.msk [vmem:[#allocation2 + $0x91] sm:$0xff] %vm4165_vm2, %v3319_v24 }
  0xc6   : > { %519 = vst.msk [vmem:[#allocation2 + $0x99] sm:$0x7f] %vm500_vm4, %v485_v39 }
  0xc7   : > { %394 = vst.msk [vmem:[#allocation2 + $0xb0] sm:$0xff] %vm373_vm6, %v3383_v40 }
  0xc8   : > { %710 = vst.msk [vmem:[#allocation2 + $0x71] sm:$0xff] %vm4164_vm10, %v3294_v17 }
  0xc9   : > { %711 = vst.msk [vmem:[#allocation2 + $0x79] sm:$0x7f] %vm696_vm13, %v2285_v38  ;;  %v497_v38 = vld [vmem:[%s2932_s14 + $0xf8] sm:$0x7f] }
  0xca   : > { %583 = vst.msk [vmem:[#allocation2 + $0x90] sm:$0xff] %vm564_vm5, %v3319_v24  ;;  %584 = vst.msk [vmem:[#allocation2 + $0x98] sm:$0xff] %vm564_vm5, %v3342_v28  ;;  %v2356_v24 = vld [vmem:[%s2932_s14 + $0xe1] sm:$0xff] }
  0xcb   : > { %456 = vst.msk [vmem:[#allocation2 + $0xb0] sm:$0xff] %vm4185_vm3, %v2348_v44  ;;  %vm4189_vm3 = vmmov %vm4187_vm14  ;;  %vm4190_vm14 = vcmask 97344  }
  0xcc   : > { %771 = vst.msk [vmem:[#allocation2 + $0x70] sm:$0xff] %vm4163_vm11, %v3294_v17  ;;  %772 = vst.msk [vmem:[#allocation2 + $0x78] sm:$0xff] %vm4163_vm11, %v3304_v20  ;;  %2564 = vmatprep.mubr.msk.f32.mxu0 %vm4189_vm3, %v895_v47  ;;  %v429_v17 = vld [vmem:[%s2932_s14 + $0xc9] sm:$0x7f]  ;;  %v493_v20 = vld [vmem:[%s2932_s14 + $0xd8] sm:$0x7f] }
  0xcd   : > { %649 = vst.msk [vmem:[#allocation2 + $0x90] sm:$0xff] %vm629_vm7, %v3330_v25  ;;  %2565 = vmatmul.mubr.msk.f32.gmra.mrb[12].mxu0 %vm4189_vm3, %v896_v50  ;;  %v2297_v25 = vld [vmem:[%s2932_s14 + $0xe8] sm:$0x7f] }
  0xce   : > { %650 = vst.msk [vmem:[#allocation2 + $0x98] sm:$0x7f] %vm631_vm8, %v616_v43  ;;  %v2359_v43 = vld [vmem:[%s2932_s14 + $0xf9] sm:$0x7f] }
  0xcf   : > { %332 = vst.msk [vmem:[#allocation2 + $0xa9] sm:$0x7f] %vm4186_vm0, %v300_v48  ;;  %334 = vst.msk [vmem:[#allocation2 + $0xb9] sm:$0x7f] %vm4186_vm0, %v302_v58 }
  0xd0   : > { %833 = vst.msk [vmem:[#allocation2 + $0x70] sm:$0xff] %vm4161_vm12, %v3307_v21  ;;  %vm4192_vm0 = vmmov %vm4189_vm3  ;;  %v2355_v21 = vld [vmem:[%s2932_s14 + $0xd9] sm:$0x7f] }
  0xd1   : > { %834 = vst.msk [vmem:[#allocation2 + $0x78] sm:$0x7f] %vm819_vm15, %v2345_v42  ;;  %v2358_v42 = vld [vmem:[%s2932_s14 + $0xf1] sm:$0xff] }
  0xd2   : > { %714 = vst.msk [vmem:[#allocation2 + $0x91] sm:$0xff] %vm4164_vm10, %v3383_v40 }
  0xd3   : > { %715 = vst.msk [vmem:[#allocation2 + $0x99] sm:$0x7f] %vm696_vm13, %v2289_v45 }
  0xd4   : > { %393 = vst.msk [vmem:[#allocation2 + $0xa8] sm:$0xff] %vm373_vm6, %v3342_v28  ;;  %395 = vst.msk [vmem:[#allocation2 + $0xb8] sm:$0xff] %vm373_vm6, %v2319_v46  ;;  %v2327_v28 = vld [vmem:[%s2932_s14 + $0xe8] sm:$0xff] }
  0xd5   : > { %335 = vst.msk [vmem:[#allocation2 + $0xc1] sm:$0xff] %vm4188_vm9, %v2290_v53  ;;  %vm4191_vm9 = vmmov %vm4189_vm3  ;;  %vm4195_vm3 = vcmask 97344  }
  0xd6   : > { %775 = vst.msk [vmem:[#allocation2 + $0x90] sm:$0xff] %vm4163_vm11, %v3383_v40  ;;  %776 = vst.msk [vmem:[#allocation2 + $0x98] sm:$0xff] %vm4163_vm11, %v2319_v46  ;;  %2580 = vmatprep.mubr.msk.f32.mxu1 %vm4191_vm9, %v1298_v60  ;;  %vm4194_vm9 = vcmask 30720   ;;  %v1972_v60 = vld [vmem:[%s4152_s2 + $0x20] sm:$0xf] }
  0xd7   : > { %455 = vst.msk [vmem:[#allocation2 + $0xa8] sm:$0x7f] %vm436_vm1, %v423_v49  ;;  %2581 = vmatmul.mubr.msk.f32.vlgmr.msra.gmra.mrb[0].mxu1 %vm4192_vm0, %v1299_v61  ;;  %457 = vst.msk [vmem:[#allocation2 + $0xb8] sm:$0x7f] %vm436_vm1, %v425_v59  ;;  %v897_v12 = vld [vmem:[#allocation2 + $0x70] sm:$0xff] }
  0xd8   : > { %396 = vst.msk [vmem:[#allocation2 + $0xc0] sm:$0xff] %vm373_vm6, %v2290_v53  ;;  %v898_v13 = vld [vmem:[#allocation2 + $0x78] sm:$0xff]  ;;  %v1731_v59 = vld [vmem:[%s4152_s2 + $0x20] sm:$0xf] }
  0xd9   : > { %837 = vst.msk [vmem:[#allocation2 + $0x90] sm:$0xff] %vm4161_vm12, %v2348_v44  ;;  %v3633_v61 = vld [vmem:[%s4153_s3] ss:$0 sm:$0xff] }
  0xda   : > { %838 = vst.msk [vmem:[#allocation2 + $0x98] sm:$0x7f] %vm819_vm15, %v2349_v51 }
  0xdb   : > { %520 = vst.msk [vmem:[#allocation2 + $0xa1] sm:$0xff] %vm4165_vm2, %v3383_v40  ;;  %522 = vst.msk [vmem:[#allocation2 + $0xb1] sm:$0xff] %vm4165_vm2, %v2290_v53 }
  0xdc   : > { %521 = vst.msk [vmem:[#allocation2 + $0xa9] sm:$0x7f] %vm500_vm4, %v487_v52  ;;  %523 = vst.msk [vmem:[#allocation2 + $0xb9] sm:$0x7f] %vm500_vm4, %v489_v63 }
  0xdd   : > { %458 = vst.msk [vmem:[#allocation2 + $0xc0] sm:$0xff] %vm4190_vm14, %v2350_v55  ;;  %vm4193_vm14 = vcmask 31744  }
  0xde   : > { %585 = vst.msk [vmem:[#allocation2 + $0xa0] sm:$0xff] %vm564_vm5, %v3383_v40  ;;  %586 = vst.msk [vmem:[#allocation2 + $0xa8] sm:$0xff] %vm564_vm5, %v2319_v46 }
  0xdf   : > { %651 = vst.msk [vmem:[#allocation2 + $0xa0] sm:$0xff] %vm629_vm7, %v2348_v44  ;;  %vm4196_vm0 = vmmov %vm4193_vm14  ;;  %v628_v44 = vld [vmem:[%s2932_s14 + $0xf9] sm:$0x7f] }
  0xe0   : > { %652 = vst.msk [vmem:[#allocation2 + $0xa8] sm:$0x7f] %vm631_vm8, %v618_v54  ;;  %v1300_v18 = vld [vmem:[#allocation2 + $0x90] sm:$0xff]  ;;  %v1728_v54 = vld [vmem:[%s4152_s2 + $0x8] sm:$0xff] }
  0xe1   : > { %337 = vst.msk [vmem:[#allocation2 + $0xd1] sm:$0xff] %vm4193_vm14, %v2292_v1  ;;  %vm4197_vm14 = vcmask 293888   ;;  %v1301_v19 = vld [vmem:[#allocation2 + $0x98] sm:$0xff] }
  0xe2   : > { %716 = vst.msk [vmem:[#allocation2 + $0xa1] sm:$0xff] %vm4164_vm10, %v2290_v53  ;;  %2567 = vmatprep.mubr.msk.f32.mxu0 %vm4197_vm14, %v897_v12 }
  0xe3   : > { %717 = vst.msk [vmem:[#allocation2 + $0xa9] sm:$0x7f] %vm696_vm13, %v2291_v56  ;;  %v1729_v56 = vld [vmem:[%s4152_s2 + $0x10] sm:$0xff] }
  0xe4   : > { %336 = vst.msk [vmem:[#allocation2 + $0xc9] sm:$0x7f] %vm4194_vm9, %v304_v5  ;;  %vm4198_vm9 = vmmov %vm4197_vm14 }
  0xe5   : > { %398 = vst.msk [vmem:[#allocation2 + $0xd0] sm:$0xff] %vm373_vm6, %v2292_v1  ;;  %397 = vst.msk [vmem:[#allocation2 + $0xc8] sm:$0xff] %vm373_vm6, %v2321_v57  ;;  %2568 = vmatmul.mubr.msk.f32.gmra.mrb[14].mxu0 %vm4198_vm9, %v898_v13 }
  0xe6   : > { %777 = vst.msk [vmem:[#allocation2 + $0xa0] sm:$0xff] %vm4163_vm11, %v2290_v53  ;;  %778 = vst.msk [vmem:[#allocation2 + $0xa8] sm:$0xff] %vm4163_vm11, %v2321_v57 }
  0xe7   : > { %587 = vst.msk [vmem:[#allocation2 + $0xb0] sm:$0xff] %vm564_vm5, %v2290_v53  ;;  %588 = vst.msk [vmem:[#allocation2 + $0xb8] sm:$0xff] %vm564_vm5, %v2321_v57  ;;  %v1727_v53 = vld [vmem:[%s4152_s2] sm:$0xff]  ;;  %v1730_v57 = vld [vmem:[%s4152_s2 + $0x18] sm:$0xff] }
  0xe8   : > { %460 = vst.msk [vmem:[#allocation2 + $0xd0] sm:$0xff] %vm4195_vm3, %v2352_v2  ;;  %vm4199_vm3 = vcmask 30720   ;;  %vm4201_vm14 = vmmov %vm4198_vm9  ;;  %v2692_v58 = vpack.c.bf16 %v1730_v57, %v1729_v56 }
  0xe9   : > { %839 = vst.msk [vmem:[#allocation2 + $0xa0] sm:$0xff] %vm4161_vm12, %v2350_v55  ;;  %2583 = vmatprep.mubr.msk.f32.mxu1 %vm4201_vm14, %v1300_v18  ;;  %vm4204_vm14 = vcmask 97344  }
  0xea   : > { %840 = vst.msk [vmem:[#allocation2 + $0xa8] sm:$0x7f] %vm819_vm15, %v2351_v62  ;;  %2584 = vmatmul.mubr.msk.f32.gmra.mrb[2].mxu1 %vm4198_vm9, %v1301_v19 }
  0xeb   : > { %653 = vst.msk [vmem:[#allocation2 + $0xb0] sm:$0xff] %vm629_vm7, %v2350_v55  ;;  %v2688_v55 = vpack.c.bf16 %v1728_v54, %v1727_v53 }
  0xec   : > { %654 = vst.msk [vmem:[#allocation2 + $0xb8] sm:$0x7f] %vm631_vm8, %v620_v0 }
  0xed   : > { %459 = vst.msk [vmem:[#allocation2 + $0xc8] sm:$0x7f] %vm436_vm1, %v427_v7  ;;  %2689 = vmatprep.subr.bf16.mxu0 %v2688_v55  ;;  %2697 = vmatprep.subr.bf16.mxu1 %v2688_v55 }
  0xee   : > { %339 = vst.msk [vmem:[#allocation2 + $0xe1] sm:$0xff] %vm4196_vm0, %v2294_v10  ;;  %vm4200_vm0 = vcmask 97344   ;;  %2691 = vmatpush3.bf16.msra.mxu0 %v2688_v55  ;;  %2699 = vmatpush3.bf16.msra.mxu1 %v2688_v55 }
  0xef   : > { %718 = vst.msk [vmem:[#allocation2 + $0xb1] sm:$0xff] %vm4164_vm10, %v2292_v1  ;;  %2693 = vmatprep.subr.bf16.mxu0 %v2692_v58  ;;  %2701 = vmatprep.subr.bf16.mxu1 %v2692_v58 }
  0xf0   : > { %719 = vst.msk [vmem:[#allocation2 + $0xb9] sm:$0x7f] %vm696_vm13, %v2293_v3  ;;  %v1302_v30 = vld [vmem:[#allocation2 + $0xa0] sm:$0xff] }
  0xf1   : > { %524 = vst.msk [vmem:[#allocation2 + $0xc1] sm:$0xff] %vm4165_vm2, %v2292_v1  ;;  %v1303_v31 = vld [vmem:[#allocation2 + $0xa8] sm:$0xff]  ;;  %2586 = vmatprep.mubr.msk.f32.mxu1 %vm4198_vm9, %v1302_v30 }
  0xf2   : > { %525 = vst.msk [vmem:[#allocation2 + $0xc9] sm:$0x7f] %vm500_vm4, %v491_v8  ;;  %2695 = vmatpush3.bf16.msra.mxu0 %v2692_v58  ;;  %2703 = vmatpush3.bf16.msra.mxu1 %v2692_v58 }
  0xf3   : > { %400 = vst.msk [vmem:[#allocation2 + $0xe0] sm:$0xff] %vm373_vm6, %v2294_v10 }
  0xf4   : > { %779 = vst.msk [vmem:[#allocation2 + $0xb0] sm:$0xff] %vm4163_vm11, %v2292_v1  ;;  %780 = vst.msk [vmem:[#allocation2 + $0xb8] sm:$0xff] %vm4163_vm11, %v2323_v4 }
  0xf5   : > { %589 = vst.msk [vmem:[#allocation2 + $0xc0] sm:$0xff] %vm564_vm5, %v2292_v1  ;;  %590 = vst.msk [vmem:[#allocation2 + $0xc8] sm:$0xff] %vm564_vm5, %v2323_v4 }
  0xf6   : > { %338 = vst.msk [vmem:[#allocation2 + $0xd9] sm:$0x7f] %vm4199_vm3, %v306_v16  ;;  %vm4202_vm3 = vcmask 31744  }
  0xf7   : > { %462 = vst.msk [vmem:[#allocation2 + $0xe0] sm:$0xff] %vm4200_vm0, %v3493_v11  ;;  %vm4203_vm0 = vcmask 30720  }
  0xf8   : > { %841 = vst.msk [vmem:[#allocation2 + $0xb0] sm:$0xff] %vm4161_vm12, %v2352_v2 }
  0xf9   : > { %842 = vst.msk [vmem:[#allocation2 + $0xb8] sm:$0x7f] %vm819_vm15, %v2353_v6 }
  0xfa   : > { %655 = vst.msk [vmem:[#allocation2 + $0xc0] sm:$0xff] %vm629_vm7, %v2352_v2 }
  0xfb   : > { %656 = vst.msk [vmem:[#allocation2 + $0xc8] sm:$0x7f] %vm631_vm8, %v622_v9 }
  0xfc   : > { %399 = vst.msk [vmem:[#allocation2 + $0xd8] sm:$0xff] %vm373_vm6, %v2323_v4 }
  0xfd   : > { %720 = vst.msk [vmem:[#allocation2 + $0xc1] sm:$0xff] %vm4164_vm10, %v2294_v10 }
  0xfe   : > { %721 = vst.msk [vmem:[#allocation2 + $0xc9] sm:$0x7f] %vm696_vm13, %v2295_v14 }
  0xff   : > { %461 = vst.msk [vmem:[#allocation2 + $0xd8] sm:$0x7f] %vm436_vm1, %v429_v17  ;;  %v1304_v39 = vld [vmem:[#allocation2 + $0xb0] sm:$0xff] }
 0x100   : > { %341 = vst.msk [vmem:[#allocation2 + $0xf1] sm:$0xff] %vm4202_vm3, %v2296_v22  ;;  %vm4205_vm3 = vmmov %vm4198_vm9  ;;  %v1305_v40 = vld [vmem:[#allocation2 + $0xb8] sm:$0xff] }
 0x101   : > { %781 = vst.msk [vmem:[#allocation2 + $0xc0] sm:$0xff] %vm4163_vm11, %v2294_v10  ;;  %782 = vst.msk [vmem:[#allocation2 + $0xc8] sm:$0xff] %vm4163_vm11, %v2325_v15  ;;  %2587 = vmatmul.mubr.msk.f32.gmra.mrb[4].mxu1 %vm4205_vm3, %v1303_v31 }
 0x102   : > { %526 = vst.msk [vmem:[#allocation2 + $0xd1] sm:$0xff] %vm4165_vm2, %v2294_v10  ;;  %vm4207_vm9 = vmmov %vm4205_vm3 }
 0x103   : > { %527 = vst.msk [vmem:[#allocation2 + $0xd9] sm:$0x7f] %vm500_vm4, %v493_v20 }
 0x104   : > { %402 = vst.msk [vmem:[#allocation2 + $0xf0] sm:$0xff] %vm373_vm6, %v2296_v22 }
 0x105   : > { %843 = vst.msk [vmem:[#allocation2 + $0xc0] sm:$0xff] %vm4161_vm12, %v3493_v11 }
 0x106   : > { %844 = vst.msk [vmem:[#allocation2 + $0xc8] sm:$0x7f] %vm819_vm15, %v2355_v21 }
 0x107   : > { %591 = vst.msk [vmem:[#allocation2 + $0xd0] sm:$0xff] %vm564_vm5, %v2294_v10  ;;  %592 = vst.msk [vmem:[#allocation2 + $0xd8] sm:$0xff] %vm564_vm5, %v2325_v15 }
 0x108   : > { %340 = vst.msk [vmem:[#allocation2 + $0xe9] sm:$0x7f] %vm4203_vm0, %v308_v26  ;;  %342 = vst.msk [vmem:[#allocation2 + $0xf9] sm:$0x7f] %vm4203_vm0, %v310_v35 }
 0x109   : > { %464 = vst.msk [vmem:[#allocation2 + $0xf0] sm:$0xff] %vm4204_vm14, %v2356_v24  ;;  %vm4206_vm14 = vmmov %vm4205_vm3 }
 0x10a   : > { %657 = vst.msk [vmem:[#allocation2 + $0xd0] sm:$0xff] %vm629_vm7, %v3493_v11  ;;  %2589 = vmatprep.mubr.msk.f32.mxu1 %vm4206_vm14, %v1304_v39 }
 0x10b   : > { %658 = vst.msk [vmem:[#allocation2 + $0xd8] sm:$0x7f] %vm631_vm8, %v624_v23  ;;  %2590 = vmatmul.mubr.msk.f32.gmra.mrb[6].mxu1 %vm4207_vm9, %v1305_v40 }
 0x10c   : > { %401 = vst.msk [vmem:[#allocation2 + $0xe8] sm:$0xff] %vm373_vm6, %v2325_v15  ;;  %403 = vst.msk [vmem:[#allocation2 + $0xf8] sm:$0xff] %vm373_vm6, %v2327_v28  ;;  %v1306_v45 = vld [vmem:[#allocation2 + $0xc0] sm:$0xff] }
 0x10d   : > { %722 = vst.msk [vmem:[#allocation2 + $0xd1] sm:$0xff] %vm4164_vm10, %v2296_v22  ;;  %v1307_v46 = vld [vmem:[#allocation2 + $0xc8] sm:$0xff] }
 0x10e   : > { %723 = vst.msk [vmem:[#allocation2 + $0xd9] sm:$0x7f] %vm696_vm13, %v2297_v25 }
 0x10f   : > { %463 = vst.msk [vmem:[#allocation2 + $0xe8] sm:$0x7f] %vm436_vm1, %v431_v27  ;;  %465 = vst.msk [vmem:[#allocation2 + $0xf8] sm:$0x7f] %vm436_vm1, %v433_v37 }
 0x110   : > { %783 = vst.msk [vmem:[#allocation2 + $0xd0] sm:$0xff] %vm4163_vm11, %v2296_v22  ;;  %784 = vst.msk [vmem:[#allocation2 + $0xd8] sm:$0xff] %vm4163_vm11, %v2327_v28 }
 0x111   : > { %528 = vst.msk [vmem:[#allocation2 + $0xe1] sm:$0xff] %vm4165_vm2, %v2296_v22  ;;  %530 = vst.msk [vmem:[#allocation2 + $0xf1] sm:$0xff] %vm4165_vm2, %v2298_v34 }
 0x112   : > { %529 = vst.msk [vmem:[#allocation2 + $0xe9] sm:$0x7f] %vm500_vm4, %v495_v29  ;;  %531 = vst.msk [vmem:[#allocation2 + $0xf9] sm:$0x7f] %vm500_vm4, %v497_v38 }
 0x113   : > { %845 = vst.msk [vmem:[#allocation2 + $0xd0] sm:$0xff] %vm4161_vm12, %v2356_v24  ;;  %vm4208_vm1 = vmmov %vm4205_vm3 }
 0x114   : > { %846 = vst.msk [vmem:[#allocation2 + $0xd8] sm:$0x7f] %vm819_vm15, %v2357_v32  ;;  %2592 = vmatprep.mubr.msk.f32.mxu1 %vm4208_vm1, %v1306_v45  ;;  %vm4209_vm3 = vmmov %vm4208_vm1 }
 0x115   : > { %593 = vst.msk [vmem:[#allocation2 + $0xe0] sm:$0xff] %vm564_vm5, %v2296_v22  ;;  %594 = vst.msk [vmem:[#allocation2 + $0xe8] sm:$0xff] %vm564_vm5, %v2327_v28  ;;  %2593 = vmatmul.mubr.msk.f32.gmra.mrb[8].mxu1 %vm4209_vm3, %v1307_v46 }
 0x116   : > { %659 = vst.msk [vmem:[#allocation2 + $0xe0] sm:$0xff] %vm629_vm7, %v2356_v24  ;;  %vm4210_vm0 = vmmov %vm4208_vm1 }
 0x117   : > { %660 = vst.msk [vmem:[#allocation2 + $0xe8] sm:$0x7f] %vm631_vm8, %v626_v33  ;;  %vm4211_vm14 = vmmov %vm4210_vm0 }
 0x118   : > { %724 = vst.msk [vmem:[#allocation2 + $0xe1] sm:$0xff] %vm4164_vm10, %v2298_v34  ;;  %vm4212_vm9 = vmmov %vm4210_vm0 }
 0x119   : > { %725 = vst.msk [vmem:[#allocation2 + $0xe9] sm:$0x7f] %vm696_vm13, %v2299_v36  ;;  %vm4213_vm1 = vmmov %vm4210_vm0 }
 0x11a   : > { %785 = vst.msk [vmem:[#allocation2 + $0xe0] sm:$0xff] %vm4163_vm11, %v2298_v34  ;;  %786 = vst.msk [vmem:[#allocation2 + $0xe8] sm:$0xff] %vm4163_vm11, %v2329_v41  ;;  %v1308_v47 = vld [vmem:[#allocation2 + $0xd0] sm:$0xff] }
 0x11b   : > { %595 = vst.msk [vmem:[#allocation2 + $0xf0] sm:$0xff] %vm564_vm5, %v2298_v34  ;;  %596 = vst.msk [vmem:[#allocation2 + $0xf8] sm:$0xff] %vm564_vm5, %v2329_v41  ;;  %2595 = vmatprep.mubr.msk.f32.mxu1 %vm4210_vm0, %v1308_v47  ;;  %v1309_v48 = vld [vmem:[#allocation2 + $0xd8] sm:$0xff] }
 0x11c   : > { %847 = vst.msk [vmem:[#allocation2 + $0xe0] sm:$0xff] %vm4161_vm12, %v2358_v42  ;;  %2596 = vmatmul.mubr.msk.f32.gmra.mrb[10].mxu1 %vm4211_vm14, %v1309_v48  ;;  %vm4215_vm12 = vmmov %vm4210_vm0 }
 0x11d   : > { %848 = vst.msk [vmem:[#allocation2 + $0xe8] sm:$0x7f] %vm819_vm15, %v2359_v43  ;;  %vm4214_vm15 = vmmov %vm4210_vm0 }
 0x11e   : > { %661 = vst.msk [vmem:[#allocation2 + $0xf0] sm:$0xff] %vm629_vm7, %v2358_v42 }
 0x11f   : > { %662 = vst.msk [vmem:[#allocation2 + $0xf8] sm:$0x7f] %vm631_vm8, %v628_v44  ;;  %vm4216_vm8 = vcmask 1043456  }
 0x120   : > { %2612 = vmatprep.subr.msk.mxu0 %vm4216_vm8, %v1731_v59  ;;  %vm4218_vm3 = vmmov %vm4216_vm8 }
 0x121   : > { %2646 = vmatprep.subr.msk.mxu1 %vm4218_vm3, %v1972_v60  ;;  %vm4219_vm0 = vmmov %vm4218_vm3  ;;  %vm4222_vm3 = vcmask 97344  }
 0x122   : > { %2647 = vmatpush3.msk.msra.mxu1 %vm4219_vm0, %v1972_v60 }
 0x123   : > { %v1310_v49 = vld [vmem:[#allocation2 + $0xe0] sm:$0xff] }
 0x124   : > { %2598 = vmatprep.mubr.msk.f32.mxu1 %vm4212_vm9, %v1310_v49  ;;  %v1311_v50 = vld [vmem:[#allocation2 + $0xe8] sm:$0xff] }
 0x125   : > { %v1312_v51 = vld [vmem:[#allocation2 + $0xf0] sm:$0xff]  ;;  %2599 = vmatmul.mubr.msk.f32.gmra.mrb[12].mxu1 %vm4213_vm1, %v1311_v50  ;;  %vm4220_vm1 = vcmask 30720  }
 0x126   : > { %2601 = vmatprep.mubr.msk.f32.mxu1 %vm4214_vm15, %v1312_v51  ;;  %v1313_v52 = vld [vmem:[#allocation2 + $0xf8] sm:$0xff]  ;;  %vm1188_vm15 = vcmask 97345  }
 0x129   : > { %2602 = vmatmul.mubr.msk.f32.gmra.mrb[14].mxu1 %vm4215_vm12, %v1313_v52  ;;  %vm4217_vm12 = vmmov %vm4216_vm8  ;;  %vm1237_vm8 = vcmask 195745  }
 0x12a   : > { %2613 = vmatpush3.msk.msra.mxu0 %vm4217_vm12, %v1731_v59  ;;  %vm4221_vm12 = vcmask 31744  }
 0x14f   : > { %v2548_v62 = vpop.f32.mrb[0].mxu0 }
 0x150   : > { %v1035_v63 = vadd.f32 %v2548_v62, %v3633_v61  ;;  %v1029_v0 = vpop.f32.mrb[1].mxu0 }
 0x151   : > { %v1030_v1 = vadd.f32 %v3633_v61, %v1029_v0 }
 0x152   : > { %vm1109_vm14 = vcmp.gt.f32.partialorder %v1035_v63, 0.0  ;;  %v1125_v2 = vmul.f32 0.01, %v1035_v63 }
 0x153   : > { %vm1108_vm9 = vcmp.gt.f32.partialorder %v1030_v1, 0.0  ;;  %v1124_v3 = vmul.f32 0.01, %v1030_v1 }
 0x154   : > { %v1141_v4 = vsel %vm1109_vm14, %v1035_v63, %v1125_v2 }
 0x155   : > { %1157 = vst.msk [vmem:[#allocation3 + $0x19] sm:$0x7f] %vm4220_vm1, %v1141_v4  ;;  %v1140_v5 = vsel %vm1108_vm9, %v1030_v1, %v1124_v3  ;;  %vm4223_vm9 = vmmov %vm4220_vm1  ;;  %vm4162_vm1 = vcmask 294145  }
 0x156   : > { %1206 = vst.msk [vmem:[#allocation3 + $0x9] sm:$0x7f] %vm500_vm4, %v1141_v4 }
 0x157   : > { %1156 = vst.msk [vmem:[#allocation3 + $0x11] sm:$0xff] %vm4221_vm12, %v1140_v5 }
 0x158   : > { %1205 = vst.msk [vmem:[#allocation3 + $0x1] sm:$0xff] %vm4165_vm2, %v1140_v5 }
 0x159   : > { %1172 = vst.msk [vmem:[#allocation3 + $0x10] sm:$0xff] %vm373_vm6, %v1140_v5  ;;  %1173 = vst.msk [vmem:[#allocation3 + $0x18] sm:$0xff] %vm373_vm6, %v1141_v4 }
 0x15a   : > { %1221 = vst.msk [vmem:[#allocation3] sm:$0xff] %vm564_vm5, %v1140_v5  ;;  %1222 = vst.msk [vmem:[#allocation3 + $0x8] sm:$0xff] %vm564_vm5, %v1141_v4 }
 0x15b   : > { %1189 = vst.msk [vmem:[#allocation3 + $0xf] sm:$0xfe] %vm1188_vm15, %v1140_v5 }
 0x15c   : > { %v2551_v6 = vpop.f32.mrb[2].mxu0  ;;  %1190 = vst.msk [vmem:[#allocation3 + $0x17] sm:$0xff] %vm4222_vm3, %v1141_v4 }
 0x15d   : > { %v1045_v7 = vadd.f32 %v2551_v6, %v3633_v61  ;;  %v1039_v8 = vpop.f32.mrb[3].mxu0  ;;  %1238 = vst.msk [vmem:[#allocation3 - $0x1] sm:$0xfe] %vm1237_vm8, %v1140_v5 }
 0x15e   : > { %v1040_v9 = vadd.f32 %v3633_v61, %v1039_v8  ;;  %1239 = vst.msk [vmem:[#allocation3 + $0x7] sm:$0xff] %vm629_vm7, %v1141_v4 }
 0x15f   : > { %vm1111_vm0 = vcmp.gt.f32.partialorder %v1045_v7, 0.0  ;;  %v1127_v10 = vmul.f32 0.01, %v1045_v7 }
 0x160   : > { %vm1110_vm14 = vcmp.gt.f32.partialorder %v1040_v9, 0.0  ;;  %v1126_v11 = vmul.f32 0.01, %v1040_v9 }
 0x161   : > { %v1143_v13 = vsel %vm1111_vm0, %v1045_v7, %v1127_v10 }
 0x162   : > { %1159 = vst.msk [vmem:[#allocation3 + $0x29] sm:$0x7f] %vm4223_vm9, %v1143_v13  ;;  %v1142_v16 = vsel %vm1110_vm14, %v1040_v9, %v1126_v11  ;;  %vm4224_vm14 = vcmask 294144   ;;  %vm4225_vm9 = vcmask 97344  }
 0x163   : > { %1208 = vst.msk [vmem:[#allocation3 + $0x19] sm:$0x7f] %vm500_vm4, %v1143_v13 }
 0x164   : > { %1255 = vst.msk [vmem:[#allocation3 + $0x9] sm:$0x7f] %vm696_vm13, %v1143_v13 }
 0x165   : > { %1158 = vst.msk [vmem:[#allocation3 + $0x21] sm:$0xff] %vm4221_vm12, %v1142_v16  ;;  %vm4226_vm12 = vcmask 30720  }
 0x166   : > { %1207 = vst.msk [vmem:[#allocation3 + $0x11] sm:$0xff] %vm4165_vm2, %v1142_v16 }
 0x167   : > { %1254 = vst.msk [vmem:[#allocation3 + $0x1] sm:$0xff] %vm4164_vm10, %v1142_v16 }
 0x168   : > { %1174 = vst.msk [vmem:[#allocation3 + $0x20] sm:$0xff] %vm373_vm6, %v1142_v16  ;;  %1175 = vst.msk [vmem:[#allocation3 + $0x28] sm:$0xff] %vm373_vm6, %v1143_v13 }
 0x169   : > { %1223 = vst.msk [vmem:[#allocation3 + $0x10] sm:$0xff] %vm564_vm5, %v1142_v16  ;;  %1224 = vst.msk [vmem:[#allocation3 + $0x18] sm:$0xff] %vm564_vm5, %v1143_v13 }
 0x16a   : > { %1268 = vst.msk [vmem:[#allocation3] sm:$0xff] %vm4163_vm11, %v1142_v16  ;;  %1269 = vst.msk [vmem:[#allocation3 + $0x8] sm:$0xff] %vm4163_vm11, %v1143_v13 }
 0x16b   : > { %v2554_v12 = vpop.f32.mrb[4].mxu0  ;;  %1191 = vst.msk [vmem:[#allocation3 + $0x1f] sm:$0xfe] %vm1188_vm15, %v1142_v16 }
 0x16c   : > { %v1055_v14 = vadd.f32 %v2554_v12, %v3633_v61  ;;  %v1049_v15 = vpop.f32.mrb[5].mxu0  ;;  %1240 = vst.msk [vmem:[#allocation3 + $0xf] sm:$0xfe] %vm1237_vm8, %v1142_v16 }
 0x16d   : > { %v1050_v17 = vadd.f32 %v3633_v61, %v1049_v15  ;;  %1283 = vst.msk [vmem:[#allocation3 - $0x1] sm:$0xfe] %vm4162_vm1, %v1142_v16  ;;  %vm4227_vm1 = vcmask 31744  }
 0x16e   : > { %vm1113_vm3 = vcmp.gt.f32.partialorder %v1055_v14, 0.0  ;;  %v1129_v18 = vmul.f32 0.01, %v1055_v14  ;;  %1284 = vst.msk [vmem:[#allocation3 + $0x7] sm:$0xff] %vm4224_vm14, %v1143_v13 }
 0x16f   : > { %vm1112_vm0 = vcmp.gt.f32.partialorder %v1050_v17, 0.0  ;;  %v1128_v19 = vmul.f32 0.01, %v1050_v17  ;;  %1192 = vst.msk [vmem:[#allocation3 + $0x27] sm:$0xff] %vm4225_vm9, %v1143_v13 }
 0x170   : > { %v1145_v21 = vsel %vm1113_vm3, %v1055_v14, %v1129_v18  ;;  %1241 = vst.msk [vmem:[#allocation3 + $0x17] sm:$0xff] %vm629_vm7, %v1143_v13 }
 0x171   : > { %1161 = vst.msk [vmem:[#allocation3 + $0x39] sm:$0x7f] %vm4226_vm12, %v1145_v21  ;;  %v1144_v24 = vsel %vm1112_vm0, %v1050_v17, %v1128_v19 }
 0x172   : > { %1210 = vst.msk [vmem:[#allocation3 + $0x29] sm:$0x7f] %vm500_vm4, %v1145_v21 }
 0x173   : > { %1257 = vst.msk [vmem:[#allocation3 + $0x19] sm:$0x7f] %vm696_vm13, %v1145_v21 }
 0x174   : > { %v2557_v20 = vpop.f32.mrb[6].mxu0  ;;  %1160 = vst.msk [vmem:[#allocation3 + $0x31] sm:$0xff] %vm4227_vm1, %v1144_v24  ;;  %vm4228_vm1 = vcmask 294145  }
 0x175   : > { %v1065_v22 = vadd.f32 %v2557_v20, %v3633_v61  ;;  %v1059_v23 = vpop.f32.mrb[7].mxu0  ;;  %1209 = vst.msk [vmem:[#allocation3 + $0x21] sm:$0xff] %vm4165_vm2, %v1144_v24  ;;  %v1711_v37 = vld [vmem:[#allocation3] sm:$0xff]  ;;  %v1712_v38 = vld [vmem:[#allocation3 + $0x8] sm:$0xff] }
 0x176   : > { %v1060_v25 = vadd.f32 %v3633_v61, %v1059_v23  ;;  %1256 = vst.msk [vmem:[#allocation3 + $0x11] sm:$0xff] %vm4164_vm10, %v1144_v24 }
 0x177   : > { %vm1115_vm3 = vcmp.gt.f32.partialorder %v1065_v22, 0.0  ;;  %v1131_v26 = vmul.f32 0.01, %v1065_v22  ;;  %1176 = vst.msk [vmem:[#allocation3 + $0x30] sm:$0xff] %vm373_vm6, %v1144_v24  ;;  %1177 = vst.msk [vmem:[#allocation3 + $0x38] sm:$0xff] %vm373_vm6, %v1145_v21 }
 0x178   : > { %1225 = vst.msk [vmem:[#allocation3 + $0x20] sm:$0xff] %vm564_vm5, %v1144_v24  ;;  %1226 = vst.msk [vmem:[#allocation3 + $0x28] sm:$0xff] %vm564_vm5, %v1145_v21  ;;  %vm1114_vm0 = vcmp.gt.f32.partialorder %v1060_v25, 0.0  ;;  %v1130_v27 = vmul.f32 0.01, %v1060_v25 }
 0x179   : > { %1270 = vst.msk [vmem:[#allocation3 + $0x10] sm:$0xff] %vm4163_vm11, %v1144_v24  ;;  %1271 = vst.msk [vmem:[#allocation3 + $0x18] sm:$0xff] %vm4163_vm11, %v1145_v21  ;;  %v1147_v29 = vsel %vm1115_vm3, %v1065_v22, %v1131_v26 }
 0x17a   : > { %1193 = vst.msk [vmem:[#allocation3 + $0x2f] sm:$0xfe] %vm1188_vm15, %v1144_v24  ;;  %v1146_v32 = vsel %vm1114_vm0, %v1060_v25, %v1130_v27 }
 0x17b   : > { %1242 = vst.msk [vmem:[#allocation3 + $0x1f] sm:$0xfe] %vm1237_vm8, %v1144_v24 }
 0x17c   : > { %1285 = vst.msk [vmem:[#allocation3 + $0xf] sm:$0xfe] %vm4228_vm1, %v1144_v24  ;;  %vm4229_vm1 = vcmask 31744  }
 0x17d   : > { %1286 = vst.msk [vmem:[#allocation3 + $0x17] sm:$0xff] %vm4224_vm14, %v1145_v21  ;;  %vm4230_vm14 = vcmask 294145  }
 0x17e   : > { %1194 = vst.msk [vmem:[#allocation3 + $0x37] sm:$0xff] %vm4225_vm9, %v1145_v21  ;;  %vm4231_vm9 = vcmask 294144  }
 0x17f   : > { %v2560_v28 = vpop.f32.mrb[8].mxu0  ;;  %1243 = vst.msk [vmem:[#allocation3 + $0x27] sm:$0xff] %vm629_vm7, %v1145_v21 }
 0x180   : > { %v1075_v30 = vadd.f32 %v2560_v28, %v3633_v61  ;;  %v1069_v31 = vpop.f32.mrb[9].mxu0  ;;  %1163 = vst.msk [vmem:[#allocation3 + $0x49] sm:$0x7f] %vm4226_vm12, %v1147_v29  ;;  %vm4232_vm12 = vcmask 97344  }
 0x181   : > { %1212 = vst.msk [vmem:[#allocation3 + $0x39] sm:$0x7f] %vm500_vm4, %v1147_v29  ;;  %v1070_v33 = vadd.f32 %v3633_v61, %v1069_v31 }
 0x182   : > { %1259 = vst.msk [vmem:[#allocation3 + $0x29] sm:$0x7f] %vm696_vm13, %v1147_v29  ;;  %vm1117_vm3 = vcmp.gt.f32.partialorder %v1075_v30, 0.0  ;;  %v1133_v34 = vmul.f32 0.01, %v1075_v30 }
 0x183   : > { %1162 = vst.msk [vmem:[#allocation3 + $0x41] sm:$0xff] %vm4229_vm1, %v1146_v32  ;;  %vm1116_vm0 = vcmp.gt.f32.partialorder %v1070_v33, 0.0  ;;  %v1132_v35 = vmul.f32 0.01, %v1070_v33  ;;  %vm4233_vm1 = vcmask 293888  }
 0x184   : > { %1211 = vst.msk [vmem:[#allocation3 + $0x31] sm:$0xff] %vm4165_vm2, %v1146_v32  ;;  %v1149_v39 = vsel %vm1117_vm3, %v1075_v30, %v1133_v34  ;;  %2614 = vmatprep.mubr.msk.f32.mxu0 %vm4233_vm1, %v1711_v37  ;;  %v1713_v48 = vld [vmem:[#allocation3 + $0x10] sm:$0xff]  ;;  %v1714_v54 = vld [vmem:[#allocation3 + $0x18] sm:$0xff] }
 0x185   : > { %1258 = vst.msk [vmem:[#allocation3 + $0x21] sm:$0xff] %vm4164_vm10, %v1146_v32  ;;  %v1148_v42 = vsel %vm1116_vm0, %v1070_v33, %v1132_v35 }
 0x186   : > { %1178 = vst.msk [vmem:[#allocation3 + $0x40] sm:$0xff] %vm373_vm6, %v1146_v32  ;;  %1179 = vst.msk [vmem:[#allocation3 + $0x48] sm:$0xff] %vm373_vm6, %v1147_v29 }
 0x187   : > { %1227 = vst.msk [vmem:[#allocation3 + $0x30] sm:$0xff] %vm564_vm5, %v1146_v32  ;;  %1228 = vst.msk [vmem:[#allocation3 + $0x38] sm:$0xff] %vm564_vm5, %v1147_v29 }
 0x188   : > { %1272 = vst.msk [vmem:[#allocation3 + $0x20] sm:$0xff] %vm4163_vm11, %v1146_v32  ;;  %1273 = vst.msk [vmem:[#allocation3 + $0x28] sm:$0xff] %vm4163_vm11, %v1147_v29  ;;  %vm4234_vm11 = vcmask 30720  }
 0x189   : > { %1195 = vst.msk [vmem:[#allocation3 + $0x3f] sm:$0xfe] %vm1188_vm15, %v1146_v32 }
 0x18a   : > { %1244 = vst.msk [vmem:[#allocation3 + $0x2f] sm:$0xfe] %vm1237_vm8, %v1146_v32 }
 0x18b   : > { %1287 = vst.msk [vmem:[#allocation3 + $0x1f] sm:$0xfe] %vm4230_vm14, %v1146_v32  ;;  %vm4235_vm14 = vmmov %vm4233_vm1  ;;  %vm4239_vm1 = vcmask 294145  }
 0x18c   : > { %1288 = vst.msk [vmem:[#allocation3 + $0x27] sm:$0xff] %vm4231_vm9, %v1147_v29  ;;  %2615 = vmatmul.mubr.msk.f32.vlgmr.msra.gmra.mrb[16].mxu0 %vm4235_vm14, %v1712_v38  ;;  %vm4236_vm9 = vcmask 31744   ;;  %vm4240_vm14 = vcmask 294144  }
 0x18d   : > { %1196 = vst.msk [vmem:[#allocation3 + $0x47] sm:$0xff] %vm4232_vm12, %v1147_v29 }
 0x18e   : > { %1245 = vst.msk [vmem:[#allocation3 + $0x37] sm:$0xff] %vm629_vm7, %v1147_v29 }
 0x18f   : > { %1165 = vst.msk [vmem:[#allocation3 + $0x59] sm:$0x7f] %vm4234_vm11, %v1149_v39  ;;  %vm4237_vm11 = vcmask 261344  }
 0x190   : > { %1214 = vst.msk [vmem:[#allocation3 + $0x49] sm:$0x7f] %vm500_vm4, %v1149_v39  ;;  %vm4238_vm12 = vmmov %vm4237_vm11 }
 0x191   : > { %1261 = vst.msk [vmem:[#allocation3 + $0x39] sm:$0x7f] %vm696_vm13, %v1149_v39 }
 0x192   : > { %1164 = vst.msk [vmem:[#allocation3 + $0x51] sm:$0xff] %vm4236_vm9, %v1148_v42  ;;  %vm4241_vm9 = vcmask 97344  }
 0x193   : > { %1213 = vst.msk [vmem:[#allocation3 + $0x41] sm:$0xff] %vm4165_vm2, %v1148_v42  ;;  %v1715_v2 = vld [vmem:[#allocation3 + $0x20] sm:$0xff]  ;;  %v1716_v3 = vld [vmem:[#allocation3 + $0x28] sm:$0xff] }
 0x194   : > { %1260 = vst.msk [vmem:[#allocation3 + $0x31] sm:$0xff] %vm4164_vm10, %v1148_v42 }
 0x195   : > { %1180 = vst.msk [vmem:[#allocation3 + $0x50] sm:$0xff] %vm373_vm6, %v1148_v42  ;;  %1181 = vst.msk [vmem:[#allocation3 + $0x58] sm:$0xff] %vm373_vm6, %v1149_v39 }
 0x196   : > { %v2563_v36 = vpop.f32.mrb[10].mxu0  ;;  %1229 = vst.msk [vmem:[#allocation3 + $0x40] sm:$0xff] %vm564_vm5, %v1148_v42  ;;  %1230 = vst.msk [vmem:[#allocation3 + $0x48] sm:$0xff] %vm564_vm5, %v1149_v39 }
 0x197   : > { %v1085_v40 = vadd.f32 %v2563_v36, %v3633_v61  ;;  %v1079_v41 = vpop.f32.mrb[11].mxu0  ;;  %1274 = vst.msk [vmem:[#allocation3 + $0x30] sm:$0xff] %vm4237_vm11, %v1148_v42  ;;  %vm4242_vm11 = vcmask 293888  }
 0x198   : > { %v1080_v43 = vadd.f32 %v3633_v61, %v1079_v41  ;;  %1275 = vst.msk [vmem:[#allocation3 + $0x38] sm:$0xff] %vm4238_vm12, %v1149_v39  ;;  %2617 = vmatprep.mubr.msk.f32.mxu0 %vm4242_vm11, %v1713_v48  ;;  %vm4243_vm12 = vcmask 30720  }
 0x199   : > { %vm1119_vm3 = vcmp.gt.f32.partialorder %v1085_v40, 0.0  ;;  %v1135_v44 = vmul.f32 0.01, %v1085_v40  ;;  %1197 = vst.msk [vmem:[#allocation3 + $0x4f] sm:$0xfe] %vm1188_vm15, %v1148_v42 }
 0x19a   : > { %vm1118_vm0 = vcmp.gt.f32.partialorder %v1080_v43, 0.0  ;;  %v1134_v45 = vmul.f32 0.01, %v1080_v43  ;;  %1246 = vst.msk [vmem:[#allocation3 + $0x3f] sm:$0xfe] %vm1237_vm8, %v1148_v42 }
 0x19b   : > { %1289 = vst.msk [vmem:[#allocation3 + $0x2f] sm:$0xfe] %vm4239_vm1, %v1148_v42  ;;  %v1151_v49 = vsel %vm1119_vm3, %v1085_v40, %v1135_v44  ;;  %vm4244_vm3 = vmmov %vm4242_vm11  ;;  %vm4245_vm1 = vcmask 31744  }
 0x19c   : > { %1290 = vst.msk [vmem:[#allocation3 + $0x37] sm:$0xff] %vm4240_vm14, %v1149_v39  ;;  %v1150_v55 = vsel %vm1118_vm0, %v1080_v43, %v1134_v45  ;;  %2618 = vmatmul.mubr.msk.f32.gmra.mrb[18].mxu0 %vm4244_vm3, %v1714_v54  ;;  %vm4246_vm0 = vcmask 261344  }
 0x19d   : > { %1198 = vst.msk [vmem:[#allocation3 + $0x57] sm:$0xff] %vm4241_vm9, %v1149_v39  ;;  %vm4247_vm11 = vmmov %vm4246_vm0 }
 0x19e   : > { %1247 = vst.msk [vmem:[#allocation3 + $0x47] sm:$0xff] %vm629_vm7, %v1149_v39 }
 0x19f   : > { %1167 = vst.msk [vmem:[#allocation3 + $0x69] sm:$0x7f] %vm4243_vm12, %v1151_v49 }
 0x1a0   : > { %v2566_v46 = vpop.f32.mrb[12].mxu0  ;;  %1216 = vst.msk [vmem:[#allocation3 + $0x59] sm:$0x7f] %vm500_vm4, %v1151_v49 }
 0x1a1   : > { %v1095_v50 = vadd.f32 %v2566_v46, %v3633_v61  ;;  %v1089_v51 = vpop.f32.mrb[13].mxu0  ;;  %1263 = vst.msk [vmem:[#allocation3 + $0x49] sm:$0x7f] %vm696_vm13, %v1151_v49 }
 0x1a2   : > { %v1090_v56 = vadd.f32 %v3633_v61, %v1089_v51  ;;  %1166 = vst.msk [vmem:[#allocation3 + $0x61] sm:$0xff] %vm4245_vm1, %v1150_v55  ;;  %vm4248_vm1 = vcmask 294145  }
 0x1a3   : > { %1215 = vst.msk [vmem:[#allocation3 + $0x51] sm:$0xff] %vm4165_vm2, %v1150_v55  ;;  %vm1121_vm14 = vcmp.gt.f32.partialorder %v1095_v50, 0.0  ;;  %v1137_v58 = vmul.f32 0.01, %v1095_v50  ;;  %vm4250_vm2 = vcmask 97344   ;;  %v1717_v13 = vld [vmem:[#allocation3 + $0x30] sm:$0xff] }
 0x1a4   : > { %1262 = vst.msk [vmem:[#allocation3 + $0x41] sm:$0xff] %vm4164_vm10, %v1150_v55  ;;  %vm1120_vm12 = vcmp.gt.f32.partialorder %v1090_v56, 0.0  ;;  %v1136_v60 = vmul.f32 0.01, %v1090_v56  ;;  %vm4249_vm10 = vcmask 294144   ;;  %v1718_v14 = vld [vmem:[#allocation3 + $0x38] sm:$0xff] }
 0x1a5   : > { %1182 = vst.msk [vmem:[#allocation3 + $0x60] sm:$0xff] %vm373_vm6, %v1150_v55  ;;  %1183 = vst.msk [vmem:[#allocation3 + $0x68] sm:$0xff] %vm373_vm6, %v1151_v49  ;;  %v1153_v63 = vsel %vm1121_vm14, %v1095_v50, %v1137_v58  ;;  %vm4254_vm14 = vcmask 31744  }
 0x1a6   : > { %1231 = vst.msk [vmem:[#allocation3 + $0x50] sm:$0xff] %vm564_vm5, %v1150_v55  ;;  %1232 = vst.msk [vmem:[#allocation3 + $0x58] sm:$0xff] %vm564_vm5, %v1151_v49  ;;  %v1152_v4 = vsel %vm1120_vm12, %v1090_v56, %v1136_v60 }
 0x1a7   : > { %1276 = vst.msk [vmem:[#allocation3 + $0x40] sm:$0xff] %vm4246_vm0, %v1150_v55  ;;  %vm4251_vm0 = vcmask 30720  }
 0x1a8   : > { %1277 = vst.msk [vmem:[#allocation3 + $0x48] sm:$0xff] %vm4247_vm11, %v1151_v49  ;;  %vm4256_vm11 = vcmask 228544  }
 0x1a9   : > { %1199 = vst.msk [vmem:[#allocation3 + $0x5f] sm:$0xfe] %vm1188_vm15, %v1150_v55 }
 0x1aa   : > { %v2582_v47 = vpop.f32.mrb[0].mxu1  ;;  %1248 = vst.msk [vmem:[#allocation3 + $0x4f] sm:$0xfe] %vm1237_vm8, %v1150_v55 }
 0x1ab   : > { %v1449_v52 = vadd.f32 %v2582_v47, %v3633_v61  ;;  %v1443_v53 = vpop.f32.mrb[1].mxu1  ;;  %1291 = vst.msk [vmem:[#allocation3 + $0x3f] sm:$0xfe] %vm4248_vm1, %v1150_v55  ;;  %vm4257_vm1 = vmmov %vm4254_vm14 }
 0x1ac   : > { %v1444_v57 = vadd.f32 %v3633_v61, %v1443_v53  ;;  %1292 = vst.msk [vmem:[#allocation3 + $0x47] sm:$0xff] %vm4249_vm10, %v1151_v49  ;;  %vm4253_vm10 = vcmask 293888  }
 0x1ad   : > { %vm1523_vm9 = vcmp.gt.f32.partialorder %v1449_v52, 0.0  ;;  %v1539_v59 = vmul.f32 0.01, %v1449_v52  ;;  %1200 = vst.msk [vmem:[#allocation3 + $0x67] sm:$0xff] %vm4250_vm2, %v1151_v49  ;;  %vm4252_vm2 = vmmov %vm4251_vm0  ;;  %2620 = vmatprep.mubr.msk.f32.mxu0 %vm4253_vm10, %v1715_v2 }
 0x1ae   : > { %vm1522_vm3 = vcmp.gt.f32.partialorder %v1444_v57, 0.0  ;;  %v1538_v62 = vmul.f32 0.01, %v1444_v57  ;;  %1249 = vst.msk [vmem:[#allocation3 + $0x57] sm:$0xff] %vm629_vm7, %v1151_v49  ;;  %vm4258_vm12 = vmmov %vm4253_vm10  ;;  %vm4261_vm10 = vcmask 294145  }
 0x1af   : > { %v3763_v0 = vsel %vm1523_vm9, %v1449_v52, %v1539_v59  ;;  %1169 = vst.msk [vmem:[#allocation3 + $0x79] sm:$0x7f] %vm4251_vm0, %v1153_v63  ;;  %vm4255_vm9 = vcmask 130144   ;;  %2621 = vmatmul.mubr.msk.f32.gmra.mrb[20].mxu0 %vm4258_vm12, %v1716_v3 }
 0x1b0   : > { %1218 = vst.msk [vmem:[#allocation3 + $0x69] sm:$0x7f] %vm500_vm4, %v1153_v63  ;;  %v3772_v5 = vsel %vm1522_vm3, %v1444_v57, %v1538_v62  ;;  %vm4259_vm3 = vcmask 261344   ;;  %2623 = vmatprep.mubr.msk.f32.mxu0 %vm4258_vm12, %v1717_v13 }
 0x1b1   : > { %1265 = vst.msk [vmem:[#allocation3 + $0x59] sm:$0x7f] %vm696_vm13, %v1153_v63  ;;  %vm4260_vm0 = vmmov %vm4259_vm3 }
 0x1b2   : > { %1572 = vst.msk [vmem:[#allocation3 + $0x99] sm:$0x7f] %vm4252_vm2, %v3763_v0 }
 0x1b3   : > { %1168 = vst.msk [vmem:[#allocation3 + $0x71] sm:$0xff] %vm4254_vm14, %v1152_v4  ;;  %vm4262_vm14 = vcmask 294144   ;;  %v1719_v23 = vld [vmem:[#allocation3 + $0x40] sm:$0xff]  ;;  %v1720_v24 = vld [vmem:[#allocation3 + $0x48] sm:$0xff] }
 0x1b4   : > { %1217 = vst.msk [vmem:[#allocation3 + $0x61] sm:$0xff] %vm4255_vm9, %v1152_v4  ;;  %vm4263_vm9 = vcmask 97344  }
 0x1b5   : > { %1264 = vst.msk [vmem:[#allocation3 + $0x51] sm:$0xff] %vm4256_vm11, %v1152_v4  ;;  %vm4264_vm11 = vmmov %vm4263_vm9 }
 0x1b6   : > { %1571 = vst.msk [vmem:[#allocation3 + $0x91] sm:$0xff] %vm4257_vm1, %v3772_v5 }
 0x1b7   : > { %1184 = vst.msk [vmem:[#allocation3 + $0x70] sm:$0xff] %vm373_vm6, %v1152_v4  ;;  %1185 = vst.msk [vmem:[#allocation3 + $0x78] sm:$0xff] %vm373_vm6, %v1153_v63 }
 0x1b8   : > { %v2569_v1 = vpop.f32.mrb[14].mxu0  ;;  %1233 = vst.msk [vmem:[#allocation3 + $0x60] sm:$0xff] %vm564_vm5, %v1152_v4  ;;  %1234 = vst.msk [vmem:[#allocation3 + $0x68] sm:$0xff] %vm564_vm5, %v1153_v63 }
 0x1b9   : > { %v1105_v6 = vadd.f32 %v2569_v1, %v3633_v61  ;;  %v1099_v7 = vpop.f32.mrb[15].mxu0  ;;  %1278 = vst.msk [vmem:[#allocation3 + $0x50] sm:$0xff] %vm4259_vm3, %v1152_v4 }
 0x1ba   : > { %v1100_v8 = vadd.f32 %v3633_v61, %v1099_v7  ;;  %1279 = vst.msk [vmem:[#allocation3 + $0x58] sm:$0xff] %vm4260_vm0, %v1153_v63  ;;  %vm4265_vm0 = vcmask 30720  }
 0x1bb   : > { %1585 = vst.msk [vmem:[#allocation3 + $0x90] sm:$0xff] %vm373_vm6, %v3772_v5  ;;  %1586 = vst.msk [vmem:[#allocation3 + $0x98] sm:$0xff] %vm373_vm6, %v3763_v0  ;;  %vm1123_vm2 = vcmp.gt.f32.partialorder %v1105_v6, 0.0  ;;  %v1139_v10 = vmul.f32 0.01, %v1105_v6 }
 0x1bc   : > { %1201 = vst.msk [vmem:[#allocation3 + $0x6f] sm:$0xfe] %vm1188_vm15, %v1152_v4  ;;  %1599 = vst.msk [vmem:[#allocation3 + $0x8f] sm:$0xfe] %vm1188_vm15, %v3772_v5  ;;  %vm1122_vm1 = vcmp.gt.f32.partialorder %v1100_v8, 0.0 }
 0x1bd   : > { %v2585_v9 = vpop.f32.mrb[2].mxu1  ;;  %1250 = vst.msk [vmem:[#allocation3 + $0x5f] sm:$0xfe] %vm1237_vm8, %v1152_v4  ;;  %v1138_v15 = vmul.f32 0.01, %v1100_v8  ;;  %v1155_v17 = vsel %vm1123_vm2, %v1105_v6, %v1139_v10  ;;  %vm4270_vm2 = vcmask 261344  }
 0x1be   : > { %v1459_v11 = vadd.f32 %v2585_v9, %v3633_v61  ;;  %v1453_v12 = vpop.f32.mrb[3].mxu1  ;;  %1293 = vst.msk [vmem:[#allocation3 + $0x4f] sm:$0xfe] %vm4261_vm10, %v1152_v4 }
 0x1bf   : > { %1294 = vst.msk [vmem:[#allocation3 + $0x57] sm:$0xff] %vm4262_vm14, %v1153_v63  ;;  %v1454_v16 = vadd.f32 %v3633_v61, %v1453_v12  ;;  %v1154_v19 = vsel %vm1122_vm1, %v1100_v8, %v1138_v15  ;;  %vm4266_vm14 = vmmov %vm4258_vm12  ;;  %vm4269_vm12 = vcmask 228544  }
 0x1c0   : > { %1202 = vst.msk [vmem:[#allocation3 + $0x77] sm:$0xff] %vm4263_vm9, %v1153_v63  ;;  %vm1525_vm3 = vcmp.gt.f32.partialorder %v1459_v11, 0.0  ;;  %v1541_v18 = vmul.f32 0.01, %v1459_v11  ;;  %2624 = vmatmul.mubr.msk.f32.gmra.mrb[22].mxu0 %vm4266_vm14, %v1718_v14  ;;  %vm4267_vm9 = vcmask 31744   ;;  %vm4271_vm1 = vmmov %vm4270_vm2 }
 0x1c1   : > { %1251 = vst.msk [vmem:[#allocation3 + $0x67] sm:$0xff] %vm629_vm7, %v1153_v63  ;;  %vm1524_vm10 = vcmp.gt.f32.partialorder %v1454_v16, 0.0  ;;  %v1540_v20 = vmul.f32 0.01, %v1454_v16 }
 0x1c2   : > { %1600 = vst.msk [vmem:[#allocation3 + $0x97] sm:$0xff] %vm4264_vm11, %v3763_v0  ;;  %vm4268_vm11 = vcmask 130144   ;;  %v3814_v21 = vsel %vm1525_vm3, %v1459_v11, %v1541_v18  ;;  %vm4272_vm3 = vmmov %vm4266_vm14  ;;  %vm4273_vm14 = vcmask 97344  }
 0x1c3   : > { %1171 = vst.msk [vmem:[#allocation3 + $0x89] sm:$0x7f] %vm4265_vm0, %v1155_v17  ;;  %1574 = vst.msk [vmem:[#allocation3 + $0xa9] sm:$0x7f] %vm4265_vm0, %v3814_v21  ;;  %v1556_v25 = vsel %vm1524_vm10, %v1454_v16, %v1540_v20  ;;  %2626 = vmatprep.mubr.msk.f32.mxu0 %vm4272_vm3, %v1719_v23  ;;  %vm4277_vm10 = vcmask 130144  }
 0x1c4   : > { %1220 = vst.msk [vmem:[#allocation3 + $0x79] sm:$0x7f] %vm500_vm4, %v1155_v17  ;;  %1617 = vst.msk [vmem:[#allocation3 + $0x99] sm:$0x7f] %vm500_vm4, %v3814_v21  ;;  %2627 = vmatmul.mubr.msk.f32.gmra.mrb[24].mxu0 %vm4272_vm3, %v1720_v24 }
 0x1c5   : > { %1267 = vst.msk [vmem:[#allocation3 + $0x69] sm:$0x7f] %vm696_vm13, %v1155_v17 }
 0x1c6   : > { %1170 = vst.msk [vmem:[#allocation3 + $0x81] sm:$0xff] %vm4267_vm9, %v1154_v19  ;;  %vm4274_vm9 = vcmask 294145   ;;  %v1721_v32 = vld [vmem:[#allocation3 + $0x50] sm:$0xff]  ;;  %v1722_v33 = vld [vmem:[#allocation3 + $0x58] sm:$0xff] }
 0x1c7   : > { %1219 = vst.msk [vmem:[#allocation3 + $0x71] sm:$0xff] %vm4268_vm11, %v1154_v19  ;;  %vm4275_vm11 = vcmask 294144  }
 0x1c8   : > { %1266 = vst.msk [vmem:[#allocation3 + $0x61] sm:$0xff] %vm4269_vm12, %v1154_v19  ;;  %vm4276_vm12 = vcmask 31744  }
 0x1c9   : > { %1186 = vst.msk [vmem:[#allocation3 + $0x80] sm:$0xff] %vm373_vm6, %v1154_v19  ;;  %1187 = vst.msk [vmem:[#allocation3 + $0x88] sm:$0xff] %vm373_vm6, %v1155_v17 }
 0x1ca   : > { %1235 = vst.msk [vmem:[#allocation3 + $0x70] sm:$0xff] %vm564_vm5, %v1154_v19  ;;  %1236 = vst.msk [vmem:[#allocation3 + $0x78] sm:$0xff] %vm564_vm5, %v1155_v17 }
 0x1cb   : > { %1280 = vst.msk [vmem:[#allocation3 + $0x60] sm:$0xff] %vm4270_vm2, %v1154_v19  ;;  %vm4278_vm2 = vmmov %vm4277_vm10 }
 0x1cc   : > { %1281 = vst.msk [vmem:[#allocation3 + $0x68] sm:$0xff] %vm4271_vm1, %v1155_v17  ;;  %vm4279_vm1 = vcmask 228544  }
 0x1cd   : > { %1203 = vst.msk [vmem:[#allocation3 + $0x7f] sm:$0xfe] %vm1188_vm15, %v1154_v19 }
 0x1ce   : > { %1204 = vst.msk [vmem:[#allocation3 + $0x87] sm:$0xff] %vm4273_vm14, %v1155_v17  ;;  %vm4280_vm14 = vcmask 261344  }
 0x1cf   : > { %1252 = vst.msk [vmem:[#allocation3 + $0x6f] sm:$0xfe] %vm1237_vm8, %v1154_v19 }
 0x1d0   : > { %1253 = vst.msk [vmem:[#allocation3 + $0x77] sm:$0xff] %vm629_vm7, %v1155_v17 }
 0x1d1   : > { %1295 = vst.msk [vmem:[#allocation3 + $0x5f] sm:$0xfe] %vm4274_vm9, %v1154_v19  ;;  %vm4281_vm9 = vmmov %vm4280_vm14 }
 0x1d2   : > { %1296 = vst.msk [vmem:[#allocation3 + $0x67] sm:$0xff] %vm4275_vm11, %v1155_v17  ;;  %vm4282_vm11 = vcmask 97344  }
 0x1d3   : > { %1573 = vst.msk [vmem:[#allocation3 + $0xa1] sm:$0xff] %vm4276_vm12, %v1556_v25 }
 0x1d4   : > { %v2588_v22 = vpop.f32.mrb[4].mxu1  ;;  %1616 = vst.msk [vmem:[#allocation3 + $0x91] sm:$0xff] %vm4277_vm10, %v1556_v25  ;;  %vm4283_vm10 = vcmask 294145  }
 0x1d5   : > { %v1469_v26 = vadd.f32 %v2588_v22, %v3633_v61  ;;  %v1463_v27 = vpop.f32.mrb[5].mxu1  ;;  %1614 = vst.msk [vmem:[#allocation3 + $0x81] sm:$0xff] %vm4278_vm2, %v3772_v5  ;;  %vm4284_vm2 = vcmask 294144  }
 0x1d6   : > { %v1464_v28 = vadd.f32 %v3633_v61, %v1463_v27  ;;  %1663 = vst.msk [vmem:[#allocation3 + $0x71] sm:$0xff] %vm4279_vm1, %v3772_v5  ;;  %vm4285_vm1 = vmmov %vm4272_vm3  ;;  %vm4286_vm3 = vcmask 228544  }
 0x1d7   : > { %1664 = vst.msk [vmem:[#allocation3 + $0x79] sm:$0x7f] %vm696_vm13, %v3763_v0  ;;  %vm1527_vm0 = vcmp.gt.f32.partialorder %v1469_v26, 0.0  ;;  %v1543_v29 = vmul.f32 0.01, %v1469_v26  ;;  %2629 = vmatprep.mubr.msk.f32.mxu0 %vm4285_vm1, %v1721_v32 }
 0x1d8   : > { %1615 = vst.msk [vmem:[#allocation3 + $0x89] sm:$0x7f] %vm500_vm4, %v3763_v0  ;;  %vm1526_vm12 = vcmp.gt.f32.partialorder %v1464_v28, 0.0  ;;  %v1542_v30 = vmul.f32 0.01, %v1464_v28 }
 0x1d9   : > { %1587 = vst.msk [vmem:[#allocation3 + $0xa0] sm:$0xff] %vm373_vm6, %v1556_v25  ;;  %1588 = vst.msk [vmem:[#allocation3 + $0xa8] sm:$0xff] %vm373_vm6, %v3814_v21  ;;  %v1559_v34 = vsel %vm1527_vm0, %v1469_v26, %v1543_v29  ;;  %v1723_v45 = vld [vmem:[#allocation3 + $0x60] sm:$0xff]  ;;  %v1724_v46 = vld [vmem:[#allocation3 + $0x68] sm:$0xff] }
 0x1da   : > { %1632 = vst.msk [vmem:[#allocation3 + $0x90] sm:$0xff] %vm564_vm5, %v1556_v25  ;;  %1633 = vst.msk [vmem:[#allocation3 + $0x98] sm:$0xff] %vm564_vm5, %v3814_v21  ;;  %v1558_v37 = vsel %vm1526_vm12, %v1464_v28, %v1542_v30  ;;  %vm4295_vm12 = vcmask 294144  }
 0x1db   : > { %1630 = vst.msk [vmem:[#allocation3 + $0x80] sm:$0xff] %vm564_vm5, %v3772_v5  ;;  %1631 = vst.msk [vmem:[#allocation3 + $0x88] sm:$0xff] %vm564_vm5, %v3763_v0 }
 0x1dc   : > { %1679 = vst.msk [vmem:[#allocation3 + $0x70] sm:$0xff] %vm4280_vm14, %v3772_v5  ;;  %vm4287_vm14 = vcmask 30720   ;;  %vm4288_vm0 = vmmov %vm4281_vm9 }
 0x1dd   : > { %1680 = vst.msk [vmem:[#allocation3 + $0x78] sm:$0xff] %vm4281_vm9, %v3763_v0  ;;  %vm4289_vm9 = vmmov %vm4288_vm0 }
 0x1de   : > { %1601 = vst.msk [vmem:[#allocation3 + $0x9f] sm:$0xfe] %vm1188_vm15, %v1556_v25  ;;  %v2591_v31 = vpop.f32.mrb[6].mxu1 }
 0x1df   : > { %1648 = vst.msk [vmem:[#allocation3 + $0x8f] sm:$0xfe] %vm1237_vm8, %v1556_v25  ;;  %1646 = vst.msk [vmem:[#allocation3 + $0x7f] sm:$0xfe] %vm1237_vm8, %v3772_v5  ;;  %v1479_v35 = vadd.f32 %v2591_v31, %v3633_v61  ;;  %v1473_v36 = vpop.f32.mrb[7].mxu1 }
 0x1e0   : > { %1602 = vst.msk [vmem:[#allocation3 + $0xa7] sm:$0xff] %vm4282_vm11, %v3814_v21  ;;  %v1474_v38 = vadd.f32 %v3633_v61, %v1473_v36  ;;  %vm4290_vm11 = vcmask 31744   ;;  %v4034_v31 = vld [vmem:[%s4154_s4] ss:$0 sm:$0xff] }
 0x1e1   : > { %1649 = vst.msk [vmem:[#allocation3 + $0x97] sm:$0xff] %vm629_vm7, %v3814_v21  ;;  %1647 = vst.msk [vmem:[#allocation3 + $0x87] sm:$0xff] %vm629_vm7, %v3763_v0  ;;  %vm1529_vm1 = vcmp.gt.f32.partialorder %v1479_v35, 0.0  ;;  %v1545_v39 = vmul.f32 0.01, %v1479_v35 }
 0x1e2   : > { %1695 = vst.msk [vmem:[#allocation3 + $0x6f] sm:$0xfe] %vm4283_vm10, %v3772_v5  ;;  %vm4291_vm10 = vcmask 130144   ;;  %v1544_v40 = vmul.f32 0.01, %v1474_v38 }
 0x1e3   : > { %1696 = vst.msk [vmem:[#allocation3 + $0x77] sm:$0xff] %vm4284_vm2, %v3763_v0  ;;  %vm4292_vm2 = vmmov %vm4286_vm3  ;;  %v1561_v42 = vsel %vm1529_vm1, %v1479_v35, %v1545_v39  ;;  %vm4303_vm1 = vcmask 130144  }
 0x1e4   : > { %1666 = vst.msk [vmem:[#allocation3 + $0x89] sm:$0x7f] %vm696_vm13, %v3814_v21  ;;  %1668 = vst.msk [vmem:[#allocation3 + $0x99] sm:$0x7f] %vm696_vm13, %v1559_v34 }
 0x1e5   : > { %1665 = vst.msk [vmem:[#allocation3 + $0x81] sm:$0xff] %vm4286_vm3, %v1556_v25  ;;  %vm4293_vm3 = vcmask 293888  }
 0x1e6   : > { %1576 = vst.msk [vmem:[#allocation3 + $0xb9] sm:$0x7f] %vm4287_vm14, %v1559_v34  ;;  %2630 = vmatmul.mubr.msk.f32.gmra.mrb[26].mxu0 %vm4293_vm3, %v1722_v33  ;;  %vm4294_vm14 = vcmask 294145   ;;  %vm4299_vm3 = vcmask 97344  }
 0x1e7   : > { %1619 = vst.msk [vmem:[#allocation3 + $0xa9] sm:$0x7f] %vm500_vm4, %v1559_v34 }
 0x1e8   : > { %1681 = vst.msk [vmem:[#allocation3 + $0x80] sm:$0xff] %vm4288_vm0, %v1556_v25  ;;  %v2594_v41 = vpop.f32.mrb[8].mxu1 }
 0x1e9   : > { %1682 = vst.msk [vmem:[#allocation3 + $0x88] sm:$0xff] %vm4289_vm9, %v3814_v21  ;;  %vm4296_vm9 = vmmov %vm4288_vm0  ;;  %v1489_v43 = vadd.f32 %v2594_v41, %v3633_v61  ;;  %v1483_v44 = vpop.f32.mrb[9].mxu1 }
 0x1ea   : > { %1575 = vst.msk [vmem:[#allocation3 + $0xb1] sm:$0xff] %vm4290_vm11, %v1558_v37  ;;  %vm1528_vm11 = vcmp.gt.f32.partialorder %v1474_v38, 0.0  ;;  %v1484_v48 = vadd.f32 %v3633_v61, %v1483_v44  ;;  %v1725_v52 = vld [vmem:[#allocation3 + $0x70] sm:$0xff]  ;;  %v1726_v58 = vld [vmem:[#allocation3 + $0x78] sm:$0xff] }
 0x1eb   : > { %1618 = vst.msk [vmem:[#allocation3 + $0xa1] sm:$0xff] %vm4291_vm10, %v1558_v37  ;;  %vm4297_vm10 = vmmov %vm4294_vm14  ;;  %v1560_v47 = vsel %vm1528_vm11, %v1474_v38, %v1544_v40  ;;  %v1547_v49 = vmul.f32 0.01, %v1489_v43 }
 0x1ec   : > { %1667 = vst.msk [vmem:[#allocation3 + $0x91] sm:$0xff] %vm4292_vm2, %v1558_v37  ;;  %vm4298_vm2 = vmmov %vm4295_vm12  ;;  %v1546_v50 = vmul.f32 0.01, %v1484_v48 }
 0x1ed   : > { %1697 = vst.msk [vmem:[#allocation3 + $0x7f] sm:$0xfe] %vm4294_vm14, %v1556_v25  ;;  %vm4300_vm14 = vcmask 30720  }
 0x1ee   : > { %1698 = vst.msk [vmem:[#allocation3 + $0x87] sm:$0xff] %vm4295_vm12, %v3814_v21  ;;  %vm4301_vm12 = vcmask 293888  }
 0x1ef   : > { %1589 = vst.msk [vmem:[#allocation3 + $0xb0] sm:$0xff] %vm373_vm6, %v1558_v37  ;;  %1590 = vst.msk [vmem:[#allocation3 + $0xb8] sm:$0xff] %vm373_vm6, %v1559_v34  ;;  %2632 = vmatprep.mubr.msk.f32.mxu0 %vm4301_vm12, %v1723_v45  ;;  %v2597_v51 = vpop.f32.mrb[10].mxu1 }
 0x1f0   : > { %1634 = vst.msk [vmem:[#allocation3 + $0xa0] sm:$0xff] %vm564_vm5, %v1558_v37  ;;  %1635 = vst.msk [vmem:[#allocation3 + $0xa8] sm:$0xff] %vm564_vm5, %v1559_v34  ;;  %v1499_v54 = vadd.f32 %v2597_v51, %v3633_v61  ;;  %v1493_v55 = vpop.f32.mrb[11].mxu1 }
 0x1f1   : > { %1683 = vst.msk [vmem:[#allocation3 + $0x90] sm:$0xff] %vm4288_vm0, %v1558_v37  ;;  %vm4302_vm0 = vcmask 31744   ;;  %v1494_v57 = vadd.f32 %v3633_v61, %v1493_v55 }
 0x1f2   : > { %1684 = vst.msk [vmem:[#allocation3 + $0x98] sm:$0xff] %vm4296_vm9, %v1559_v34  ;;  %vm4304_vm9 = vcmask 228544   ;;  %v1549_v59 = vmul.f32 0.01, %v1499_v54 }
 0x1f3   : > { %1603 = vst.msk [vmem:[#allocation3 + $0xaf] sm:$0xfe] %vm1188_vm15, %v1558_v37  ;;  %v1548_v63 = vmul.f32 0.01, %v1494_v57 }
 0x1f4   : > { %1650 = vst.msk [vmem:[#allocation3 + $0x9f] sm:$0xfe] %vm1237_vm8, %v1558_v37 }
 0x1f5   : > { %1699 = vst.msk [vmem:[#allocation3 + $0x8f] sm:$0xfe] %vm4297_vm10, %v1558_v37  ;;  %vm1531_vm10 = vcmp.gt.f32.partialorder %v1489_v43, 0.0  ;;  %v1952_v60 = vld [vmem:[#allocation3 + $0x80] sm:$0xff]  ;;  %v1953_v62 = vld [vmem:[#allocation3 + $0x88] sm:$0xff] }
 0x1f6   : > { %1700 = vst.msk [vmem:[#allocation3 + $0x97] sm:$0xff] %vm4298_vm2, %v1559_v34  ;;  %vm4305_vm2 = vmmov %vm4301_vm12  ;;  %vm4308_vm12 = vcmask 294145   ;;  %v1563_v53 = vsel %vm1531_vm10, %v1489_v43, %v1547_v49  ;;  %vm4315_vm10 = vcmask 228544  }
 0x1f7   : > { %1604 = vst.msk [vmem:[#allocation3 + $0xb7] sm:$0xff] %vm4299_vm3, %v1559_v34  ;;  %2633 = vmatmul.mubr.msk.f32.gmra.mrb[28].mxu0 %vm4305_vm2, %v1724_v46  ;;  %vm4306_vm3 = vcmask 261344  }
 0x1f8   : > { %1651 = vst.msk [vmem:[#allocation3 + $0xa7] sm:$0xff] %vm629_vm7, %v1559_v34  ;;  %vm4307_vm11 = vmmov %vm4306_vm3  ;;  %v2600_v0 = vpop.f32.mrb[12].mxu1 }
 0x1f9   : > { %1578 = vst.msk [vmem:[#allocation3 + $0xc9] sm:$0x7f] %vm4300_vm14, %v1561_v42  ;;  %vm1530_vm14 = vcmp.gt.f32.partialorder %v1484_v48, 0.0  ;;  %v1509_v2 = vadd.f32 %v2600_v0, %v3633_v61  ;;  %v1503_v3 = vpop.f32.mrb[13].mxu1 }
 0x1fa   : > { %1621 = vst.msk [vmem:[#allocation3 + $0xb9] sm:$0x7f] %vm500_vm4, %v1561_v42  ;;  %v1562_v56 = vsel %vm1530_vm14, %v1484_v48, %v1546_v50  ;;  %vm4317_vm14 = vcmask 261344   ;;  %v1504_v6 = vadd.f32 %v3633_v61, %v1503_v3 }
 0x1fb   : > { %1670 = vst.msk [vmem:[#allocation3 + $0xa9] sm:$0x7f] %vm696_vm13, %v1561_v42  ;;  %v1551_v7 = vmul.f32 0.01, %v1509_v2 }
 0x1fc   : > { %1577 = vst.msk [vmem:[#allocation3 + $0xc1] sm:$0xff] %vm4302_vm0, %v1560_v47  ;;  %vm4309_vm0 = vcmask 294144   ;;  %v1550_v8 = vmul.f32 0.01, %v1504_v6  ;;  %v2603_v9 = vpop.f32.mrb[14].mxu1 }
 0x1fd   : > { %1620 = vst.msk [vmem:[#allocation3 + $0xb1] sm:$0xff] %vm4303_vm1, %v1560_v47  ;;  %vm4310_vm1 = vcmask 97344   ;;  %v1954_v4 = vld [vmem:[#allocation3 + $0x90] sm:$0xff]  ;;  %v1955_v10 = vld [vmem:[#allocation3 + $0x98] sm:$0xff]  ;;  %v1519_v12 = vadd.f32 %v2603_v9, %v3633_v61  ;;  %v1513_v13 = vpop.f32.mrb[15].mxu1 }
 0x1fe   : > { %1669 = vst.msk [vmem:[#allocation3 + $0xa1] sm:$0xff] %vm4304_vm9, %v1560_v47  ;;  %vm4311_vm9 = vmmov %vm4305_vm2  ;;  %vm4312_vm2 = vcmask 30720   ;;  %v1514_v16 = vadd.f32 %v3633_v61, %v1513_v13 }
 0x1ff   : > { %1591 = vst.msk [vmem:[#allocation3 + $0xc0] sm:$0xff] %vm373_vm6, %v1560_v47  ;;  %1592 = vst.msk [vmem:[#allocation3 + $0xc8] sm:$0xff] %vm373_vm6, %v1561_v42  ;;  %2635 = vmatprep.mubr.msk.f32.mxu0 %vm4311_vm9, %v1725_v52  ;;  %v1553_v17 = vmul.f32 0.01, %v1519_v12 }
 0x200   : > { %1636 = vst.msk [vmem:[#allocation3 + $0xb0] sm:$0xff] %vm564_vm5, %v1560_v47  ;;  %1637 = vst.msk [vmem:[#allocation3 + $0xb8] sm:$0xff] %vm564_vm5, %v1561_v42  ;;  %v1552_v61 = vmul.f32 0.01, %v1514_v16 }
 0x201   : > { %1685 = vst.msk [vmem:[#allocation3 + $0xa0] sm:$0xff] %vm4306_vm3, %v1560_v47  ;;  %vm4313_vm3 = vcmask 31744  }
 0x202   : > { %1686 = vst.msk [vmem:[#allocation3 + $0xa8] sm:$0xff] %vm4307_vm11, %v1561_v42  ;;  %vm4314_vm11 = vcmask 130144  }
 0x203   : > { %1605 = vst.msk [vmem:[#allocation3 + $0xbf] sm:$0xfe] %vm1188_vm15, %v1560_v47 }
 0x204   : > { %1652 = vst.msk [vmem:[#allocation3 + $0xaf] sm:$0xfe] %vm1237_vm8, %v1560_v47 }
 0x205   : > { %1701 = vst.msk [vmem:[#allocation3 + $0x9f] sm:$0xfe] %vm4308_vm12, %v1560_v47  ;;  %vm1533_vm12 = vcmp.gt.f32.partialorder %v1499_v54, 0.0 }
 0x206   : > { %1702 = vst.msk [vmem:[#allocation3 + $0xa7] sm:$0xff] %vm4309_vm0, %v1561_v42  ;;  %vm4316_vm0 = vmmov %vm4311_vm9  ;;  %vm1532_vm9 = vcmp.gt.f32.partialorder %v1494_v57, 0.0  ;;  %v1565_v1 = vsel %vm1533_vm12, %v1499_v54, %v1549_v59  ;;  %vm4326_vm12 = vcmask 130144  }
 0x207   : > { %1606 = vst.msk [vmem:[#allocation3 + $0xc7] sm:$0xff] %vm4310_vm1, %v1561_v42  ;;  %2636 = vmatmul.mubr.msk.f32.gmra.mrb[30].mxu0 %vm4316_vm0, %v1726_v58  ;;  %vm4318_vm1 = vmmov %vm4317_vm14  ;;  %v1564_v5 = vsel %vm1532_vm9, %v1494_v57, %v1548_v63  ;;  %vm1534_vm9 = vcmp.gt.f32.partialorder %v1504_v6, 0.0 }
 0x208   : > { %1653 = vst.msk [vmem:[#allocation3 + $0xb7] sm:$0xff] %vm629_vm7, %v1561_v42  ;;  %v1566_v15 = vsel %vm1534_vm9, %v1504_v6, %v1550_v8  ;;  %vm1536_vm9 = vcmp.gt.f32.partialorder %v1514_v16, 0.0 }
 0x209   : > { %1580 = vst.msk [vmem:[#allocation3 + $0xd9] sm:$0x7f] %vm4312_vm2, %v1563_v53  ;;  %vm4319_vm2 = vmmov %vm4316_vm0  ;;  %v1568_v21 = vsel %vm1536_vm9, %v1514_v16, %v1552_v61 }
 0x20a   : > { %1623 = vst.msk [vmem:[#allocation3 + $0xc9] sm:$0x7f] %vm500_vm4, %v1563_v53  ;;  %2648 = vmatprep.mubr.msk.f32.mxu1 %vm4319_vm2, %v1952_v60  ;;  %vm4325_vm2 = vcmask 31744  }
 0x20b   : > { %1672 = vst.msk [vmem:[#allocation3 + $0xb9] sm:$0x7f] %vm696_vm13, %v1563_v53  ;;  %2649 = vmatmul.mubr.msk.f32.vlgmr.msra.gmra.mrb[16].mxu1 %vm4316_vm0, %v1953_v62 }
 0x20c   : > { %1579 = vst.msk [vmem:[#allocation3 + $0xd1] sm:$0xff] %vm4313_vm3, %v1562_v56  ;;  %vm4320_vm3 = vcmask 294145  }
 0x20d   : > { %1622 = vst.msk [vmem:[#allocation3 + $0xc1] sm:$0xff] %vm4314_vm11, %v1562_v56  ;;  %vm4321_vm11 = vcmask 294144   ;;  %v1956_v14 = vld [vmem:[#allocation3 + $0xa0] sm:$0xff]  ;;  %v1957_v18 = vld [vmem:[#allocation3 + $0xa8] sm:$0xff] }
 0x20e   : > { %1671 = vst.msk [vmem:[#allocation3 + $0xb1] sm:$0xff] %vm4315_vm10, %v1562_v56  ;;  %vm4322_vm10 = vcmask 97344  }
 0x20f   : > { %1593 = vst.msk [vmem:[#allocation3 + $0xd0] sm:$0xff] %vm373_vm6, %v1562_v56  ;;  %1594 = vst.msk [vmem:[#allocation3 + $0xd8] sm:$0xff] %vm373_vm6, %v1563_v53 }
 0x210   : > { %1638 = vst.msk [vmem:[#allocation3 + $0xc0] sm:$0xff] %vm564_vm5, %v1562_v56  ;;  %1639 = vst.msk [vmem:[#allocation3 + $0xc8] sm:$0xff] %vm564_vm5, %v1563_v53 }
 0x211   : > { %1687 = vst.msk [vmem:[#allocation3 + $0xb0] sm:$0xff] %vm4317_vm14, %v1562_v56  ;;  %vm4323_vm14 = vcmask 30720  }
 0x212   : > { %1688 = vst.msk [vmem:[#allocation3 + $0xb8] sm:$0xff] %vm4318_vm1, %v1563_v53  ;;  %vm4324_vm1 = vmmov %vm4316_vm0 }
 0x213   : > { %1607 = vst.msk [vmem:[#allocation3 + $0xcf] sm:$0xfe] %vm1188_vm15, %v1562_v56  ;;  %2651 = vmatprep.mubr.msk.f32.mxu1 %vm4324_vm1, %v1954_v4  ;;  %vm4331_vm1 = vcmask 294144  }
 0x214   : > { %1654 = vst.msk [vmem:[#allocation3 + $0xbf] sm:$0xfe] %vm1237_vm8, %v1562_v56 }
 0x215   : > { %1703 = vst.msk [vmem:[#allocation3 + $0xaf] sm:$0xfe] %vm4320_vm3, %v1562_v56  ;;  %vm4327_vm3 = vcmask 228544  }
 0x216   : > { %1704 = vst.msk [vmem:[#allocation3 + $0xb7] sm:$0xff] %vm4321_vm11, %v1563_v53  ;;  %vm1535_vm11 = vcmp.gt.f32.partialorder %v1509_v2, 0.0 }
 0x217   : > { %1608 = vst.msk [vmem:[#allocation3 + $0xd7] sm:$0xff] %vm4322_vm10, %v1563_v53  ;;  %vm4328_vm10 = vcmask 261344   ;;  %v1567_v11 = vsel %vm1535_vm11, %v1509_v2, %v1551_v7  ;;  %vm4337_vm11 = vcmask 130144  }
 0x218   : > { %1655 = vst.msk [vmem:[#allocation3 + $0xc7] sm:$0xff] %vm629_vm7, %v1563_v53  ;;  %vm4329_vm0 = vmmov %vm4328_vm10 }
 0x219   : > { %1582 = vst.msk [vmem:[#allocation3 + $0xe9] sm:$0x7f] %vm4323_vm14, %v1565_v1  ;;  %vm4330_vm14 = vcmask 294145  }
 0x21a   : > { %1625 = vst.msk [vmem:[#allocation3 + $0xd9] sm:$0x7f] %vm500_vm4, %v1565_v1 }
 0x21b   : > { %1674 = vst.msk [vmem:[#allocation3 + $0xc9] sm:$0x7f] %vm696_vm13, %v1565_v1 }
 0x21c   : > { %1581 = vst.msk [vmem:[#allocation3 + $0xe1] sm:$0xff] %vm4325_vm2, %v1564_v5  ;;  %vm4332_vm2 = vcmask 97344  }
 0x21d   : > { %1624 = vst.msk [vmem:[#allocation3 + $0xd1] sm:$0xff] %vm4326_vm12, %v1564_v5  ;;  %vm4333_vm12 = vcmask 293888   ;;  %v1958_v20 = vld [vmem:[#allocation3 + $0xb0] sm:$0xff]  ;;  %v1959_v22 = vld [vmem:[#allocation3 + $0xb8] sm:$0xff] }
 0x21e   : > { %1673 = vst.msk [vmem:[#allocation3 + $0xc1] sm:$0xff] %vm4327_vm3, %v1564_v5  ;;  %2652 = vmatmul.mubr.msk.f32.gmra.mrb[18].mxu1 %vm4333_vm12, %v1955_v10  ;;  %vm4334_vm3 = vcmask 30720  }
 0x21f   : > { %1595 = vst.msk [vmem:[#allocation3 + $0xe0] sm:$0xff] %vm373_vm6, %v1564_v5  ;;  %1596 = vst.msk [vmem:[#allocation3 + $0xe8] sm:$0xff] %vm373_vm6, %v1565_v1 }
 0x220   : > { %1640 = vst.msk [vmem:[#allocation3 + $0xd0] sm:$0xff] %vm564_vm5, %v1564_v5  ;;  %1641 = vst.msk [vmem:[#allocation3 + $0xd8] sm:$0xff] %vm564_vm5, %v1565_v1 }
 0x221   : > { %1689 = vst.msk [vmem:[#allocation3 + $0xc0] sm:$0xff] %vm4328_vm10, %v1564_v5  ;;  %vm4335_vm10 = vmmov %vm4333_vm12 }
 0x222   : > { %1690 = vst.msk [vmem:[#allocation3 + $0xc8] sm:$0xff] %vm4329_vm0, %v1565_v1  ;;  %2654 = vmatprep.mubr.msk.f32.mxu1 %vm4335_vm10, %v1956_v14  ;;  %vm4336_vm0 = vcmask 31744   ;;  %vm4342_vm10 = vcmask 294144  }
 0x223   : > { %1609 = vst.msk [vmem:[#allocation3 + $0xdf] sm:$0xfe] %vm1188_vm15, %v1564_v5 }
 0x224   : > { %1656 = vst.msk [vmem:[#allocation3 + $0xcf] sm:$0xfe] %vm1237_vm8, %v1564_v5 }
 0x225   : > { %1705 = vst.msk [vmem:[#allocation3 + $0xbf] sm:$0xfe] %vm4330_vm14, %v1564_v5  ;;  %vm4338_vm14 = vcmask 228544  }
 0x226   : > { %1706 = vst.msk [vmem:[#allocation3 + $0xc7] sm:$0xff] %vm4331_vm1, %v1565_v1  ;;  %vm1537_vm1 = vcmp.gt.f32.partialorder %v1519_v12, 0.0 }
 0x227   : > { %1610 = vst.msk [vmem:[#allocation3 + $0xe7] sm:$0xff] %vm4332_vm2, %v1565_v1  ;;  %vm4339_vm2 = vcmask 261344   ;;  %v1569_v19 = vsel %vm1537_vm1, %v1519_v12, %v1553_v17 }
 0x228   : > { %1657 = vst.msk [vmem:[#allocation3 + $0xd7] sm:$0xff] %vm629_vm7, %v1565_v1  ;;  %vm4340_vm12 = vmmov %vm4339_vm2 }
 0x229   : > { %1584 = vst.msk [vmem:[#allocation3 + $0xf9] sm:$0x7f] %vm4334_vm3, %v1567_v11  ;;  %vm4341_vm3 = vcmask 294145   ;;  %vm4348_vm1 = vmmov %vm4339_vm2 }
 0x22a   : > { %1627 = vst.msk [vmem:[#allocation3 + $0xe9] sm:$0x7f] %vm500_vm4, %v1567_v11 }
 0x22b   : > { %1676 = vst.msk [vmem:[#allocation3 + $0xd9] sm:$0x7f] %vm696_vm13, %v1567_v11 }
 0x22c   : > { %1583 = vst.msk [vmem:[#allocation3 + $0xf1] sm:$0xff] %vm4336_vm0, %v1566_v15  ;;  %vm4343_vm0 = vcmask 97344  }
 0x22d   : > { %1626 = vst.msk [vmem:[#allocation3 + $0xe1] sm:$0xff] %vm4337_vm11, %v1566_v15  ;;  %v1960_v23 = vld [vmem:[#allocation3 + $0xc0] sm:$0xff]  ;;  %v1961_v24 = vld [vmem:[#allocation3 + $0xc8] sm:$0xff] }
 0x22e   : > { %1675 = vst.msk [vmem:[#allocation3 + $0xd1] sm:$0xff] %vm4338_vm14, %v1566_v15  ;;  %vm4346_vm14 = vcmask 130144  }
 0x22f   : > { %1597 = vst.msk [vmem:[#allocation3 + $0xf0] sm:$0xff] %vm373_vm6, %v1566_v15  ;;  %1598 = vst.msk [vmem:[#allocation3 + $0xf8] sm:$0xff] %vm373_vm6, %v1567_v11  ;;  %vm4344_vm6 = vcmask 293888  }
 0x230   : > { %1642 = vst.msk [vmem:[#allocation3 + $0xe0] sm:$0xff] %vm564_vm5, %v1566_v15  ;;  %1643 = vst.msk [vmem:[#allocation3 + $0xe8] sm:$0xff] %vm564_vm5, %v1567_v11  ;;  %2655 = vmatmul.mubr.msk.f32.gmra.mrb[20].mxu1 %vm4344_vm6, %v1957_v18 }
 0x231   : > { %1691 = vst.msk [vmem:[#allocation3 + $0xd0] sm:$0xff] %vm4339_vm2, %v1566_v15  ;;  %vm4345_vm11 = vmmov %vm4344_vm6 }
 0x232   : > { %1692 = vst.msk [vmem:[#allocation3 + $0xd8] sm:$0xff] %vm4340_vm12, %v1567_v11  ;;  %2657 = vmatprep.mubr.msk.f32.mxu1 %vm4345_vm11, %v1958_v20  ;;  %vm4351_vm12 = vmmov %vm4344_vm6  ;;  %vm1935_vm11 = vcmask 64512  }
 0x233   : > { %1707 = vst.msk [vmem:[#allocation3 + $0xcf] sm:$0xfe] %vm4341_vm3, %v1566_v15  ;;  %vm4352_vm9 = vmmov %vm4344_vm6 }
 0x234   : > { %1708 = vst.msk [vmem:[#allocation3 + $0xd7] sm:$0xff] %vm4342_vm10, %v1567_v11  ;;  %2658 = vmatmul.mubr.msk.f32.gmra.mrb[22].mxu1 %vm4351_vm12, %v1959_v22 }
 0x235   : > { %1611 = vst.msk [vmem:[#allocation3 + $0xef] sm:$0xfe] %vm1188_vm15, %v1566_v15  ;;  %vm4347_vm15 = vcmask 228544   ;;  %2660 = vmatprep.mubr.msk.f32.mxu1 %vm4352_vm9, %v1960_v23 }
 0x236   : > { %1658 = vst.msk [vmem:[#allocation3 + $0xdf] sm:$0xfe] %vm1237_vm8, %v1566_v15 }
 0x237   : > { %1612 = vst.msk [vmem:[#allocation3 + $0xf7] sm:$0xff] %vm4343_vm0, %v1567_v11 }
 0x238   : > { %1659 = vst.msk [vmem:[#allocation3 + $0xe7] sm:$0xff] %vm629_vm7, %v1567_v11 }
 0x239   : > { %1629 = vst.msk [vmem:[#allocation3 + $0xf9] sm:$0x7f] %vm500_vm4, %v1569_v19  ;;  %vm4349_vm4 = vmmov %vm4341_vm3 }
 0x23a   : > { %1678 = vst.msk [vmem:[#allocation3 + $0xe9] sm:$0x7f] %vm696_vm13, %v1569_v19  ;;  %vm4350_vm13 = vmmov %vm4342_vm10 }
 0x23b   : > { %1628 = vst.msk [vmem:[#allocation3 + $0xf1] sm:$0xff] %vm4346_vm14, %v1568_v21  ;;  %v1962_v25 = vld [vmem:[#allocation3 + $0xd0] sm:$0xff]  ;;  %v1963_v26 = vld [vmem:[#allocation3 + $0xd8] sm:$0xff] }
 0x23c   : > { %1677 = vst.msk [vmem:[#allocation3 + $0xe1] sm:$0xff] %vm4347_vm15, %v1568_v21 }
 0x23d   : > { %1644 = vst.msk [vmem:[#allocation3 + $0xf0] sm:$0xff] %vm564_vm5, %v1568_v21  ;;  %1645 = vst.msk [vmem:[#allocation3 + $0xf8] sm:$0xff] %vm564_vm5, %v1569_v19 }
 0x23e   : > { %1693 = vst.msk [vmem:[#allocation3 + $0xe0] sm:$0xff] %vm4339_vm2, %v1568_v21  ;;  %vm4353_vm5 = vmmov %vm4344_vm6 }
 0x23f   : > { %1694 = vst.msk [vmem:[#allocation3 + $0xe8] sm:$0xff] %vm4348_vm1, %v1569_v19  ;;  %2661 = vmatmul.mubr.msk.f32.gmra.mrb[24].mxu1 %vm4353_vm5, %v1961_v24  ;;  %vm4354_vm3 = vmmov %vm4353_vm5 }
 0x240   : > { %1660 = vst.msk [vmem:[#allocation3 + $0xef] sm:$0xfe] %vm1237_vm8, %v1568_v21  ;;  %2663 = vmatprep.mubr.msk.f32.mxu1 %vm4354_vm3, %v1962_v25  ;;  %vm4355_vm8 = vmmov %vm4354_vm3 }
 0x241   : > { %1661 = vst.msk [vmem:[#allocation3 + $0xf7] sm:$0xff] %vm629_vm7, %v1569_v19  ;;  %vm4356_vm7 = vmmov %vm4354_vm3 }
 0x242   : > { %1709 = vst.msk [vmem:[#allocation3 + $0xdf] sm:$0xfe] %vm4349_vm4, %v1568_v21  ;;  %vm4357_vm10 = vmmov %vm4354_vm3 }
 0x243   : > { %1710 = vst.msk [vmem:[#allocation3 + $0xe7] sm:$0xff] %vm4350_vm13, %v1569_v19  ;;  %2664 = vmatmul.mubr.msk.f32.gmra.mrb[26].mxu1 %vm4355_vm8, %v1963_v26  ;;  %vm4358_vm0 = vmmov %vm4354_vm3 }
 0x244   : > { %vm4359_vm6 = vmmov %vm4358_vm0 }
 0x248   : > { %v1966_v29 = vld [vmem:[#allocation3 + $0xf0] sm:$0xff]  ;;  %v1967_v30 = vld [vmem:[#allocation3 + $0xf8] sm:$0xff] }
 0x24a   : > { %v1964_v27 = vld [vmem:[#allocation3 + $0xe0] sm:$0xff]  ;;  %v1965_v28 = vld [vmem:[#allocation3 + $0xe8] sm:$0xff] }
 0x24b   : > { %2666 = vmatprep.mubr.msk.f32.mxu1 %vm4356_vm7, %v1964_v27 }
 0x24c   : > { %2667 = vmatmul.mubr.msk.f32.gmra.mrb[28].mxu1 %vm4357_vm10, %v1965_v28 }
 0x24d   : > { %2669 = vmatprep.mubr.msk.f32.mxu1 %vm4358_vm0, %v1966_v29 }
 0x250   : > { %2670 = vmatmul.mubr.msk.f32.gmra.mrb[30].mxu1 %vm4359_vm6, %v1967_v30 }
 0x25f   : > { %v2616_v32 = vpop.f32.mrb[16].mxu0 }
 0x260   : > { %v1862_v33 = vadd.f32 %v2616_v32, %v4034_v31  ;;  %v1856_v34 = vpop.f32.mrb[17].mxu0 }
 0x261   : > { %v1857_v35 = vadd.f32 %v4034_v31, %v1856_v34 }
 0x262   : > { %1937 = vst.msk [vmem:[%s4039_s25 + $0x8] sm:$0xff] %vm1935_vm11, %v1862_v33 }
 0x263   : > { %1936 = vst.msk [vmem:[%s4039_s25] sm:$0xff] %vm1935_vm11, %v1857_v35 }
 0x26f   : > { %v2619_v36 = vpop.f32.mrb[18].mxu0 }
 0x270   : > { %v1872_v37 = vadd.f32 %v2619_v36, %v4034_v31  ;;  %v1866_v38 = vpop.f32.mrb[19].mxu0 }
 0x271   : > { %v1867_v39 = vadd.f32 %v4034_v31, %v1866_v38 }
 0x272   : > { %1939 = vst.msk [vmem:[%s4039_s25 + $0x18] sm:$0xff] %vm1935_vm11, %v1872_v37 }
 0x273   : > { %1938 = vst.msk [vmem:[%s4039_s25 + $0x10] sm:$0xff] %vm1935_vm11, %v1867_v39 }
 0x282   : > { %v2622_v40 = vpop.f32.mrb[20].mxu0 }
 0x283   : > { %v1882_v41 = vadd.f32 %v2622_v40, %v4034_v31  ;;  %v1876_v42 = vpop.f32.mrb[21].mxu0 }
 0x284   : > { %v1877_v43 = vadd.f32 %v4034_v31, %v1876_v42 }
 0x285   : > { %1941 = vst.msk [vmem:[%s4039_s25 + $0x28] sm:$0xff] %vm1935_vm11, %v1882_v41 }
 0x286   : > { %1940 = vst.msk [vmem:[%s4039_s25 + $0x20] sm:$0xff] %vm1935_vm11, %v1877_v43 }
 0x293   : > { %v2625_v44 = vpop.f32.mrb[22].mxu0 }
 0x294   : > { %v1892_v45 = vadd.f32 %v2625_v44, %v4034_v31  ;;  %v1886_v46 = vpop.f32.mrb[23].mxu0 }
 0x295   : > { %v1887_v47 = vadd.f32 %v4034_v31, %v1886_v46 }
 0x296   : > { %1943 = vst.msk [vmem:[%s4039_s25 + $0x38] sm:$0xff] %vm1935_vm11, %v1892_v45 }
 0x297   : > { %1942 = vst.msk [vmem:[%s4039_s25 + $0x30] sm:$0xff] %vm1935_vm11, %v1887_v47  ;;  %v2628_v48 = vpop.f32.mrb[24].mxu0 }
 0x298   : > { %v1902_v49 = vadd.f32 %v2628_v48, %v4034_v31  ;;  %v1896_v50 = vpop.f32.mrb[25].mxu0 }
 0x299   : > { %v1897_v51 = vadd.f32 %v4034_v31, %v1896_v50 }
 0x29a   : > { %1945 = vst.msk [vmem:[%s4039_s25 + $0x48] sm:$0xff] %vm1935_vm11, %v1902_v49 }
 0x29b   : > { %1944 = vst.msk [vmem:[%s4039_s25 + $0x40] sm:$0xff] %vm1935_vm11, %v1897_v51 }
 0x2b9   : > { %v2631_v52 = vpop.f32.mrb[26].mxu0 }
 0x2ba   : > { %v1912_v53 = vadd.f32 %v2631_v52, %v4034_v31  ;;  %v1906_v54 = vpop.f32.mrb[27].mxu0 }
 0x2bb   : > { %v1907_v55 = vadd.f32 %v4034_v31, %v1906_v54 }
 0x2bc   : > { %1947 = vst.msk [vmem:[%s4039_s25 + $0x58] sm:$0xff] %vm1935_vm11, %v1912_v53 }
 0x2bd   : > { %1946 = vst.msk [vmem:[%s4039_s25 + $0x50] sm:$0xff] %vm1935_vm11, %v1907_v55 }
 0x2ca   : > { %v2634_v56 = vpop.f32.mrb[28].mxu0 }
 0x2cb   : > { %v1922_v57 = vadd.f32 %v2634_v56, %v4034_v31  ;;  %v1916_v58 = vpop.f32.mrb[29].mxu0 }
 0x2cc   : > { %v1917_v59 = vadd.f32 %v4034_v31, %v1916_v58 }
 0x2cd   : > { %1949 = vst.msk [vmem:[%s4039_s25 + $0x68] sm:$0xff] %vm1935_vm11, %v1922_v57 }
 0x2ce   : > { %1948 = vst.msk [vmem:[%s4039_s25 + $0x60] sm:$0xff] %vm1935_vm11, %v1917_v59 }
 0x2da   : > { %v2637_v60 = vpop.f32.mrb[30].mxu0 }
 0x2db   : > { %v1932_v62 = vadd.f32 %v2637_v60, %v4034_v31  ;;  %v1926_v63 = vpop.f32.mrb[31].mxu0 }
 0x2dc   : > { %v1927_v0 = vadd.f32 %v4034_v31, %v1926_v63 }
 0x2dd   : > { %1951 = vst.msk [vmem:[%s4039_s25 + $0x78] sm:$0xff] %vm1935_vm11, %v1932_v62 }
 0x2de   : > { %v2650_v1 = vpop.f32.mrb[16].mxu1  ;;  %1950 = vst.msk [vmem:[%s4039_s25 + $0x70] sm:$0xff] %vm1935_vm11, %v1927_v0 }
 0x2df   : > { %v2103_v2 = vadd.f32 %v2650_v1, %v4034_v31  ;;  %v2097_v3 = vpop.f32.mrb[17].mxu1 }
 0x2e0   : > { %v2098_v4 = vadd.f32 %v4034_v31, %v2097_v3 }
 0x2e1   : > { %2433 = vst.msk [vmem:[%s4039_s25 + $0x88] sm:$0xff] %vm1935_vm11, %v2103_v2 }
 0x2e2   : > { %2432 = vst.msk [vmem:[%s4039_s25 + $0x80] sm:$0xff] %vm1935_vm11, %v2098_v4 }
 0x2f1   : > { %v2653_v5 = vpop.f32.mrb[18].mxu1 }
 0x2f2   : > { %v2113_v6 = vadd.f32 %v2653_v5, %v4034_v31  ;;  %v2107_v7 = vpop.f32.mrb[19].mxu1 }
 0x2f3   : > { %v2108_v8 = vadd.f32 %v4034_v31, %v2107_v7 }
 0x2f4   : > { %2435 = vst.msk [vmem:[%s4039_s25 + $0x98] sm:$0xff] %vm1935_vm11, %v2113_v6 }
 0x2f5   : > { %2434 = vst.msk [vmem:[%s4039_s25 + $0x90] sm:$0xff] %vm1935_vm11, %v2108_v8 }
 0x303   : > { %v2656_v9 = vpop.f32.mrb[20].mxu1 }
 0x304   : > { %v2123_v10 = vadd.f32 %v2656_v9, %v4034_v31  ;;  %v2117_v11 = vpop.f32.mrb[21].mxu1 }
 0x305   : > { %v2118_v12 = vadd.f32 %v4034_v31, %v2117_v11 }
 0x306   : > { %2437 = vst.msk [vmem:[%s4039_s25 + $0xa8] sm:$0xff] %vm1935_vm11, %v2123_v10 }
 0x307   : > { %2436 = vst.msk [vmem:[%s4039_s25 + $0xa0] sm:$0xff] %vm1935_vm11, %v2118_v12  ;;  %v2659_v13 = vpop.f32.mrb[22].mxu1 }
 0x308   : > { %v2133_v14 = vadd.f32 %v2659_v13, %v4034_v31  ;;  %v2127_v15 = vpop.f32.mrb[23].mxu1 }
 0x309   : > { %v2128_v16 = vadd.f32 %v4034_v31, %v2127_v15 }
 0x30a   : > { %2439 = vst.msk [vmem:[%s4039_s25 + $0xb8] sm:$0xff] %vm1935_vm11, %v2133_v14 }
 0x30b   : > { %2438 = vst.msk [vmem:[%s4039_s25 + $0xb0] sm:$0xff] %vm1935_vm11, %v2128_v16 }
 0x312   : > { %v2662_v17 = vpop.f32.mrb[24].mxu1 }
 0x313   : > { %v2143_v61 = vadd.f32 %v2662_v17, %v4034_v31  ;;  %v2137_v18 = vpop.f32.mrb[25].mxu1 }
 0x314   : > { %v2138_v19 = vadd.f32 %v4034_v31, %v2137_v18 }
 0x315   : > { %2441 = vst.msk [vmem:[%s4039_s25 + $0xc8] sm:$0xff] %vm1935_vm11, %v2143_v61 }
 0x316   : > { %2440 = vst.msk [vmem:[%s4039_s25 + $0xc0] sm:$0xff] %vm1935_vm11, %v2138_v19  ;;  %v2665_v20 = vpop.f32.mrb[26].mxu1 }
 0x317   : > { %v2153_v21 = vadd.f32 %v2665_v20, %v4034_v31  ;;  %v2147_v22 = vpop.f32.mrb[27].mxu1 }
 0x318   : > { %v2148_v23 = vadd.f32 %v4034_v31, %v2147_v22 }
 0x319   : > { %2443 = vst.msk [vmem:[%s4039_s25 + $0xd8] sm:$0xff] %vm1935_vm11, %v2153_v21 }
 0x31a   : > { %2442 = vst.msk [vmem:[%s4039_s25 + $0xd0] sm:$0xff] %vm1935_vm11, %v2148_v23 }
 0x31f   : > { %v2668_v24 = vpop.f32.mrb[28].mxu1 }
 0x320   : > { %v2163_v25 = vadd.f32 %v2668_v24, %v4034_v31  ;;  %v2157_v26 = vpop.f32.mrb[29].mxu1 }
 0x321   : > { %v2158_v27 = vadd.f32 %v4034_v31, %v2157_v26 }
 0x322   : > { %2445 = vst.msk [vmem:[%s4039_s25 + $0xe8] sm:$0xff] %vm1935_vm11, %v2163_v25 }
 0x323   : > { %2444 = vst.msk [vmem:[%s4039_s25 + $0xe0] sm:$0xff] %vm1935_vm11, %v2158_v27  ;;  %v2671_v28 = vpop.f32.mrb[30].mxu1 }
 0x324   : > { %v2173_v29 = vadd.f32 %v2671_v28, %v4034_v31  ;;  %v2167_v30 = vpop.f32.mrb[31].mxu1 }
 0x325   : > { %v2168_v32 = vadd.f32 %v4034_v31, %v2167_v30 }
 0x326   : > { %2447 = vst.msk [vmem:[%s4039_s25 + $0xf8] sm:$0xff] %vm1935_vm11, %v2173_v29 }
 0x327   : > { %2446 = vst.msk [vmem:[%s4039_s25 + $0xf0] sm:$0xff] %vm1935_vm11, %v2168_v32 }
 0x328 PF: > { %p15_p8 = scmp.ge.s32.totalorder %s2868_s23, 4   ;;  %s4360_s18 = smov %s2802_s19 }
 0x329   : > { %s4361_s19 = smov %s2806_s20  ;;  %s4362_s20 = smov %s2878_s26 }
 0x32a   : > { %s4363_s21 = smov %s2868_s23  ;;  %17 = sbr.rel (!%p15_p8) target bundleno = 3 (0x3), region = 90 }
 0x331   :  { %2214 = vsyncpa [#allocation5], 1 }
 0x332   :  { %2216 = vsyncpa [#allocation5 + $0x1], 1 }

</bundles_post_ra>
